<compile_context>
chip_gen: v7x
topology: tpu7x:2x2x1
jax: 0.10.0
libtpu: 0.0.40
codegen_flags: <defaults>
</compile_context>

<pallas_src>
import functools

import jax
import jax.numpy as jnp
from jax.experimental import pallas as pl
from jax.experimental.pallas import tpu as pltpu


_TAPS = tuple((dy, dx) for dy in (-1, 0, 1) for dx in (-1, 0, 1))


# ----------------------------------------------------------------------------
# In-kernel helpers
# ----------------------------------------------------------------------------
def _shift(m, s):
    """Pure sublane shift of a row-major flattened (H*W, C) map, zero fill."""
    if s == 0:
        return m
    rows, cols = m.shape
    z = jnp.zeros((abs(s), cols), m.dtype)
    if s > 0:
        return jnp.concatenate([m[s:, :], z], axis=0)
    return jnp.concatenate([z, m[: rows + s, :]], axis=0)


def _maxpool_phase(y1_img, mask_r, m2, width):
    """3x3/s2/p1 maxpool of a conv1 map whose rows are phase-ordered (A;B;C;D).

    A[i,j]=Y[2i,2j], B=Y[2i,2j+1], C=Y[2i+1,2j], D=Y[2i+1,2j+1].  The 9 window
    taps are the 4 phase maps plus 5 small shifts of them.  dx=-1 taps use a
    source pre-masked in its last column so the shift needs no post-masking;
    out-of-image taps become 0, which is safe post-ReLU.
    """
    ph_a = y1_img[0 * m2:1 * m2, :]
    ph_b = y1_img[1 * m2:2 * m2, :]
    ph_c = y1_img[2 * m2:3 * m2, :]
    ph_d = y1_img[3 * m2:4 * m2, :]
    mp = jnp.maximum(jnp.maximum(ph_a, ph_b), jnp.maximum(ph_c, ph_d))
    ph_b_m = jnp.where(mask_r, ph_b, 0.0)
    ph_d_m = jnp.where(mask_r, ph_d, 0.0)
    mp = jnp.maximum(mp, _shift(ph_b_m, -1))           # Y[2i,   2j-1]
    mp = jnp.maximum(mp, _shift(ph_c, -width))         # Y[2i-1, 2j  ]
    mp = jnp.maximum(mp, _shift(ph_d_m, -width - 1))   # Y[2i-1, 2j-1]
    mp = jnp.maximum(mp, _shift(ph_d, -width))         # Y[2i-1, 2j+1]
    mp = jnp.maximum(mp, _shift(ph_d_m, -1))           # Y[2i+1, 2j-1]
    return mp


def _tap_concat(m_f32, mask_l, mask_r, width):
    """9-tap shifted im2col of a (H*W, C) f32 map -> (H*W, 9*C) bf16.

    Masking is done once per dx value on the f32 map (3 variants, 3 bf16
    casts); each of the 9 taps is then a pure sublane shift and all taps are
    concatenated along the lane/K axis so the 3x3 conv is ONE K=9*C matmul.
    """
    v = {0: m_f32.astype(jnp.bfloat16),
         1: jnp.where(mask_l, m_f32, 0.0).astype(jnp.bfloat16),   # dx = +1
         -1: jnp.where(mask_r, m_f32, 0.0).astype(jnp.bfloat16)}  # dx = -1
    return jnp.concatenate(
        [_shift(v[dx], dy * width + dx) for (dy, dx) in _TAPS], axis=-1)


def _fused_stem_block_kernel(p1_ref, w1_ref, b1_ref, w2_ref, b2_ref,
                             w3_ref, b3_ref, o_ref, *, pool_h, pool_w, bpb):
    """conv1+bn+relu -> maxpool -> BasicBlock for `bpb` images, all in VMEM."""
    m2 = pool_h * pool_w
    m1 = 4 * m2
    cout = w1_ref.shape[1]

    # ---- conv1 (7x7/s2, BN folded, ReLU): one batched im2col matmul --------
    p1 = p1_ref[...].reshape(bpb * m1, p1_ref.shape[-1])
    y1 = jnp.dot(p1, w1_ref[...], preferred_element_type=jnp.float32)
    y1 = jnp.maximum(y1 + b1_ref[...], 0.0)          # (bpb*m1, C), phase-ordered

    # ---- column masks, hoisted: built once, reused by pool + both convs ----
    col = jax.lax.broadcasted_iota(jnp.int32, (m2, cout), 0) % pool_w
    mask_l = col > 0               # pre-mask for dx=+1 taps (zeros column 0)
    mask_r = col < pool_w - 1      # pre-mask for dx=-1 taps (zeros last column)

    # ---- maxpool 3x3/s2/p1 + 9-tap im2col of the pooled map ----------------
    mp_list, xcat_list = [], []
    for b in range(bpb):
        y1_img = y1[b * m1:(b + 1) * m1, :]
        mp = _maxpool_phase(y1_img, mask_r, m2, pool_w)
        mp_list.append(mp)
        xcat_list.append(_tap_concat(mp, mask_l, mask_r, pool_w))
    mp_all = mp_list[0] if bpb == 1 else jnp.concatenate(mp_list, axis=0)
    xcat = xcat_list[0] if bpb == 1 else jnp.concatenate(xcat_list, axis=0)

    # ---- BasicBlock conv1 (3x3/s1/p1) + BN + ReLU: single K=9*C matmul -----
    z = jnp.dot(xcat, w2_ref[...], preferred_element_type=jnp.float32)
    z = jnp.maximum(z + b2_ref[...], 0.0)

    zcat_list = []
    for b in range(bpb):
        zcat_list.append(
            _tap_concat(z[b * m2:(b + 1) * m2, :], mask_l, mask_r, pool_w))
    zcat = zcat_list[0] if bpb == 1 else jnp.concatenate(zcat_list, axis=0)

    # ---- BasicBlock conv2 + BN + residual (f32 pooled map) + ReLU ----------
    out = jnp.dot(zcat, w3_ref[...], preferred_element_type=jnp.float32)
    out = jnp.maximum(out + b3_ref[...] + mp_all, 0.0)
    o_ref[...] = out.reshape(bpb, m2, cout).astype(o_ref.dtype)


# ----------------------------------------------------------------------------
# Host-side wrapper (lean XLA prep + one pallas_call)
# ----------------------------------------------------------------------------
def bn_fold(gamma, beta, mean, var, eps=1e-5):
    scale = gamma / jnp.sqrt(var + eps)
    bias = beta - mean * scale
    return scale, bias


def _conv1_patches(x_nchw, h2, w2, k_pad):
    """Phase-ordered, K-padded, bf16 im2col for conv1 (7x7 / stride 2 / pad 3).

    Rows come out ordered (row-phase, col-phase, i, j) so the kernel's maxpool
    can phase-split with plain static slices.  Slices are emitted directly in
    that order and concatenated once per phase (no stack / 6-D transpose).
    """
    n, cin, _, _ = x_nchw.shape
    k1 = 49 * cin
    x = jnp.transpose(x_nchw.astype(jnp.bfloat16), (0, 2, 3, 1))      # NHWC
    xp = jnp.pad(x, ((0, 0), (3, 3), (3, 3), (0, 0)))
    phases = []
    for p in (0, 1):
        for q in (0, 1):
            cols = []
            for dy in range(7):
                for dx in range(7):
                    y0, x0 = 2 * p + dy, 2 * q + dx
                    cols.append(jax.lax.slice(
                        xp, (0, y0, x0, 0),
                        (n, y0 + 4 * (h2 - 1) + 1, x0 + 4 * (w2 - 1) + 1, cin),
                        (1, 4, 4, 1)))
            if k_pad > k1:   # fold the K zero-padding into the same concat
                cols.append(jnp.zeros((n, h2, w2, k_pad - k1), jnp.bfloat16))
            phases.append(jnp.concatenate(cols, axis=-1).reshape(n, h2 * w2, k_pad))
    return jnp.concatenate(phases, axis=1)                            # (n, 4*h2*w2, k_pad)


def _num_grid_blocks(n):
    """2 parallel blocks on 2-TensorCore chips (v7x), else fold batch into 1."""
    try:
        kind = jax.devices()[0].device_kind.lower()
    except Exception:  # pragma: no cover - be conservative
        kind = ""
    if ("v7" in kind or "7x" in kind) and n >= 2 and n % 2 == 0:
        return 2
    return 1


def net_forward(x_nchw, params):
    n, cin, h, w = x_nchw.shape
    # conv1 geometry: 7x7, stride 2, pad 3
    h1 = (h + 2 * 3 - 7) // 2 + 1
    w1 = (w + 2 * 3 - 7) // 2 + 1
    assert h1 % 2 == 0 and w1 % 2 == 0, "phase-split maxpool needs even conv1 output"
    h2, w2 = h1 // 2, w1 // 2                 # maxpool / BasicBlock spatial dims
    m1, m2 = h1 * w1, h2 * w2
    k1 = 7 * 7 * cin
    k1p = ((k1 + 127) // 128) * 128           # conv1 K padded to a lane-tile multiple
    cout = params["conv1_w"].shape[0]

    # ---- conv1 im2col: phase-ordered, bf16, K zero-padded --------------------
    p1 = _conv1_patches(x_nchw, h2, w2, k1p)

    # ---- BN folded into weights (scale) + per-channel bias -------------------
    def fold(w_oihw, bn):
        scale, bias = bn_fold(*bn)
        o = w_oihw.shape[0]
        wm = jnp.transpose(w_oihw, (2, 3, 1, 0)).reshape(-1, o)   # (kh*kw*ci, o)
        return ((wm * scale[None, :]).astype(jnp.bfloat16),
                bias.reshape(1, o).astype(jnp.float32))

    w1m, b1 = fold(params["conv1_w"], params["bn1"])
    w1m = jnp.pad(w1m, ((0, k1p - k1), (0, 0)))                   # (k1p, cout)
    w2m, b2 = fold(params["blk_conv1_w"], params["blk_bn1"])      # (9*cout, cout)
    w3m, b3 = fold(params["blk_conv2_w"], params["blk_bn2"])      # (9*cout, cout)

    g = _num_grid_blocks(n)
    bpb = n // g

    kernel = functools.partial(_fused_stem_block_kernel,
                               pool_h=h2, pool_w=w2, bpb=bpb)
    flops = 2 * n * (m1 * k1p * cout + 2 * m2 * (9 * cout) * cout)
    bytes_accessed = ((p1.size + w1m.size + w2m.size + w3m.size) * 2
                      + (b1.size + b2.size + b3.size) * 4
                      + n * m2 * cout * 4)

    out = pl.pallas_call(
        kernel,
        out_shape=jax.ShapeDtypeStruct((n, m2, cout), jnp.float32),
        grid=(g,),
        in_specs=[
            pl.BlockSpec((bpb, m1, k1p), lambda b: (b, 0, 0)),
            pl.BlockSpec((k1p, cout), lambda b: (0, 0)),
            pl.BlockSpec((1, cout), lambda b: (0, 0)),
            pl.BlockSpec((9 * cout, cout), lambda b: (0, 0)),
            pl.BlockSpec((1, cout), lambda b: (0, 0)),
            pl.BlockSpec((9 * cout, cout), lambda b: (0, 0)),
            pl.BlockSpec((1, cout), lambda b: (0, 0)),
        ],
        out_specs=pl.BlockSpec((bpb, m2, cout), lambda b: (b, 0, 0)),
        compiler_params=pltpu.CompilerParams(
            dimension_semantics=("parallel",)),
        cost_estimate=pl.CostEstimate(
            flops=int(flops), transcendentals=0,
            bytes_accessed=int(bytes_accessed)),
    )(p1, w1m, b1, w2m, b2, w3m, b3)

    return jnp.transpose(out.reshape(n, h2, w2, cout), (0, 3, 1, 2))   # NCHW


# ----------------------------------------------------------------------------
# Pure-JAX reference (f32, HIGHEST precision) for the correctness check
# ----------------------------------------------------------------------------
def reference_forward(x_nchw, params):
    def conv(x, w, stride, pad):
        return jax.lax.conv_general_dilated(
            x,
            jnp.transpose(w, (2, 3, 1, 0)),  # OIHW -> HWIO
            window_strides=(stride, stride),
            padding=((pad, pad), (pad, pad)),
            dimension_numbers=("NHWC", "HWIO", "NHWC"),
            precision=jax.lax.Precision.HIGHEST,
        )

    def bn(x, bnp):
        s, b = bn_fold(*bnp)
        return x * s + b

    x = jnp.transpose(x_nchw, (0, 2, 3, 1))
    y = jax.nn.relu(bn(conv(x, params["conv1_w"], 2, 3), params["bn1"]))
    y = jax.lax.reduce_window(
        y, -jnp.inf, jax.lax.max,
        (1, 3, 3, 1), (1, 2, 2, 1), ((0, 0), (1, 1), (1, 1), (0, 0)))
    identity = y
    z = jax.nn.relu(bn(conv(y, params["blk_conv1_w"], 1, 1), params["blk_bn1"]))
    z = bn(conv(z, params["blk_conv2_w"], 1, 1), params["blk_bn2"]) + identity
    z = jax.nn.relu(z)
    return jnp.transpose(z, (0, 3, 1, 2))


# ----------------------------------------------------------------------------
# Deterministic parameter initialization (synthetic, matching module shapes)
# ----------------------------------------------------------------------------
def init_params():
    keys = jax.random.split(jax.random.PRNGKey(42), 16)
    f32 = jnp.float32

    def bn_params(k0, k1, k2, k3, c):
        gamma = 1.0 + 0.1 * jax.random.normal(k0, (c,), f32)
        beta = 0.1 * jax.random.normal(k1, (c,), f32)
        mean = 0.1 * jax.random.normal(k2, (c,), f32)
        var = 1.0 + 0.2 * jax.random.uniform(k3, (c,), f32)
        return (gamma, beta, mean, var)

    return {
        "conv1_w": 0.05 * jax.random.normal(keys[0], (64, 3, 7, 7), f32),
        "bn1": bn_params(keys[1], keys[2], keys[3], keys[4], 64),
        "blk_conv1_w": 0.05 * jax.random.normal(keys[5], (64, 64, 3, 3), f32),
        "blk_bn1": bn_params(keys[6], keys[7], keys[8], keys[9], 64),
        "blk_conv2_w": 0.05 * jax.random.normal(keys[10], (64, 64, 3, 3), f32),
        "blk_bn2": bn_params(keys[11], keys[12], keys[13], keys[14], 64),
    }


if __name__ == "__main__":
    params = init_params()
    x = jax.random.normal(jax.random.PRNGKey(0), (2, 3, 32, 32), jnp.float32)

    out = jax.block_until_ready(jax.jit(net_forward)(x, params))
    assert out.shape == (2, 64, 8, 8), out.shape

    ref = jax.block_until_ready(reference_forward(x, params))
    err = float(jnp.max(jnp.abs(out - ref)))
    # bf16 MXU inputs (f32 accumulation) vs an f32 HIGHEST-precision reference.
    assert err < 3e-2, f"max abs error vs reference: {err}"

    print("KERNEL_OK")
</pallas_src>

<mosaic_0001>
module attributes {stable_mosaic.version = 11 : i64} {
  func.func @_fused_stem_block_kernel(%arg0: i32, %arg1: memref<2x256x256xbf16, #tpu.memory_space<vmem>>, %arg2: memref<256x64xbf16, #tpu.memory_space<vmem>>, %arg3: memref<1x64xf32, #tpu.memory_space<vmem>>, %arg4: memref<576x64xbf16, #tpu.memory_space<vmem>>, %arg5: memref<1x64xf32, #tpu.memory_space<vmem>>, %arg6: memref<576x64xbf16, #tpu.memory_space<vmem>>, %arg7: memref<1x64xf32, #tpu.memory_space<vmem>>, %arg8: memref<2x64x64xf32, #tpu.memory_space<vmem>>) attributes {dimension_semantics = [#tpu.dimension_semantics<parallel>], iteration_bounds = array<i64: 1>, scalar_prefetch = 0 : i64, scratch_operands = 0 : i64, tpu.core_type = #tpu.core_type<tc>, window_params = [{transform_indices = @transform_0, window_bounds = array<i64: 2, 256, 256>}, {pipeline_mode = #tpu.pipeline_mode<synchronous>, transform_indices = @transform_1, window_bounds = array<i64: 256, 64>}, {pipeline_mode = #tpu.pipeline_mode<synchronous>, transform_indices = @transform_2, window_bounds = array<i64: 1, 64>}, {pipeline_mode = #tpu.pipeline_mode<synchronous>, transform_indices = @transform_3, window_bounds = array<i64: 576, 64>}, {pipeline_mode = #tpu.pipeline_mode<synchronous>, transform_indices = @transform_4, window_bounds = array<i64: 1, 64>}, {pipeline_mode = #tpu.pipeline_mode<synchronous>, transform_indices = @transform_5, window_bounds = array<i64: 576, 64>}, {pipeline_mode = #tpu.pipeline_mode<synchronous>, transform_indices = @transform_6, window_bounds = array<i64: 1, 64>}, {transform_indices = @transform_7, window_bounds = array<i64: 2, 64, 64>}]} {
    %c0 = arith.constant 0 : index
    %c0_0 = arith.constant 0 : index
    %c0_1 = arith.constant 0 : index
    %0 = vector.load %arg1[%c0, %c0_0, %c0_1] : memref<2x256x256xbf16, #tpu.memory_space<vmem>>, vector<2x256x256xbf16>
    %1 = vector.shape_cast %0 : vector<2x256x256xbf16> to vector<512x256xbf16>
    %c0_2 = arith.constant 0 : index
    %c0_3 = arith.constant 0 : index
    %2 = vector.load %arg2[%c0_2, %c0_3] : memref<256x64xbf16, #tpu.memory_space<vmem>>, vector<256x64xbf16>
    %cst = arith.constant dense<0.000000e+00> : vector<512x64xf32>
    %3 = tpu.matmul %1, %2, %cst {dimension_numbers = #tpu.dot_dimension_numbers<[1], [0], [0], [1], [0, 0, 1, 1], [], []>} : vector<512x256xbf16>, vector<256x64xbf16>, vector<512x64xf32> -> vector<512x64xf32>
    %c0_4 = arith.constant 0 : index
    %c0_5 = arith.constant 0 : index
    %4 = vector.load %arg3[%c0_4, %c0_5] : memref<1x64xf32, #tpu.memory_space<vmem>>, vector<1x64xf32>
    %5 = vector.broadcast %4 : vector<1x64xf32> to vector<512x64xf32>
    %6 = arith.addf %3, %5 : vector<512x64xf32>
    %cst_6 = arith.constant 0.000000e+00 : f32
    %7 = vector.broadcast %cst_6 : f32 to vector<512x64xf32>
    %8 = arith.maximumf %6, %7 : vector<512x64xf32>
    %9 = tpu.iota {dimensions = array<i32: 0>} : vector<64x64xi32>
    %c8_i32 = arith.constant 8 : i32
    %c0_i32 = arith.constant 0 : i32
    %10 = arith.cmpi eq, %c8_i32, %c0_i32 : i32
    %c1_i32 = arith.constant 1 : i32
    %11 = arith.select %10, %c1_i32, %c8_i32 : i32
    %12 = vector.broadcast %11 : i32 to vector<64x64xi32>
    %13 = arith.remsi %9, %12 : vector<64x64xi32>
    %c0_i32_7 = arith.constant 0 : i32
    %14 = vector.broadcast %c0_i32_7 : i32 to vector<64x64xi32>
    %15 = arith.cmpi ne, %13, %14 : vector<64x64xi32>
    %c0_i32_8 = arith.constant 0 : i32
    %16 = vector.broadcast %c0_i32_8 : i32 to vector<64x64xi32>
    %17 = arith.cmpi slt, %13, %16 : vector<64x64xi32>
    %c0_i32_9 = arith.constant 0 : i32
    %18 = arith.cmpi slt, %11, %c0_i32_9 : i32
    %19 = vector.broadcast %18 : i1 to vector<64x64xi1>
    %20 = vector.broadcast %19 : vector<64x64xi1> to vector<64x64xi1>
    %21 = arith.xori %17, %20 : vector<64x64xi1>
    %22 = arith.andi %21, %15 : vector<64x64xi1>
    %23 = vector.broadcast %11 : i32 to vector<64x64xi32>
    %24 = arith.addi %13, %23 : vector<64x64xi32>
    %25 = arith.select %22, %24, %13 : vector<64x64xi1>, vector<64x64xi32>
    %c0_i32_10 = arith.constant 0 : i32
    %26 = vector.broadcast %c0_i32_10 : i32 to vector<64x64xi32>
    %27 = arith.cmpi sgt, %25, %26 : vector<64x64xi32>
    %c7_i32 = arith.constant 7 : i32
    %28 = vector.broadcast %c7_i32 : i32 to vector<64x64xi32>
    %29 = arith.cmpi slt, %25, %28 : vector<64x64xi32>
    %30 = vector.extract_strided_slice %8 {offsets = [0, 0], sizes = [256, 64], strides = [1, 1]} : vector<512x64xf32> to vector<256x64xf32>
    %31 = vector.extract_strided_slice %30 {offsets = [0, 0], sizes = [64, 64], strides = [1, 1]} : vector<256x64xf32> to vector<64x64xf32>
    %32 = vector.extract_strided_slice %30 {offsets = [64, 0], sizes = [64, 64], strides = [1, 1]} : vector<256x64xf32> to vector<64x64xf32>
    %33 = vector.extract_strided_slice %30 {offsets = [128, 0], sizes = [64, 64], strides = [1, 1]} : vector<256x64xf32> to vector<64x64xf32>
    %34 = vector.extract_strided_slice %30 {offsets = [192, 0], sizes = [64, 64], strides = [1, 1]} : vector<256x64xf32> to vector<64x64xf32>
    %35 = arith.maximumf %31, %32 : vector<64x64xf32>
    %36 = arith.maximumf %33, %34 : vector<64x64xf32>
    %37 = arith.maximumf %35, %36 : vector<64x64xf32>
    %cst_11 = arith.constant 0.000000e+00 : f32
    %38 = vector.broadcast %cst_11 : f32 to vector<64x64xf32>
    %39 = arith.select %29, %32, %38 : vector<64x64xi1>, vector<64x64xf32>
    %cst_12 = arith.constant 0.000000e+00 : f32
    %40 = vector.broadcast %cst_12 : f32 to vector<64x64xf32>
    %41 = arith.select %29, %34, %40 : vector<64x64xi1>, vector<64x64xf32>
    %cst_13 = arith.constant 0.000000e+00 : f32
    %42 = vector.broadcast %cst_13 : f32 to vector<1x64xf32>
    %43 = vector.extract_strided_slice %39 {offsets = [0, 0], sizes = [63, 64], strides = [1, 1]} : vector<64x64xf32> to vector<63x64xf32>
    %44 = tpu.concatenate %42, %43 in 0 : vector<1x64xf32>, vector<63x64xf32> -> vector<64x64xf32>
    %45 = arith.maximumf %37, %44 : vector<64x64xf32>
    %cst_14 = arith.constant 0.000000e+00 : f32
    %46 = vector.broadcast %cst_14 : f32 to vector<8x64xf32>
    %47 = vector.extract_strided_slice %33 {offsets = [0, 0], sizes = [56, 64], strides = [1, 1]} : vector<64x64xf32> to vector<56x64xf32>
    %48 = tpu.concatenate %46, %47 in 0 : vector<8x64xf32>, vector<56x64xf32> -> vector<64x64xf32>
    %49 = arith.maximumf %45, %48 : vector<64x64xf32>
    %cst_15 = arith.constant 0.000000e+00 : f32
    %50 = vector.broadcast %cst_15 : f32 to vector<9x64xf32>
    %51 = vector.extract_strided_slice %41 {offsets = [0, 0], sizes = [55, 64], strides = [1, 1]} : vector<64x64xf32> to vector<55x64xf32>
    %52 = tpu.concatenate %50, %51 in 0 : vector<9x64xf32>, vector<55x64xf32> -> vector<64x64xf32>
    %53 = arith.maximumf %49, %52 : vector<64x64xf32>
    %cst_16 = arith.constant 0.000000e+00 : f32
    %54 = vector.broadcast %cst_16 : f32 to vector<8x64xf32>
    %55 = vector.extract_strided_slice %34 {offsets = [0, 0], sizes = [56, 64], strides = [1, 1]} : vector<64x64xf32> to vector<56x64xf32>
    %56 = tpu.concatenate %54, %55 in 0 : vector<8x64xf32>, vector<56x64xf32> -> vector<64x64xf32>
    %57 = arith.maximumf %53, %56 : vector<64x64xf32>
    %cst_17 = arith.constant 0.000000e+00 : f32
    %58 = vector.broadcast %cst_17 : f32 to vector<1x64xf32>
    %59 = vector.extract_strided_slice %41 {offsets = [0, 0], sizes = [63, 64], strides = [1, 1]} : vector<64x64xf32> to vector<63x64xf32>
    %60 = tpu.concatenate %58, %59 in 0 : vector<1x64xf32>, vector<63x64xf32> -> vector<64x64xf32>
    %61 = arith.maximumf %57, %60 : vector<64x64xf32>
    %62 = arith.truncf %61 : vector<64x64xf32> to vector<64x64xbf16>
    %cst_18 = arith.constant 0.000000e+00 : f32
    %63 = vector.broadcast %cst_18 : f32 to vector<64x64xf32>
    %64 = arith.select %27, %61, %63 : vector<64x64xi1>, vector<64x64xf32>
    %65 = arith.truncf %64 : vector<64x64xf32> to vector<64x64xbf16>
    %cst_19 = arith.constant 0.000000e+00 : f32
    %66 = vector.broadcast %cst_19 : f32 to vector<64x64xf32>
    %67 = arith.select %29, %61, %66 : vector<64x64xi1>, vector<64x64xf32>
    %68 = arith.truncf %67 : vector<64x64xf32> to vector<64x64xbf16>
    %cst_20 = arith.constant 0.000000e+00 : bf16
    %69 = vector.broadcast %cst_20 : bf16 to vector<9x64xbf16>
    %70 = vector.extract_strided_slice %68 {offsets = [0, 0], sizes = [55, 64], strides = [1, 1]} : vector<64x64xbf16> to vector<55x64xbf16>
    %71 = tpu.concatenate %69, %70 in 0 : vector<9x64xbf16>, vector<55x64xbf16> -> vector<64x64xbf16>
    %cst_21 = arith.constant 0.000000e+00 : bf16
    %72 = vector.broadcast %cst_21 : bf16 to vector<8x64xbf16>
    %73 = vector.extract_strided_slice %62 {offsets = [0, 0], sizes = [56, 64], strides = [1, 1]} : vector<64x64xbf16> to vector<56x64xbf16>
    %74 = tpu.concatenate %72, %73 in 0 : vector<8x64xbf16>, vector<56x64xbf16> -> vector<64x64xbf16>
    %cst_22 = arith.constant 0.000000e+00 : bf16
    %75 = vector.broadcast %cst_22 : bf16 to vector<7x64xbf16>
    %76 = vector.extract_strided_slice %65 {offsets = [0, 0], sizes = [57, 64], strides = [1, 1]} : vector<64x64xbf16> to vector<57x64xbf16>
    %77 = tpu.concatenate %75, %76 in 0 : vector<7x64xbf16>, vector<57x64xbf16> -> vector<64x64xbf16>
    %cst_23 = arith.constant 0.000000e+00 : bf16
    %78 = vector.broadcast %cst_23 : bf16 to vector<1x64xbf16>
    %79 = vector.extract_strided_slice %68 {offsets = [0, 0], sizes = [63, 64], strides = [1, 1]} : vector<64x64xbf16> to vector<63x64xbf16>
    %80 = tpu.concatenate %78, %79 in 0 : vector<1x64xbf16>, vector<63x64xbf16> -> vector<64x64xbf16>
    %cst_24 = arith.constant 0.000000e+00 : bf16
    %81 = vector.broadcast %cst_24 : bf16 to vector<1x64xbf16>
    %82 = vector.extract_strided_slice %65 {offsets = [1, 0], sizes = [63, 64], strides = [1, 1]} : vector<64x64xbf16> to vector<63x64xbf16>
    %83 = tpu.concatenate %82, %81 in 0 : vector<63x64xbf16>, vector<1x64xbf16> -> vector<64x64xbf16>
    %cst_25 = arith.constant 0.000000e+00 : bf16
    %84 = vector.broadcast %cst_25 : bf16 to vector<7x64xbf16>
    %85 = vector.extract_strided_slice %68 {offsets = [7, 0], sizes = [57, 64], strides = [1, 1]} : vector<64x64xbf16> to vector<57x64xbf16>
    %86 = tpu.concatenate %85, %84 in 0 : vector<57x64xbf16>, vector<7x64xbf16> -> vector<64x64xbf16>
    %cst_26 = arith.constant 0.000000e+00 : bf16
    %87 = vector.broadcast %cst_26 : bf16 to vector<8x64xbf16>
    %88 = vector.extract_strided_slice %62 {offsets = [8, 0], sizes = [56, 64], strides = [1, 1]} : vector<64x64xbf16> to vector<56x64xbf16>
    %89 = tpu.concatenate %88, %87 in 0 : vector<56x64xbf16>, vector<8x64xbf16> -> vector<64x64xbf16>
    %cst_27 = arith.constant 0.000000e+00 : bf16
    %90 = vector.broadcast %cst_27 : bf16 to vector<9x64xbf16>
    %91 = vector.extract_strided_slice %65 {offsets = [9, 0], sizes = [55, 64], strides = [1, 1]} : vector<64x64xbf16> to vector<55x64xbf16>
    %92 = tpu.concatenate %91, %90 in 0 : vector<55x64xbf16>, vector<9x64xbf16> -> vector<64x64xbf16>
    %93 = tpu.concatenate %71, %74, %77, %80, %62, %83, %86, %89, %92 in 1 : vector<64x64xbf16>, vector<64x64xbf16>, vector<64x64xbf16>, vector<64x64xbf16>, vector<64x64xbf16>, vector<64x64xbf16>, vector<64x64xbf16>, vector<64x64xbf16>, vector<64x64xbf16> -> vector<64x576xbf16>
    %94 = vector.extract_strided_slice %8 {offsets = [256, 0], sizes = [256, 64], strides = [1, 1]} : vector<512x64xf32> to vector<256x64xf32>
    %95 = vector.extract_strided_slice %94 {offsets = [0, 0], sizes = [64, 64], strides = [1, 1]} : vector<256x64xf32> to vector<64x64xf32>
    %96 = vector.extract_strided_slice %94 {offsets = [64, 0], sizes = [64, 64], strides = [1, 1]} : vector<256x64xf32> to vector<64x64xf32>
    %97 = vector.extract_strided_slice %94 {offsets = [128, 0], sizes = [64, 64], strides = [1, 1]} : vector<256x64xf32> to vector<64x64xf32>
    %98 = vector.extract_strided_slice %94 {offsets = [192, 0], sizes = [64, 64], strides = [1, 1]} : vector<256x64xf32> to vector<64x64xf32>
    %99 = arith.maximumf %95, %96 : vector<64x64xf32>
    %100 = arith.maximumf %97, %98 : vector<64x64xf32>
    %101 = arith.maximumf %99, %100 : vector<64x64xf32>
    %cst_28 = arith.constant 0.000000e+00 : f32
    %102 = vector.broadcast %cst_28 : f32 to vector<64x64xf32>
    %103 = arith.select %29, %96, %102 : vector<64x64xi1>, vector<64x64xf32>
    %cst_29 = arith.constant 0.000000e+00 : f32
    %104 = vector.broadcast %cst_29 : f32 to vector<64x64xf32>
    %105 = arith.select %29, %98, %104 : vector<64x64xi1>, vector<64x64xf32>
    %cst_30 = arith.constant 0.000000e+00 : f32
    %106 = vector.broadcast %cst_30 : f32 to vector<1x64xf32>
    %107 = vector.extract_strided_slice %103 {offsets = [0, 0], sizes = [63, 64], strides = [1, 1]} : vector<64x64xf32> to vector<63x64xf32>
    %108 = tpu.concatenate %106, %107 in 0 : vector<1x64xf32>, vector<63x64xf32> -> vector<64x64xf32>
    %109 = arith.maximumf %101, %108 : vector<64x64xf32>
    %cst_31 = arith.constant 0.000000e+00 : f32
    %110 = vector.broadcast %cst_31 : f32 to vector<8x64xf32>
    %111 = vector.extract_strided_slice %97 {offsets = [0, 0], sizes = [56, 64], strides = [1, 1]} : vector<64x64xf32> to vector<56x64xf32>
    %112 = tpu.concatenate %110, %111 in 0 : vector<8x64xf32>, vector<56x64xf32> -> vector<64x64xf32>
    %113 = arith.maximumf %109, %112 : vector<64x64xf32>
    %cst_32 = arith.constant 0.000000e+00 : f32
    %114 = vector.broadcast %cst_32 : f32 to vector<9x64xf32>
    %115 = vector.extract_strided_slice %105 {offsets = [0, 0], sizes = [55, 64], strides = [1, 1]} : vector<64x64xf32> to vector<55x64xf32>
    %116 = tpu.concatenate %114, %115 in 0 : vector<9x64xf32>, vector<55x64xf32> -> vector<64x64xf32>
    %117 = arith.maximumf %113, %116 : vector<64x64xf32>
    %cst_33 = arith.constant 0.000000e+00 : f32
    %118 = vector.broadcast %cst_33 : f32 to vector<8x64xf32>
    %119 = vector.extract_strided_slice %98 {offsets = [0, 0], sizes = [56, 64], strides = [1, 1]} : vector<64x64xf32> to vector<56x64xf32>
    %120 = tpu.concatenate %118, %119 in 0 : vector<8x64xf32>, vector<56x64xf32> -> vector<64x64xf32>
    %121 = arith.maximumf %117, %120 : vector<64x64xf32>
    %cst_34 = arith.constant 0.000000e+00 : f32
    %122 = vector.broadcast %cst_34 : f32 to vector<1x64xf32>
    %123 = vector.extract_strided_slice %105 {offsets = [0, 0], sizes = [63, 64], strides = [1, 1]} : vector<64x64xf32> to vector<63x64xf32>
    %124 = tpu.concatenate %122, %123 in 0 : vector<1x64xf32>, vector<63x64xf32> -> vector<64x64xf32>
    %125 = arith.maximumf %121, %124 : vector<64x64xf32>
    %126 = arith.truncf %125 : vector<64x64xf32> to vector<64x64xbf16>
    %cst_35 = arith.constant 0.000000e+00 : f32
    %127 = vector.broadcast %cst_35 : f32 to vector<64x64xf32>
    %128 = arith.select %27, %125, %127 : vector<64x64xi1>, vector<64x64xf32>
    %129 = arith.truncf %128 : vector<64x64xf32> to vector<64x64xbf16>
    %cst_36 = arith.constant 0.000000e+00 : f32
    %130 = vector.broadcast %cst_36 : f32 to vector<64x64xf32>
    %131 = arith.select %29, %125, %130 : vector<64x64xi1>, vector<64x64xf32>
    %132 = arith.truncf %131 : vector<64x64xf32> to vector<64x64xbf16>
    %cst_37 = arith.constant 0.000000e+00 : bf16
    %133 = vector.broadcast %cst_37 : bf16 to vector<9x64xbf16>
    %134 = vector.extract_strided_slice %132 {offsets = [0, 0], sizes = [55, 64], strides = [1, 1]} : vector<64x64xbf16> to vector<55x64xbf16>
    %135 = tpu.concatenate %133, %134 in 0 : vector<9x64xbf16>, vector<55x64xbf16> -> vector<64x64xbf16>
    %cst_38 = arith.constant 0.000000e+00 : bf16
    %136 = vector.broadcast %cst_38 : bf16 to vector<8x64xbf16>
    %137 = vector.extract_strided_slice %126 {offsets = [0, 0], sizes = [56, 64], strides = [1, 1]} : vector<64x64xbf16> to vector<56x64xbf16>
    %138 = tpu.concatenate %136, %137 in 0 : vector<8x64xbf16>, vector<56x64xbf16> -> vector<64x64xbf16>
    %cst_39 = arith.constant 0.000000e+00 : bf16
    %139 = vector.broadcast %cst_39 : bf16 to vector<7x64xbf16>
    %140 = vector.extract_strided_slice %129 {offsets = [0, 0], sizes = [57, 64], strides = [1, 1]} : vector<64x64xbf16> to vector<57x64xbf16>
    %141 = tpu.concatenate %139, %140 in 0 : vector<7x64xbf16>, vector<57x64xbf16> -> vector<64x64xbf16>
    %cst_40 = arith.constant 0.000000e+00 : bf16
    %142 = vector.broadcast %cst_40 : bf16 to vector<1x64xbf16>
    %143 = vector.extract_strided_slice %132 {offsets = [0, 0], sizes = [63, 64], strides = [1, 1]} : vector<64x64xbf16> to vector<63x64xbf16>
    %144 = tpu.concatenate %142, %143 in 0 : vector<1x64xbf16>, vector<63x64xbf16> -> vector<64x64xbf16>
    %cst_41 = arith.constant 0.000000e+00 : bf16
    %145 = vector.broadcast %cst_41 : bf16 to vector<1x64xbf16>
    %146 = vector.extract_strided_slice %129 {offsets = [1, 0], sizes = [63, 64], strides = [1, 1]} : vector<64x64xbf16> to vector<63x64xbf16>
    %147 = tpu.concatenate %146, %145 in 0 : vector<63x64xbf16>, vector<1x64xbf16> -> vector<64x64xbf16>
    %cst_42 = arith.constant 0.000000e+00 : bf16
    %148 = vector.broadcast %cst_42 : bf16 to vector<7x64xbf16>
    %149 = vector.extract_strided_slice %132 {offsets = [7, 0], sizes = [57, 64], strides = [1, 1]} : vector<64x64xbf16> to vector<57x64xbf16>
    %150 = tpu.concatenate %149, %148 in 0 : vector<57x64xbf16>, vector<7x64xbf16> -> vector<64x64xbf16>
    %cst_43 = arith.constant 0.000000e+00 : bf16
    %151 = vector.broadcast %cst_43 : bf16 to vector<8x64xbf16>
    %152 = vector.extract_strided_slice %126 {offsets = [8, 0], sizes = [56, 64], strides = [1, 1]} : vector<64x64xbf16> to vector<56x64xbf16>
    %153 = tpu.concatenate %152, %151 in 0 : vector<56x64xbf16>, vector<8x64xbf16> -> vector<64x64xbf16>
    %cst_44 = arith.constant 0.000000e+00 : bf16
    %154 = vector.broadcast %cst_44 : bf16 to vector<9x64xbf16>
    %155 = vector.extract_strided_slice %129 {offsets = [9, 0], sizes = [55, 64], strides = [1, 1]} : vector<64x64xbf16> to vector<55x64xbf16>
    %156 = tpu.concatenate %155, %154 in 0 : vector<55x64xbf16>, vector<9x64xbf16> -> vector<64x64xbf16>
    %157 = tpu.concatenate %135, %138, %141, %144, %126, %147, %150, %153, %156 in 1 : vector<64x64xbf16>, vector<64x64xbf16>, vector<64x64xbf16>, vector<64x64xbf16>, vector<64x64xbf16>, vector<64x64xbf16>, vector<64x64xbf16>, vector<64x64xbf16>, vector<64x64xbf16> -> vector<64x576xbf16>
    %158 = tpu.concatenate %61, %125 in 0 : vector<64x64xf32>, vector<64x64xf32> -> vector<128x64xf32>
    %159 = tpu.concatenate %93, %157 in 0 : vector<64x576xbf16>, vector<64x576xbf16> -> vector<128x576xbf16>
    %c0_45 = arith.constant 0 : index
    %c0_46 = arith.constant 0 : index
    %160 = vector.load %arg4[%c0_45, %c0_46] : memref<576x64xbf16, #tpu.memory_space<vmem>>, vector<576x64xbf16>
    %cst_47 = arith.constant dense<0.000000e+00> : vector<128x64xf32>
    %161 = tpu.matmul %159, %160, %cst_47 {dimension_numbers = #tpu.dot_dimension_numbers<[1], [0], [0], [1], [0, 0, 1, 1], [], []>} : vector<128x576xbf16>, vector<576x64xbf16>, vector<128x64xf32> -> vector<128x64xf32>
    %c0_48 = arith.constant 0 : index
    %c0_49 = arith.constant 0 : index
    %162 = vector.load %arg5[%c0_48, %c0_49] : memref<1x64xf32, #tpu.memory_space<vmem>>, vector<1x64xf32>
    %163 = vector.broadcast %162 : vector<1x64xf32> to vector<128x64xf32>
    %164 = arith.addf %161, %163 : vector<128x64xf32>
    %cst_50 = arith.constant 0.000000e+00 : f32
    %165 = vector.broadcast %cst_50 : f32 to vector<128x64xf32>
    %166 = arith.maximumf %164, %165 : vector<128x64xf32>
    %167 = vector.extract_strided_slice %166 {offsets = [0, 0], sizes = [64, 64], strides = [1, 1]} : vector<128x64xf32> to vector<64x64xf32>
    %168 = arith.truncf %167 : vector<64x64xf32> to vector<64x64xbf16>
    %cst_51 = arith.constant 0.000000e+00 : f32
    %169 = vector.broadcast %cst_51 : f32 to vector<64x64xf32>
    %170 = arith.select %27, %167, %169 : vector<64x64xi1>, vector<64x64xf32>
    %171 = arith.truncf %170 : vector<64x64xf32> to vector<64x64xbf16>
    %cst_52 = arith.constant 0.000000e+00 : f32
    %172 = vector.broadcast %cst_52 : f32 to vector<64x64xf32>
    %173 = arith.select %29, %167, %172 : vector<64x64xi1>, vector<64x64xf32>
    %174 = arith.truncf %173 : vector<64x64xf32> to vector<64x64xbf16>
    %cst_53 = arith.constant 0.000000e+00 : bf16
    %175 = vector.broadcast %cst_53 : bf16 to vector<9x64xbf16>
    %176 = vector.extract_strided_slice %174 {offsets = [0, 0], sizes = [55, 64], strides = [1, 1]} : vector<64x64xbf16> to vector<55x64xbf16>
    %177 = tpu.concatenate %175, %176 in 0 : vector<9x64xbf16>, vector<55x64xbf16> -> vector<64x64xbf16>
    %cst_54 = arith.constant 0.000000e+00 : bf16
    %178 = vector.broadcast %cst_54 : bf16 to vector<8x64xbf16>
    %179 = vector.extract_strided_slice %168 {offsets = [0, 0], sizes = [56, 64], strides = [1, 1]} : vector<64x64xbf16> to vector<56x64xbf16>
    %180 = tpu.concatenate %178, %179 in 0 : vector<8x64xbf16>, vector<56x64xbf16> -> vector<64x64xbf16>
    %cst_55 = arith.constant 0.000000e+00 : bf16
    %181 = vector.broadcast %cst_55 : bf16 to vector<7x64xbf16>
    %182 = vector.extract_strided_slice %171 {offsets = [0, 0], sizes = [57, 64], strides = [1, 1]} : vector<64x64xbf16> to vector<57x64xbf16>
    %183 = tpu.concatenate %181, %182 in 0 : vector<7x64xbf16>, vector<57x64xbf16> -> vector<64x64xbf16>
    %cst_56 = arith.constant 0.000000e+00 : bf16
    %184 = vector.broadcast %cst_56 : bf16 to vector<1x64xbf16>
    %185 = vector.extract_strided_slice %174 {offsets = [0, 0], sizes = [63, 64], strides = [1, 1]} : vector<64x64xbf16> to vector<63x64xbf16>
    %186 = tpu.concatenate %184, %185 in 0 : vector<1x64xbf16>, vector<63x64xbf16> -> vector<64x64xbf16>
    %cst_57 = arith.constant 0.000000e+00 : bf16
    %187 = vector.broadcast %cst_57 : bf16 to vector<1x64xbf16>
    %188 = vector.extract_strided_slice %171 {offsets = [1, 0], sizes = [63, 64], strides = [1, 1]} : vector<64x64xbf16> to vector<63x64xbf16>
    %189 = tpu.concatenate %188, %187 in 0 : vector<63x64xbf16>, vector<1x64xbf16> -> vector<64x64xbf16>
    %cst_58 = arith.constant 0.000000e+00 : bf16
    %190 = vector.broadcast %cst_58 : bf16 to vector<7x64xbf16>
    %191 = vector.extract_strided_slice %174 {offsets = [7, 0], sizes = [57, 64], strides = [1, 1]} : vector<64x64xbf16> to vector<57x64xbf16>
    %192 = tpu.concatenate %191, %190 in 0 : vector<57x64xbf16>, vector<7x64xbf16> -> vector<64x64xbf16>
    %cst_59 = arith.constant 0.000000e+00 : bf16
    %193 = vector.broadcast %cst_59 : bf16 to vector<8x64xbf16>
    %194 = vector.extract_strided_slice %168 {offsets = [8, 0], sizes = [56, 64], strides = [1, 1]} : vector<64x64xbf16> to vector<56x64xbf16>
    %195 = tpu.concatenate %194, %193 in 0 : vector<56x64xbf16>, vector<8x64xbf16> -> vector<64x64xbf16>
    %cst_60 = arith.constant 0.000000e+00 : bf16
    %196 = vector.broadcast %cst_60 : bf16 to vector<9x64xbf16>
    %197 = vector.extract_strided_slice %171 {offsets = [9, 0], sizes = [55, 64], strides = [1, 1]} : vector<64x64xbf16> to vector<55x64xbf16>
    %198 = tpu.concatenate %197, %196 in 0 : vector<55x64xbf16>, vector<9x64xbf16> -> vector<64x64xbf16>
    %199 = tpu.concatenate %177, %180, %183, %186, %168, %189, %192, %195, %198 in 1 : vector<64x64xbf16>, vector<64x64xbf16>, vector<64x64xbf16>, vector<64x64xbf16>, vector<64x64xbf16>, vector<64x64xbf16>, vector<64x64xbf16>, vector<64x64xbf16>, vector<64x64xbf16> -> vector<64x576xbf16>
    %200 = vector.extract_strided_slice %166 {offsets = [64, 0], sizes = [64, 64], strides = [1, 1]} : vector<128x64xf32> to vector<64x64xf32>
    %201 = arith.truncf %200 : vector<64x64xf32> to vector<64x64xbf16>
    %cst_61 = arith.constant 0.000000e+00 : f32
    %202 = vector.broadcast %cst_61 : f32 to vector<64x64xf32>
    %203 = arith.select %27, %200, %202 : vector<64x64xi1>, vector<64x64xf32>
    %204 = arith.truncf %203 : vector<64x64xf32> to vector<64x64xbf16>
    %cst_62 = arith.constant 0.000000e+00 : f32
    %205 = vector.broadcast %cst_62 : f32 to vector<64x64xf32>
    %206 = arith.select %29, %200, %205 : vector<64x64xi1>, vector<64x64xf32>
    %207 = arith.truncf %206 : vector<64x64xf32> to vector<64x64xbf16>
    %cst_63 = arith.constant 0.000000e+00 : bf16
    %208 = vector.broadcast %cst_63 : bf16 to vector<9x64xbf16>
    %209 = vector.extract_strided_slice %207 {offsets = [0, 0], sizes = [55, 64], strides = [1, 1]} : vector<64x64xbf16> to vector<55x64xbf16>
    %210 = tpu.concatenate %208, %209 in 0 : vector<9x64xbf16>, vector<55x64xbf16> -> vector<64x64xbf16>
    %cst_64 = arith.constant 0.000000e+00 : bf16
    %211 = vector.broadcast %cst_64 : bf16 to vector<8x64xbf16>
    %212 = vector.extract_strided_slice %201 {offsets = [0, 0], sizes = [56, 64], strides = [1, 1]} : vector<64x64xbf16> to vector<56x64xbf16>
    %213 = tpu.concatenate %211, %212 in 0 : vector<8x64xbf16>, vector<56x64xbf16> -> vector<64x64xbf16>
    %cst_65 = arith.constant 0.000000e+00 : bf16
    %214 = vector.broadcast %cst_65 : bf16 to vector<7x64xbf16>
    %215 = vector.extract_strided_slice %204 {offsets = [0, 0], sizes = [57, 64], strides = [1, 1]} : vector<64x64xbf16> to vector<57x64xbf16>
    %216 = tpu.concatenate %214, %215 in 0 : vector<7x64xbf16>, vector<57x64xbf16> -> vector<64x64xbf16>
    %cst_66 = arith.constant 0.000000e+00 : bf16
    %217 = vector.broadcast %cst_66 : bf16 to vector<1x64xbf16>
    %218 = vector.extract_strided_slice %207 {offsets = [0, 0], sizes = [63, 64], strides = [1, 1]} : vector<64x64xbf16> to vector<63x64xbf16>
    %219 = tpu.concatenate %217, %218 in 0 : vector<1x64xbf16>, vector<63x64xbf16> -> vector<64x64xbf16>
    %cst_67 = arith.constant 0.000000e+00 : bf16
    %220 = vector.broadcast %cst_67 : bf16 to vector<1x64xbf16>
    %221 = vector.extract_strided_slice %204 {offsets = [1, 0], sizes = [63, 64], strides = [1, 1]} : vector<64x64xbf16> to vector<63x64xbf16>
    %222 = tpu.concatenate %221, %220 in 0 : vector<63x64xbf16>, vector<1x64xbf16> -> vector<64x64xbf16>
    %cst_68 = arith.constant 0.000000e+00 : bf16
    %223 = vector.broadcast %cst_68 : bf16 to vector<7x64xbf16>
    %224 = vector.extract_strided_slice %207 {offsets = [7, 0], sizes = [57, 64], strides = [1, 1]} : vector<64x64xbf16> to vector<57x64xbf16>
    %225 = tpu.concatenate %224, %223 in 0 : vector<57x64xbf16>, vector<7x64xbf16> -> vector<64x64xbf16>
    %cst_69 = arith.constant 0.000000e+00 : bf16
    %226 = vector.broadcast %cst_69 : bf16 to vector<8x64xbf16>
    %227 = vector.extract_strided_slice %201 {offsets = [8, 0], sizes = [56, 64], strides = [1, 1]} : vector<64x64xbf16> to vector<56x64xbf16>
    %228 = tpu.concatenate %227, %226 in 0 : vector<56x64xbf16>, vector<8x64xbf16> -> vector<64x64xbf16>
    %cst_70 = arith.constant 0.000000e+00 : bf16
    %229 = vector.broadcast %cst_70 : bf16 to vector<9x64xbf16>
    %230 = vector.extract_strided_slice %204 {offsets = [9, 0], sizes = [55, 64], strides = [1, 1]} : vector<64x64xbf16> to vector<55x64xbf16>
    %231 = tpu.concatenate %230, %229 in 0 : vector<55x64xbf16>, vector<9x64xbf16> -> vector<64x64xbf16>
    %232 = tpu.concatenate %210, %213, %216, %219, %201, %222, %225, %228, %231 in 1 : vector<64x64xbf16>, vector<64x64xbf16>, vector<64x64xbf16>, vector<64x64xbf16>, vector<64x64xbf16>, vector<64x64xbf16>, vector<64x64xbf16>, vector<64x64xbf16>, vector<64x64xbf16> -> vector<64x576xbf16>
    %233 = tpu.concatenate %199, %232 in 0 : vector<64x576xbf16>, vector<64x576xbf16> -> vector<128x576xbf16>
    %c0_71 = arith.constant 0 : index
    %c0_72 = arith.constant 0 : index
    %234 = vector.load %arg6[%c0_71, %c0_72] : memref<576x64xbf16, #tpu.memory_space<vmem>>, vector<576x64xbf16>
    %cst_73 = arith.constant dense<0.000000e+00> : vector<128x64xf32>
    %235 = tpu.matmul %233, %234, %cst_73 {dimension_numbers = #tpu.dot_dimension_numbers<[1], [0], [0], [1], [0, 0, 1, 1], [], []>} : vector<128x576xbf16>, vector<576x64xbf16>, vector<128x64xf32> -> vector<128x64xf32>
    %c0_74 = arith.constant 0 : index
    %c0_75 = arith.constant 0 : index
    %236 = vector.load %arg7[%c0_74, %c0_75] : memref<1x64xf32, #tpu.memory_space<vmem>>, vector<1x64xf32>
    %237 = vector.broadcast %236 : vector<1x64xf32> to vector<128x64xf32>
    %238 = arith.addf %235, %237 : vector<128x64xf32>
    %239 = arith.addf %238, %158 : vector<128x64xf32>
    %cst_76 = arith.constant 0.000000e+00 : f32
    %240 = vector.broadcast %cst_76 : f32 to vector<128x64xf32>
    %241 = arith.maximumf %239, %240 : vector<128x64xf32>
    %242 = vector.shape_cast %241 : vector<128x64xf32> to vector<2x64x64xf32>
    %c0_77 = arith.constant 0 : index
    %c0_78 = arith.constant 0 : index
    %c0_79 = arith.constant 0 : index
    %243 = vector.load %arg8[%c0_77, %c0_78, %c0_79] : memref<2x64x64xf32, #tpu.memory_space<vmem>>, vector<2x64x64xf32>
    tpu.vector_store %arg8[%c0_77, %c0_78, %c0_79], %242 {strides = array<i32>} : memref<2x64x64xf32, #tpu.memory_space<vmem>>, vector<2x64x64xf32>,
    return
  }
  func.func @transform_0(%arg0: i32) -> (i32, i32, i32) {
    %c0_i32 = arith.constant 0 : i32
    %c0_i32_0 = arith.constant 0 : i32
    %c0_i32_1 = arith.constant 0 : i32
    return %arg0, %c0_i32, %c0_i32_0 : i32, i32, i32
  }
  func.func @transform_1(%arg0: i32) -> (i32, i32) {
    %c0_i32 = arith.constant 0 : i32
    %c0_i32_0 = arith.constant 0 : i32
    %c0_i32_1 = arith.constant 0 : i32
    return %c0_i32, %c0_i32_0 : i32, i32
  }
  func.func @transform_2(%arg0: i32) -> (i32, i32) {
    %c0_i32 = arith.constant 0 : i32
    %c0_i32_0 = arith.constant 0 : i32
    %c0_i32_1 = arith.constant 0 : i32
    return %c0_i32, %c0_i32_0 : i32, i32
  }
  func.func @transform_3(%arg0: i32) -> (i32, i32) {
    %c0_i32 = arith.constant 0 : i32
    %c0_i32_0 = arith.constant 0 : i32
    %c0_i32_1 = arith.constant 0 : i32
    return %c0_i32, %c0_i32_0 : i32, i32
  }
  func.func @transform_4(%arg0: i32) -> (i32, i32) {
    %c0_i32 = arith.constant 0 : i32
    %c0_i32_0 = arith.constant 0 : i32
    %c0_i32_1 = arith.constant 0 : i32
    return %c0_i32, %c0_i32_0 : i32, i32
  }
  func.func @transform_5(%arg0: i32) -> (i32, i32) {
    %c0_i32 = arith.constant 0 : i32
    %c0_i32_0 = arith.constant 0 : i32
    %c0_i32_1 = arith.constant 0 : i32
    return %c0_i32, %c0_i32_0 : i32, i32
  }
  func.func @transform_6(%arg0: i32) -> (i32, i32) {
    %c0_i32 = arith.constant 0 : i32
    %c0_i32_0 = arith.constant 0 : i32
    %c0_i32_1 = arith.constant 0 : i32
    return %c0_i32, %c0_i32_0 : i32, i32
  }
  func.func @transform_7(%arg0: i32) -> (i32, i32, i32) {
    %c0_i32 = arith.constant 0 : i32
    %c0_i32_0 = arith.constant 0 : i32
    %c0_i32_1 = arith.constant 0 : i32
    return %arg0, %c0_i32, %c0_i32_0 : i32, i32, i32
  }
}

</mosaic_0001>

<bundles_post_ra>
// kernel: net_forward.1
= control target key start
LH: loop header
LB: loop body
LE: loop exit
PB: predicated region body
PF: predicated region fallthrough
CT: control target
= control target key end

     0   :  { %v4254_v1 = vmov 0   ;;  %s6637_s0 = inlined_call_operand.vmem [shape: bf16[2,256,256], index: 0, kind: input, shape index: {}]   ;;  %s6638_s1 = inlined_call_operand.vmem [shape: bf16[256,64], index: 1, kind: input, shape index: {}]   ;;  %s6639_s2 = inlined_call_operand.vmem [shape: f32[1,64], index: 2, kind: input, shape index: {}]   ;;  %s6640_s3 = inlined_call_operand.vmem [shape: bf16[576,64], index: 3, kind: input, shape index: {}]   ;;  %s6641_s4 = inlined_call_operand.vmem [shape: f32[1,64], index: 4, kind: input, shape index: {}]   ;;  %s6642_s5 = inlined_call_operand.vmem [shape: bf16[576,64], index: 5, kind: input, shape index: {}]   ;;  %s6643_s6 = inlined_call_operand.vmem [shape: f32[1,64], index: 6, kind: input, shape index: {}]   ;;  %s6644_s7 = inlined_call_operand.hbm [shape: f32[2,64,64], index: 7, kind: output, shape index: {}]  }
   0x1   :  { %v4041_v0 = vld [vmem:[%s6638_s1] sm:$0xff]   ;;  %547 = vmatprep.subr.bf16.mxu0 %v4254_v1  ;;  %v4042_v2 = vld [vmem:[%s6638_s1 + $0x8] sm:$0xff]   ;;  %v4043_v3 = vld [vmem:[%s6638_s1 + $0x10] sm:$0xff]  }
   0x2   :  { %548 = vmatpush1.bf16.msra.mxu0 %v4041_v0  ;;  %v4044_v4 = vld [vmem:[%s6638_s1 + $0x18] sm:$0xff]   ;;  %v4045_v5 = vld [vmem:[%s6638_s1 + $0x20] sm:$0xff]   ;;  %v4046_v7 = vld [vmem:[%s6638_s1 + $0x28] sm:$0xff]  }
   0x3   :  { %549 = vmatprep.subr.bf16.mxu0 %v4254_v1  ;;  %v4059_v6 = vld [vmem:[%s6637_s0 + $0x4] ss:$8 sps:$4 sm:$0xff]   ;;  %v4047_v8 = vld [vmem:[%s6638_s1 + $0x30] sm:$0xff]   ;;  %v4048_v9 = vld [vmem:[%s6638_s1 + $0x38] sm:$0xff]  }
   0x4   :  { %579 = vmatprep.mubr.bf16.mxu0 %v4059_v6  ;;  %v4049_v10 = vld [vmem:[%s6638_s1 + $0x40] sm:$0xff]   ;;  %v4050_v11 = vld [vmem:[%s6638_s1 + $0x48] sm:$0xff]   ;;  %v4051_v12 = vld [vmem:[%s6638_s1 + $0x50] sm:$0xff]  }
   0x5   :  { %v4052_v13 = vld [vmem:[%s6638_s1 + $0x58] sm:$0xff]   ;;  %v4053_v14 = vld [vmem:[%s6638_s1 + $0x60] sm:$0xff]   ;;  %v4054_v15 = vld [vmem:[%s6638_s1 + $0x68] sm:$0xff]  }
   0x6   :  { %550 = vmatpush1.bf16.msra.mxu0 %v4042_v2  ;;  %v4055_v16 = vld [vmem:[%s6638_s1 + $0x70] sm:$0xff]   ;;  %v4056_v17 = vld [vmem:[%s6638_s1 + $0x78] sm:$0xff]   ;;  %v4057_v18 = vld [vmem:[%s6637_s0] ss:$8 sps:$4 sm:$0xff]  }
   0x7   :  { %551 = vmatprep.subr.bf16.mxu0 %v4254_v1  ;;  %v4060_v19 = vld [vmem:[%s6637_s0 + $0x14] ss:$8 sps:$4 sm:$0xff]   ;;  %v4062_v20 = vld [vmem:[%s6637_s0 + $0x10] ss:$8 sps:$4 sm:$0xff]   ;;  %v4063_v21 = vld [vmem:[%s6637_s0 + $0x24] ss:$8 sps:$4 sm:$0xff]  }
   0x8   :  { %v4065_v22 = vld [vmem:[%s6637_s0 + $0x20] ss:$8 sps:$4 sm:$0xff]   ;;  %v4066_v23 = vld [vmem:[%s6637_s0 + $0x34] ss:$8 sps:$4 sm:$0xff]   ;;  %v4068_v24 = vld [vmem:[%s6637_s0 + $0x30] ss:$8 sps:$4 sm:$0xff]  }
   0x9   :  { %v4069_v25 = vld [vmem:[%s6637_s0 + $0x44] ss:$8 sps:$4 sm:$0xff]   ;;  %v4071_v26 = vld [vmem:[%s6637_s0 + $0x40] ss:$8 sps:$4 sm:$0xff]   ;;  %v4072_v27 = vld [vmem:[%s6637_s0 + $0x54] ss:$8 sps:$4 sm:$0xff]  }
   0xa   :  { %552 = vmatpush1.bf16.msra.mxu0 %v4043_v3 }
   0xb   :  { %553 = vmatprep.subr.bf16.mxu0 %v4254_v1 }
   0xe   :  { %554 = vmatpush1.bf16.msra.mxu0 %v4044_v4 }
   0xf   :  { %555 = vmatprep.subr.bf16.mxu0 %v4254_v1 }
  0x12   :  { %556 = vmatpush1.bf16.msra.mxu0 %v4045_v5 }
  0x13   :  { %557 = vmatprep.subr.bf16.mxu0 %v4254_v1 }
  0x16   :  { %558 = vmatpush1.bf16.msra.mxu0 %v4046_v7 }
  0x17   :  { %559 = vmatprep.subr.bf16.mxu0 %v4254_v1 }
  0x1a   :  { %560 = vmatpush1.bf16.msra.mxu0 %v4047_v8 }
  0x1b   :  { %561 = vmatprep.subr.bf16.mxu0 %v4254_v1 }
  0x1e   :  { %562 = vmatpush1.bf16.msra.mxu0 %v4048_v9 }
  0x1f   :  { %563 = vmatprep.subr.bf16.mxu0 %v4254_v1 }
  0x22   :  { %564 = vmatpush1.bf16.msra.mxu0 %v4049_v10 }
  0x23   :  { %565 = vmatprep.subr.bf16.mxu0 %v4254_v1 }
  0x26   :  { %566 = vmatpush1.bf16.msra.mxu0 %v4050_v11 }
  0x27   :  { %567 = vmatprep.subr.bf16.mxu0 %v4254_v1 }
  0x2a   :  { %568 = vmatpush1.bf16.msra.mxu0 %v4051_v12 }
  0x2b   :  { %569 = vmatprep.subr.bf16.mxu0 %v4254_v1 }
  0x2e   :  { %570 = vmatpush1.bf16.msra.mxu0 %v4052_v13 }
  0x2f   :  { %571 = vmatprep.subr.bf16.mxu0 %v4254_v1 }
  0x32   :  { %572 = vmatpush1.bf16.msra.mxu0 %v4053_v14 }
  0x33   :  { %573 = vmatprep.subr.bf16.mxu0 %v4254_v1 }
  0x36   :  { %574 = vmatpush1.bf16.msra.mxu0 %v4054_v15 }
  0x37   :  { %575 = vmatprep.subr.bf16.mxu0 %v4254_v1 }
  0x3a   :  { %576 = vmatpush1.bf16.msra.mxu0 %v4055_v16 }
  0x3b   :  { %577 = vmatprep.subr.bf16.mxu0 %v4254_v1 }
  0x3e   :  { %578 = vmatpush1.bf16.msra.mxu0 %v4056_v17 }
  0x41   :  { %580 = vmatmul.mubr.bf16.vlgmr.msra.gmra.mrb[0].mxu0 %v4057_v18 }
  0x42   :  { %587 = vmatprep.mubr.bf16.mxu0 %v4060_v19 }
  0x49   :  { %588 = vmatmul.mubr.bf16.gmra.mrb[4].mxu0 %v4062_v20 }
  0x4a   :  { %595 = vmatprep.mubr.bf16.mxu0 %v4063_v21 }
  0x51   :  { %596 = vmatmul.mubr.bf16.gmra.mrb[8].mxu0 %v4065_v22 }
  0x52   :  { %603 = vmatprep.mubr.bf16.mxu0 %v4066_v23 }
  0x59   :  { %604 = vmatmul.mubr.bf16.gmra.mrb[12].mxu0 %v4068_v24 }
  0x5a   :  { %611 = vmatprep.mubr.bf16.mxu0 %v4069_v25 }
  0x61   :  { %612 = vmatmul.mubr.bf16.gmra.mrb[16].mxu0 %v4071_v26 }
  0x62   :  { %619 = vmatprep.mubr.bf16.mxu0 %v4072_v27 }
  0x63   :  { %12 = vsyncpa [#allocation3], 0  ;;  %v4074_v28 = vld [vmem:[%s6637_s0 + $0x50] ss:$8 sps:$4 sm:$0xff]   ;;  %v4075_v29 = vld [vmem:[%s6637_s0 + $0x64] ss:$8 sps:$4 sm:$0xff]   ;;  %v900_v26 = vlaneseq }
  0x64   :  { %v4077_v30 = vld [vmem:[%s6637_s0 + $0x60] ss:$8 sps:$4 sm:$0xff]   ;;  %v4078_v31 = vld [vmem:[%s6637_s0 + $0x74] ss:$8 sps:$4 sm:$0xff]   ;;  %v4080_v32 = vld [vmem:[%s6637_s0 + $0x70] ss:$8 sps:$4 sm:$0xff]  }
  0x65   :  { %v4081_v33 = vld [vmem:[%s6637_s0 + $0x84] ss:$8 sps:$4 sm:$0xff]   ;;  %v4083_v34 = vld [vmem:[%s6637_s0 + $0x80] ss:$8 sps:$4 sm:$0xff]   ;;  %v4084_v35 = vld [vmem:[%s6637_s0 + $0x94] ss:$8 sps:$4 sm:$0xff]  }
  0x66   :  { %v4086_v36 = vld [vmem:[%s6637_s0 + $0x90] ss:$8 sps:$4 sm:$0xff]   ;;  %v4087_v37 = vld [vmem:[%s6637_s0 + $0xa4] ss:$8 sps:$4 sm:$0xff]   ;;  %v4089_v38 = vld [vmem:[%s6637_s0 + $0xa0] ss:$8 sps:$4 sm:$0xff]  }
  0x67   :  { %v4090_v39 = vld [vmem:[%s6637_s0 + $0xb4] ss:$8 sps:$4 sm:$0xff]   ;;  %v4092_v40 = vld [vmem:[%s6637_s0 + $0xb0] ss:$8 sps:$4 sm:$0xff]   ;;  %v4093_v41 = vld [vmem:[%s6637_s0 + $0xc4] ss:$8 sps:$4 sm:$0xff]  }
  0x68   :  { %v4095_v42 = vld [vmem:[%s6637_s0 + $0xc0] ss:$8 sps:$4 sm:$0xff]   ;;  %v4096_v43 = vld [vmem:[%s6637_s0 + $0xd4] ss:$8 sps:$4 sm:$0xff]   ;;  %v4098_v44 = vld [vmem:[%s6637_s0 + $0xd0] ss:$8 sps:$4 sm:$0xff]  }
  0x69   :  { %620 = vmatmul.mubr.bf16.gmra.mrb[20].mxu0 %v4074_v28  ;;  %v4099_v45 = vld [vmem:[%s6637_s0 + $0xe4] ss:$8 sps:$4 sm:$0xff]   ;;  %v4101_v46 = vld [vmem:[%s6637_s0 + $0xe0] ss:$8 sps:$4 sm:$0xff]   ;;  %v4102_v47 = vld [vmem:[%s6637_s0 + $0xf4] ss:$8 sps:$4 sm:$0xff]  }
  0x6a   :  { %627 = vmatprep.mubr.bf16.mxu0 %v4075_v29  ;;  %v4104_v48 = vld [vmem:[%s6637_s0 + $0xf0] ss:$8 sps:$4 sm:$0xff]   ;;  %v4105_v49 = vld [vmem:[%s6637_s0 + $0x104] ss:$8 sps:$4 sm:$0xff]   ;;  %v4107_v50 = vld [vmem:[%s6637_s0 + $0x100] ss:$8 sps:$4 sm:$0xff]  }
  0x6b   :  { %v4108_v51 = vld [vmem:[%s6637_s0 + $0x114] ss:$8 sps:$4 sm:$0xff]   ;;  %v4110_v52 = vld [vmem:[%s6637_s0 + $0x110] ss:$8 sps:$4 sm:$0xff]   ;;  %v4111_v53 = vld [vmem:[%s6637_s0 + $0x124] ss:$8 sps:$4 sm:$0xff]  }
  0x6c   :  { %v4113_v54 = vld [vmem:[%s6637_s0 + $0x120] ss:$8 sps:$4 sm:$0xff]   ;;  %v4114_v55 = vld [vmem:[%s6637_s0 + $0x134] ss:$8 sps:$4 sm:$0xff]   ;;  %v4116_v56 = vld [vmem:[%s6637_s0 + $0x130] ss:$8 sps:$4 sm:$0xff]  }
  0x6d   :  { %v4117_v57 = vld [vmem:[%s6637_s0 + $0x144] ss:$8 sps:$4 sm:$0xff]   ;;  %v4119_v58 = vld [vmem:[%s6637_s0 + $0x140] ss:$8 sps:$4 sm:$0xff]   ;;  %v4120_v59 = vld [vmem:[%s6637_s0 + $0x154] ss:$8 sps:$4 sm:$0xff]  }
  0x6e   :  { %v4122_v60 = vld [vmem:[%s6637_s0 + $0x150] ss:$8 sps:$4 sm:$0xff]   ;;  %v4123_v61 = vld [vmem:[%s6637_s0 + $0x164] ss:$8 sps:$4 sm:$0xff]   ;;  %v4125_v62 = vld [vmem:[%s6637_s0 + $0x160] ss:$8 sps:$4 sm:$0xff]  }
  0x6f   :  { %v4126_v63 = vld [vmem:[%s6637_s0 + $0x174] ss:$8 sps:$4 sm:$0xff]   ;;  %v4128_v0 = vld [vmem:[%s6637_s0 + $0x170] ss:$8 sps:$4 sm:$0xff]   ;;  %v4129_v1 = vld [vmem:[%s6637_s0 + $0x184] ss:$8 sps:$4 sm:$0xff]  }
  0x70   :  { %v4131_v2 = vld [vmem:[%s6637_s0 + $0x180] ss:$8 sps:$4 sm:$0xff]   ;;  %v4132_v3 = vld [vmem:[%s6637_s0 + $0x194] ss:$8 sps:$4 sm:$0xff]   ;;  %v4134_v4 = vld [vmem:[%s6637_s0 + $0x190] ss:$8 sps:$4 sm:$0xff]  }
  0x71   :  { %628 = vmatmul.mubr.bf16.gmra.mrb[24].mxu0 %v4077_v30  ;;  %v4135_v5 = vld [vmem:[%s6637_s0 + $0x1a4] ss:$8 sps:$4 sm:$0xff]   ;;  %v4137_v6 = vld [vmem:[%s6637_s0 + $0x1a0] ss:$8 sps:$4 sm:$0xff]   ;;  %v4138_v7 = vld [vmem:[%s6637_s0 + $0x1b4] ss:$8 sps:$4 sm:$0xff]  }
  0x72   :  { %635 = vmatprep.mubr.bf16.mxu0 %v4078_v31  ;;  %v4140_v10 = vld [vmem:[%s6637_s0 + $0x1b0] ss:$8 sps:$4 sm:$0xff]   ;;  %v4141_v12 = vld [vmem:[%s6637_s0 + $0x1c4] ss:$8 sps:$4 sm:$0xff]   ;;  %v4143_v16 = vld [vmem:[%s6637_s0 + $0x1c0] ss:$8 sps:$4 sm:$0xff]  }
  0x73   :  { %v4144_v18 = vld [vmem:[%s6637_s0 + $0x1d4] ss:$8 sps:$4 sm:$0xff]   ;;  %v4146_v22 = vld [vmem:[%s6637_s0 + $0x1d0] ss:$8 sps:$4 sm:$0xff]   ;;  %v4147_v24 = vld [vmem:[%s6637_s0 + $0x1e4] ss:$8 sps:$4 sm:$0xff]  }
  0x74   :  { %v4536_v28 = vshrl.u32 %v900_v26, 7  ;;  %v4149_v30 = vld [vmem:[%s6637_s0 + $0x1e0] ss:$8 sps:$4 sm:$0xff]   ;;  %vm6658_vm2 = vcmask 1040384   ;;  %vm6656_vm9 = vsmask.f32 256 }
  0x75   :  { %vm4896_vm10 = vmand %vm6658_vm2, %vm6656_vm9  ;;  %s4255_s23 = smov 64   ;;  %vm6661_vm11 = vcmask 1043456   ;;  %vm6659_vm12 = vsmask.f32 4352 }
  0x79   :  { %636 = vmatmul.mubr.bf16.gmra.mrb[28].mxu0 %v4080_v32  ;;  %v4150_v32 = vld [vmem:[%s6637_s0 + $0x1f4] ss:$8 sps:$4 sm:$0xff]  }
  0x7a   :  { %643 = vmatprep.mubr.bf16.mxu0 %v4081_v33 }
  0x81   :  { %644 = vmatmul.mubr.bf16.gmra.mrb[32].mxu0 %v4083_v34  ;;  %v4549_v34 = vld [vmem:[%s6639_s2] ss:$0 sm:$0xff] }
  0x82   :  { %651 = vmatprep.mubr.bf16.mxu0 %v4084_v35  ;;  %v4552_v35 = vadd.s32 8, %v4536_v28 }
  0x89   :  { %652 = vmatmul.mubr.bf16.gmra.mrb[36].mxu0 %v4086_v36  ;;  %v6651_v36 = vand.u32 7, %v4536_v28 }
  0x8a   :  { %659 = vmatprep.mubr.bf16.mxu0 %v4087_v37 }
  0x8b   :  { %vm4564_vm0 = vcmp.lt.s32.totalorder %v6651_v36, 7 }
  0x91   :  { %660 = vmatmul.mubr.bf16.gmra.mrb[40].mxu0 %v4089_v38 }
  0x92   :  { %667 = vmatprep.mubr.bf16.mxu0 %v4090_v39  ;;  %v6654_v39 = vand.u32 7, %v4552_v35 }
  0x94   :  { %vm4574_vm1 = vcmp.lt.s32.totalorder %v6654_v39, 7 }
  0x99   :  { %668 = vmatmul.mubr.bf16.gmra.mrb[44].mxu0 %v4092_v40 }
  0x9a   :  { %675 = vmatprep.mubr.bf16.mxu0 %v4093_v41 }
  0xa1   :  { %676 = vmatmul.mubr.bf16.gmra.mrb[48].mxu0 %v4095_v42 }
  0xa2   :  { %683 = vmatprep.mubr.bf16.mxu0 %v4096_v43  ;;  %v4152_v43 = vld [vmem:[%s6637_s0 + $0x1f0] ss:$8 sps:$4 sm:$0xff]  }
  0xa9   :  { %684 = vmatmul.mubr.bf16.gmra.mrb[52].mxu0 %v4098_v44 }
  0xaa   :  { %691 = vmatprep.mubr.bf16.mxu0 %v4099_v45 }
  0xb1   :  { %692 = vmatmul.mubr.bf16.gmra.mrb[56].mxu0 %v4101_v46  ;;  %v4569_v46 = vadd.s32 16, %v4536_v28 }
  0xb2   :  { %699 = vmatprep.mubr.bf16.mxu0 %v4102_v47 }
  0xb9   :  { %700 = vmatmul.mubr.bf16.gmra.mrb[60].mxu0 %v4104_v48 }
  0xba   :  { %707 = vmatprep.mubr.bf16.mxu0 %v4105_v49 }
  0xc1   :  { %708 = vmatmul.mubr.bf16.gmra.mrb[64].mxu0 %v4107_v50 }
  0xc2   :  { %715 = vmatprep.mubr.bf16.mxu0 %v4108_v51  ;;  %v6778_v51 = vmov 0 }
  0xc3   :  { %v6779_v51 = vsel %vm4574_vm1, 4294967295, %v6778_v51 }
  0xc9   :  { %716 = vmatmul.mubr.bf16.gmra.mrb[68].mxu0 %v4110_v52  ;;  %v4579_v52 = vadd.s32 24, %v4536_v28 }
  0xca   :  { %723 = vmatprep.mubr.bf16.mxu0 %v4111_v53 }
  0xd1   :  { %724 = vmatmul.mubr.bf16.gmra.mrb[72].mxu0 %v4113_v54 }
  0xd2   :  { %731 = vmatprep.mubr.bf16.mxu0 %v4114_v55 }
  0xd9   :  { %732 = vmatmul.mubr.bf16.gmra.mrb[76].mxu0 %v4116_v56 }
  0xda   :  { %739 = vmatprep.mubr.bf16.mxu0 %v4117_v57  ;;  %v6649_v57 = vand.u32 7, %v4569_v46 }
  0xdc   :  { %vm4604_vm3 = vcmp.lt.s32.totalorder %v6649_v57, 7 }
  0xe1   :  { %740 = vmatmul.mubr.bf16.gmra.mrb[80].mxu0 %v4119_v58 }
  0xe2   :  { %747 = vmatprep.mubr.bf16.mxu0 %v4120_v59 }
  0xe9   :  { %748 = vmatmul.mubr.bf16.gmra.mrb[84].mxu0 %v4122_v60 }
  0xea   :  { %755 = vmatprep.mubr.bf16.mxu0 %v4123_v61 }
  0xf1   :  { %756 = vmatmul.mubr.bf16.gmra.mrb[88].mxu0 %v4125_v62 }
  0xf2   :  { %763 = vmatprep.mubr.bf16.mxu0 %v4126_v63 }
  0xf9   :  { %764 = vmatmul.mubr.bf16.gmra.mrb[92].mxu0 %v4128_v0  ;;  %v6650_v0 = vand.u32 7, %v4579_v52 }
  0xfa   :  { %771 = vmatprep.mubr.bf16.mxu0 %v4129_v1 }
  0xfb   :  { %vm4614_vm4 = vcmp.lt.s32.totalorder %v6650_v0, 7 }
 0x101   :  { %772 = vmatmul.mubr.bf16.gmra.mrb[96].mxu0 %v4131_v2 }
 0x102   :  { %779 = vmatprep.mubr.bf16.mxu0 %v4132_v3 }
 0x109   :  { %780 = vmatmul.mubr.bf16.gmra.mrb[100].mxu0 %v4134_v4 }
 0x10a   :  { %787 = vmatprep.mubr.bf16.mxu0 %v4135_v5 }
 0x111   :  { %788 = vmatmul.mubr.bf16.gmra.mrb[104].mxu0 %v4137_v6 }
 0x112   :  { %795 = vmatprep.mubr.bf16.mxu0 %v4138_v7  ;;  %v4609_v7 = vadd.s32 32, %v4536_v28 }
 0x114   :  { %v581_v8 = vpop.f32.mrb[0].mxu0 }
 0x115   :  { %v583_v9 = vpop.f32.mrb[1].mxu0  ;;  %v582_v37 = vadd.f32 %v4549_v34, %v581_v8 }
 0x116   :  { %v584_v11 = vpop.f32.mrb[2].mxu0 }
 0x117   :  { %v586_v13 = vpop.f32.mrb[3].mxu0  ;;  %v585_v40 = vadd.f32 %v4549_v34, %v584_v11  ;;  %v836_v47 = vmax.f32 %v582_v37, 0.0 }
 0x118   :  { %v4619_v13 = vadd.s32 40, %v4536_v28 }
 0x119   :  { %796 = vmatmul.mubr.bf16.gmra.mrb[108].mxu0 %v4140_v10  ;;  %v837_v53 = vmax.f32 %v585_v40, 0.0 }
 0x11a   :  { %803 = vmatprep.mubr.bf16.mxu0 %v4141_v12 }
 0x11c   :  { %v589_v14 = vpop.f32.mrb[4].mxu0 }
 0x11d   :  { %v591_v15 = vpop.f32.mrb[5].mxu0  ;;  %v590_v58 = vadd.f32 %v4549_v34, %v589_v14 }
 0x11e   :  { %v592_v17 = vpop.f32.mrb[6].mxu0 }
 0x11f   :  { %v594_v19 = vpop.f32.mrb[7].mxu0  ;;  %v593_v1 = vadd.f32 %v4549_v34, %v592_v17  ;;  %v838_v8 = vmax.f32 %v590_v58, 0.0 }
 0x120   :  { %v6647_v19 = vand.u32 7, %v4609_v7 }
 0x121   :  { %804 = vmatmul.mubr.bf16.gmra.mrb[112].mxu0 %v4143_v16  ;;  %v839_v14 = vmax.f32 %v593_v1, 0.0 }
 0x122   :  { %811 = vmatprep.mubr.bf16.mxu0 %v4144_v18  ;;  %vm4644_vm5 = vcmp.lt.s32.totalorder %v6647_v19, 7 }
 0x124   :  { %v4524_v20 = vpop.f32.mrb[8].mxu0 }
 0x125   :  { %v599_v21 = vpop.f32.mrb[9].mxu0 }
 0x126   :  { %v4529_v23 = vpop.f32.mrb[10].mxu0  ;;  %v598_v21 = vadd.f32 %v4549_v34, %v4524_v20 }
 0x127   :  { %v602_v25 = vpop.f32.mrb[11].mxu0 }
 0x129   :  { %812 = vmatmul.mubr.bf16.gmra.mrb[116].mxu0 %v4146_v22 }
 0x12a   :  { %819 = vmatprep.mubr.bf16.mxu0 %v4147_v24 }
 0x12c   :  { %v4534_v27 = vpop.f32.mrb[12].mxu0 }
 0x12d   :  { %v607_v29 = vpop.f32.mrb[13].mxu0 }
 0x12e   :  { %v4541_v31 = vpop.f32.mrb[14].mxu0 }
 0x12f   :  { %v610_v33 = vpop.f32.mrb[15].mxu0 }
 0x131   :  { %820 = vmatmul.mubr.bf16.gmra.mrb[120].mxu0 %v4149_v30  ;;  %v6648_v30 = vand.u32 7, %v4619_v13 }
 0x132   :  { %827 = vmatprep.mubr.bf16.mxu0 %v4150_v32  ;;  %v601_v32 = vadd.f32 %v4549_v34, %v4529_v23 }
 0x133   :  { %vm4654_vm6 = vcmp.lt.s32.totalorder %v6648_v30, 7 }
 0x134   :  { %v613_v38 = vpop.f32.mrb[16].mxu0 }
 0x135   :  { %v614_v41 = vadd.f32 %v4549_v34, %v613_v38  ;;  %v615_v42 = vpop.f32.mrb[17].mxu0  ;;  %v6784_v38 = vmov 0 }
 0x136   :  { %v616_v45 = vpop.f32.mrb[18].mxu0  ;;  %v6785_v38 = vsel %vm4644_vm5, 4294967295, %v6784_v38  ;;  %v840_v42 = vmax.f32 %v598_v21, 0.0 }
 0x137   :  { %v844_v48 = vmax.f32 %v614_v41, 0.0  ;;  %v617_v49 = vadd.f32 %v4549_v34, %v616_v45  ;;  %v618_v50 = vpop.f32.mrb[19].mxu0  ;;  %6786 = vst [vmem:[#allocation5_spill] sm:$0xff] %v6785_v38  ;;  %v4649_v41 = vadd.s32 48, %v4536_v28 }
 0x139   :  { %v4581_v54 = vmax.f32 %v836_v47, %v844_v48  ;;  %v4585_v55 = vsel %vm4564_vm0, %v844_v48, 0.0  ;;  %v845_v56 = vmax.f32 %v617_v49, 0.0  ;;  %828 = vmatmul.mubr.bf16.gmra.mrb[124].mxu0 %v4152_v43  ;;  %v6787_v47 = vmov 0 }
 0x13a   :  { %v1070_v61 = vrot.slane %v4585_v55, 7  ;;  %v6788_v47 = vsel %vm4654_vm6, 4294967295, %v6787_v47  ;;  %v4659_v48 = vadd.s32 56, %v4536_v28  ;;  %v841_v49 = vmax.f32 %v601_v32, 0.0  ;;  %v4160_v55 = vld [vmem:[%s6640_s3 + $0x18] sm:$0xff]  }
 0x13b   :  { %v4589_v59 = vmax.f32 %v837_v53, %v845_v56  ;;  %v1046_v60 = vsel %vm4574_vm1, %v845_v56, 0.0  ;;  %6789 = vst [vmem:[#allocation6_spill] sm:$0xff] %v6788_v47 }
 0x13c   :  { %v1071_v62 = vrot.slane %v1046_v60, 7  ;;  %v621_v63 = vpop.f32.mrb[20].mxu0  ;;  %v6645_v60 = vand.u32 7, %v4649_v41 }
 0x13d   :  { %v622_v2 = vadd.f32 %v4549_v34, %v621_v63  ;;  %v623_v3 = vpop.f32.mrb[21].mxu0 }
 0x13e   :  { %v4600_v4 = vsel %vm6658_vm2, %v1070_v61, %v1071_v62  ;;  %v624_v6 = vpop.f32.mrb[22].mxu0  ;;  %vm4684_vm7 = vcmp.lt.s32.totalorder %v6645_v60, 7 }
 0x13f   :  { %v846_v9 = vmax.f32 %v622_v2, 0.0  ;;  %v625_v10 = vadd.f32 %v4549_v34, %v624_v6  ;;  %v626_v11 = vpop.f32.mrb[23].mxu0 }
 0x141   :  { %v4621_v15 = vmax.f32 %v838_v8, %v846_v9  ;;  %v1047_v16 = vsel %vm4604_vm3, %v846_v9, 0.0  ;;  %v847_v17 = vmax.f32 %v625_v10, 0.0  ;;  %v6646_v8 = vand.u32 7, %v4659_v48 }
 0x142   :  { %v1073_v18 = vrot.slane %v1047_v16, 7  ;;  %v609_v9 = vadd.f32 %v4549_v34, %v4541_v31  ;;  %v6793_v31 = vmov 0 }
 0x143   :  { %v4628_v22 = vmax.f32 %v839_v14, %v847_v17  ;;  %v1048_v24 = vsel %vm4614_vm4, %v847_v17, 0.0  ;;  %v6790_v14 = vmov 0  ;;  %vm4691_vm8 = vcmp.lt.s32.totalorder %v6646_v8, 7 }
 0x144   :  { %v4633_v25 = vsel %vm6658_vm2, %v1071_v62, %v1073_v18  ;;  %v1075_v26 = vrot.slane %v1048_v24, 7  ;;  %v629_v29 = vpop.f32.mrb[24].mxu0  ;;  %v606_v62 = vadd.f32 %v4549_v34, %v4534_v27  ;;  %v6791_v14 = vsel %vm4684_vm7, 4294967295, %v6790_v14 }
 0x145   :  { %v630_v33 = vadd.f32 %v4549_v34, %v629_v29  ;;  %v631_v37 = vpop.f32.mrb[25].mxu0  ;;  %6792 = vst [vmem:[#allocation7_spill] sm:$0xff] %v6791_v14  ;;  %v6794_v31 = vsel %vm4691_vm8, 4294967295, %v6793_v31 }
 0x146   :  { %v4640_v20 = vsel %vm6658_vm2, %v1073_v18, %v1075_v26  ;;  %v632_v40 = vpop.f32.mrb[26].mxu0  ;;  %v842_v17 = vmax.f32 %v606_v62, 0.0  ;;  %6795 = vst [vmem:[#allocation8_spill] sm:$0xff] %v6794_v31 }
 0x147   :  { %v848_v43 = vmax.f32 %v630_v33, 0.0  ;;  %v633_v23 = vadd.f32 %v4549_v34, %v632_v40  ;;  %v634_v45 = vpop.f32.mrb[27].mxu0 }
 0x149   :  { %v4661_v50 = vmax.f32 %v840_v42, %v848_v43  ;;  %v1049_v53 = vsel %vm4644_vm5, %v848_v43, 0.0  ;;  %v849_v56 = vmax.f32 %v633_v23, 0.0 }
 0x14a   :  { %v1077_v58 = vrot.slane %v1049_v53, 7 }
 0x14b   :  { %v4668_v63 = vmax.f32 %v841_v49, %v849_v56  ;;  %v1050_v1 = vsel %vm4654_vm6, %v849_v56, 0.0 }
 0x14c   :  { %v4673_v2 = vsel %vm6658_vm2, %v1075_v26, %v1077_v58  ;;  %v1079_v3 = vrot.slane %v1050_v1, 7  ;;  %v637_v6 = vpop.f32.mrb[28].mxu0  ;;  %v843_v26 = vmax.f32 %v609_v9, 0.0 }
 0x14d   :  { %v638_v10 = vadd.f32 %v4549_v34, %v637_v6  ;;  %v639_v11 = vpop.f32.mrb[29].mxu0 }
 0x14e   :  { %v4680_v27 = vsel %vm6658_vm2, %v1077_v58, %v1079_v3  ;;  %v640_v16 = vpop.f32.mrb[30].mxu0 }
 0x14f   :  { %v850_v18 = vmax.f32 %v638_v10, 0.0  ;;  %v641_v21 = vadd.f32 %v4549_v34, %v640_v16  ;;  %v642_v24 = vpop.f32.mrb[31].mxu0 }
 0x151   :  { %v4695_v29 = vmax.f32 %v842_v17, %v850_v18  ;;  %v1051_v32 = vsel %vm4684_vm7, %v850_v18, 0.0  ;;  %v851_v33 = vmax.f32 %v641_v21, 0.0 }
 0x152   :  { %v1081_v37 = vrot.slane %v1051_v32, 7  ;;  %v4154_v32 = vld [vmem:[%s6640_s3] sm:$0xff]  }
 0x153   :  { %v4699_v40 = vmax.f32 %v843_v26, %v851_v33  ;;  %v1052_v42 = vsel %vm4691_vm8, %v851_v33, 0.0  ;;  %v4155_v33 = vld [vmem:[%s6640_s3 + $0x48] sm:$0xff]  }
 0x154   :  { %v4704_v43 = vsel %vm6658_vm2, %v1079_v3, %v1081_v37  ;;  %v1083_v23 = vrot.slane %v1052_v42, 7  ;;  %v645_v45 = vpop.f32.mrb[32].mxu0  ;;  %v4153_v3 = vld [vmem:[%s6640_s3 + $0x40] sm:$0xff]   ;;  %v4157_v42 = vld [vmem:[%s6640_s3 + $0x50] sm:$0xff]  }
 0x155   :  { %v647_v49 = vpop.f32.mrb[33].mxu0  ;;  %3700 = vmatprep.subr.bf16.mxu1 %v4153_v3 }
 0x156   :  { %v4707_v53 = vsel %vm6658_vm2, %v1081_v37, %v1083_v23  ;;  %v648_v56 = vpop.f32.mrb[34].mxu0  ;;  %3701 = vmatpush3.bf16.msra.mxu1 %v4154_v32  ;;  %v4156_v37 = vld [vmem:[%s6640_s3 + $0x8] sm:$0xff]   ;;  %v646_v23 = vadd.f32 %v4549_v34, %v645_v45 }
 0x157   :  { %v650_v58 = vpop.f32.mrb[35].mxu0  ;;  %3702 = vmatprep.subr.bf16.mxu1 %v4155_v33 }
 0x158   :  { %v4732_v58 = vadd.f32 %v4549_v34, %v648_v56  ;;  %v4158_v56 = vld [vmem:[%s6640_s3 + $0x10] sm:$0xff]  }
 0x15a   :  { %3703 = vmatpush3.bf16.msra.mxu1 %v4156_v37  ;;  %v853_v32 = vmax.f32 %v4732_v58, 0.0  ;;  %v4165_v58 = vld [vmem:[%s6640_s3 + $0x70] sm:$0xff]  }
 0x15b   :  { %3704 = vmatprep.subr.bf16.mxu1 %v4157_v42 }
 0x15c   :  { %v653_v62 = vpop.f32.mrb[36].mxu0 }
 0x15d   :  { %v655_v1 = vpop.f32.mrb[37].mxu0  ;;  %v4745_v37 = vadd.f32 %v4549_v34, %v653_v62 }
 0x15e   :  { %v656_v6 = vpop.f32.mrb[38].mxu0  ;;  %3705 = vmatpush3.bf16.msra.mxu1 %v4158_v56 }
 0x15f   :  { %v658_v9 = vpop.f32.mrb[39].mxu0 }
 0x164   :  { %v661_v10 = vpop.f32.mrb[40].mxu0 }
 0x165   :  { %v663_v11 = vpop.f32.mrb[41].mxu0 }
 0x166   :  { %v4709_v16 = vpop.f32.mrb[42].mxu0 }
 0x167   :  { %v666_v17 = vpop.f32.mrb[43].mxu0 }
 0x168   :  { %v852_v17 = vmax.f32 %v646_v23, 0.0 }
 0x16c   :  { %v4714_v18 = vpop.f32.mrb[44].mxu0 }
 0x16d   :  { %v671_v21 = vpop.f32.mrb[45].mxu0 }
 0x16e   :  { %v4716_v24 = vpop.f32.mrb[46].mxu0 }
 0x16f   :  { %v674_v26 = vpop.f32.mrb[47].mxu0 }
 0x174   :  { %v677_v49 = vpop.f32.mrb[48].mxu0 }
 0x175   :  { %v678_v1 = vadd.f32 %v4549_v34, %v677_v49  ;;  %v679_v9 = vpop.f32.mrb[49].mxu0 }
 0x176   :  { %v680_v11 = vpop.f32.mrb[50].mxu0  ;;  %v4758_v9 = vadd.f32 %v4549_v34, %v656_v6 }
 0x177   :  { %v860_v3 = vmax.f32 %v678_v1, 0.0  ;;  %v681_v21 = vadd.f32 %v4549_v34, %v680_v11  ;;  %v682_v26 = vpop.f32.mrb[51].mxu0  ;;  %v1093_v1 = vsel %vm6658_vm2, 0.0, %v1070_v61  ;;  %v854_v61 = vmax.f32 %v4745_v37, 0.0  ;;  %v4161_v37 = vld [vmem:[%s6640_s3 + $0x60] sm:$0xff]  }
 0x179   :  { %v1029_v60 = vmax.f32 %v852_v17, %v860_v3  ;;  %v1053_v45 = vsel %vm4564_vm0, %v860_v3, 0.0  ;;  %v4739_v33 = vmax.f32 %v681_v21, 0.0 }
 0x17a   :  { %v1117_v62 = vrot.slane %v1053_v45, 7 }
 0x17b   :  { %v1037_v42 = vmax.f32 %v4581_v54, %v1029_v60  ;;  %v1030_v23 = vmax.f32 %v853_v32, %v4739_v33  ;;  %v1054_v49 = vsel %vm4574_vm1, %v4739_v33, 0.0  ;;  %v4159_v54 = vld [vmem:[%s6640_s3 + $0x58] sm:$0xff]  }
 0x17c   :  { %v1118_v11 = vrot.slane %v1054_v49, 7  ;;  %v685_v21 = vpop.f32.mrb[52].mxu0  ;;  %3706 = vmatprep.subr.bf16.mxu1 %v4159_v54 }
 0x17d   :  { %v1094_v60 = vmax.f32 %v1037_v42, %v1093_v1  ;;  %v1038_v26 = vmax.f32 %v4589_v59, %v1030_v23  ;;  %v686_v8 = vadd.f32 %v4549_v34, %v685_v21  ;;  %v687_v56 = vpop.f32.mrb[53].mxu0  ;;  %3707 = vmatpush3.bf16.msra.mxu1 %v4160_v55  ;;  %v855_v1 = vmax.f32 %v4758_v9, 0.0 }
 0x17e   :  { %v4770_v6 = vsel %vm6658_vm2, %v1117_v62, %v1118_v11  ;;  %v688_v45 = vpop.f32.mrb[54].mxu0  ;;  %v4778_v21 = vadd.f32 %v4549_v34, %v661_v10  ;;  %v4792_v10 = vadd.f32 %v4549_v34, %v4709_v16  ;;  %3708 = vmatprep.subr.bf16.mxu1 %v4161_v37 }
 0x17f   :  { %v1102_v49 = vmax.f32 %v1094_v60, 0.0  ;;  %v1095_v19 = vmax.f32 %v1038_v26, %v4600_v4  ;;  %v4773_v42 = vmax.f32 %v686_v8, 0.0  ;;  %v689_v59 = vadd.f32 %v4549_v34, %v688_v45  ;;  %v690_v23 = vpop.f32.mrb[55].mxu0  ;;  %v4162_v8 = vld [vmem:[%s6640_s3 + $0x20] sm:$0xff]  }
 0x180   :  { %v1137_v26 = vsel %vm6658_vm2, 0.0, %v1117_v62  ;;  %v4800_v23 = vadd.f32 %v4549_v34, %v4714_v18 }
 0x181   :  { %v1138_v56 = vmax.f32 %v1102_v49, 0.0  ;;  %v1103_v54 = vmax.f32 %v1095_v19, %v852_v17  ;;  %v1031_v60 = vmax.f32 %v854_v61, %v4773_v42  ;;  %v1055_v4 = vsel %vm4604_vm3, %v4773_v42, 0.0  ;;  %3709 = vmatpush3.bf16.msra.mxu1 %v4162_v8 }
 0x182   :  { %v1120_v55 = vrot.slane %v1055_v4, 7  ;;  %v4795_v45 = vmax.f32 %v689_v59, 0.0  ;;  %v856_v4 = vmax.f32 %v4778_v21, 0.0  ;;  %v857_v8 = vmax.f32 %v4792_v10, 0.0 }
 0x183   :  { %v1146_v19 = vmax.f32 %v1138_v56, 0.0  ;;  %v1139_v17 = vmax.f32 %v1103_v54, %v1137_v26  ;;  %v1039_v49 = vmax.f32 %v4621_v15, %v1031_v60  ;;  %v4163_v15 = vld [vmem:[%s6640_s3 + $0x68] sm:$0xff]  }
 0x184   :  { %v1121_v30 = vsel %vm6658_vm2, %v1118_v11, %v1120_v55  ;;  %v1032_v16 = vmax.f32 %v855_v1, %v4795_v45  ;;  %v1056_v62 = vsel %vm4614_vm4, %v4795_v45, 0.0  ;;  %v693_v59 = vpop.f32.mrb[56].mxu0  ;;  %v4164_v60 = vld [vmem:[%s6640_s3 + $0x28] sm:$0xff]   ;;  %3710 = vmatprep.subr.bf16.mxu1 %v4163_v15 }
 0x185   :  { %v4812_v37 = vmax.f32 %v1146_v19, %v1137_v26  ;;  %v1147_v56 = vmax.f32 %v1139_v17, %v860_v3  ;;  %v1096_v18 = vmax.f32 %v1039_v49, %v4633_v25  ;;  %v1122_v54 = vrot.slane %v1056_v62, 7  ;;  %v695_v11 = vpop.f32.mrb[57].mxu0  ;;  %3711 = vmatpush3.bf16.msra.mxu1 %v4164_v60 }
 0x186   :  { %v1040_v57 = vmax.f32 %v4628_v22, %v1032_v16  ;;  %v694_v0 = vadd.f32 %v4549_v34, %v693_v59  ;;  %v696_v36 = vpop.f32.mrb[58].mxu0  ;;  %v858_v22 = vmax.f32 %v4800_v23, 0.0  ;;  %v673_v17 = vadd.f32 %v4549_v34, %v4716_v24  ;;  %3712 = vmatprep.subr.bf16.mxu1 %v4165_v58 }
 0x187   :  { %6796 = vst [vmem:[#allocation9_spill] sm:$0xff] %v4812_v37  ;;  %v4823_v3 = vmax.f32 %v1147_v56, %v4770_v6  ;;  %v1104_v25 = vmax.f32 %v1096_v18, %v853_v32  ;;  %v4828_v26 = vsel %vm6658_vm2, %v1120_v55, %v1122_v54  ;;  %v697_v21 = vadd.f32 %v4549_v34, %v696_v36  ;;  %v698_v19 = vpop.f32.mrb[59].mxu0 }
 0x188   :  { %v1097_v49 = vmax.f32 %v1040_v57, %v4640_v20  ;;  %v864_v16 = vmax.f32 %v694_v0, 0.0  ;;  %v1182_v36 = vsel %vm4564_vm0, %v4812_v37, 0.0  ;;  %v4166_v57 = vld [vmem:[%s6640_s3 + $0x30] sm:$0xff]  }
 0x189   :  { %6797 = vst [vmem:[#allocation10_spill] sm:$0xff] %v4823_v3  ;;  %v1140_v32 = vmax.f32 %v1104_v25, %v4770_v6  ;;  %v4839_v55 = vmax.f32 %v697_v21, 0.0  ;;  %v1183_v62 = vsel %vm4574_vm1, %v4823_v3, 0.0  ;;  %3713 = vmatpush3.bf16.msra.mxu1 %v4166_v57 }
 0x18a   :  { %v1105_v0 = vmax.f32 %v1097_v49, %v854_v61  ;;  %v1033_v20 = vmax.f32 %v856_v4, %v864_v16  ;;  %v1057_v24 = vsel %vm4644_vm5, %v864_v16, 0.0  ;;  %v4852_v6 = vpack.c.bf16 %v1183_v62, %v1182_v36 }
 0x18b   :  { %v1148_v59 = vmax.f32 %v1140_v32, %v4739_v33  ;;  %v1124_v15 = vrot.slane %v1057_v24, 7  ;;  %v1034_v56 = vmax.f32 %v857_v8, %v4839_v55  ;;  %v1058_v18 = vsel %vm4654_vm6, %v4839_v55, 0.0  ;;  %v4167_v33 = vld [vmem:[%s6640_s3 + $0x78] sm:$0xff]  }
 0x18c   :  { %v1141_v61 = vmax.f32 %v1105_v0, %v1121_v30  ;;  %v1041_v11 = vmax.f32 %v4661_v50, %v1033_v20  ;;  %v1126_v60 = vrot.slane %v1058_v18, 7  ;;  %v701_v25 = vpop.f32.mrb[60].mxu0  ;;  %v1196_v21 = vshrl.u32 %v4852_v6, 16  ;;  %3714 = vmatprep.subr.bf16.mxu1 %v4167_v33 }
 0x18d   :  { %v4866_v19 = vmax.f32 %v1148_v59, %v1121_v30  ;;  %v1125_v49 = vsel %vm6658_vm2, %v1122_v54, %v1124_v15  ;;  %v1042_v58 = vmax.f32 %v4668_v63, %v1034_v56  ;;  %v702_v32 = vadd.f32 %v4549_v34, %v701_v25  ;;  %v703_v36 = vpop.f32.mrb[61].mxu0 }
 0x18e   :  { %v1149_v62 = vmax.f32 %v1141_v61, %v4773_v42  ;;  %v1098_v50 = vmax.f32 %v1041_v11, %v4673_v2  ;;  %v1127_v57 = vsel %vm6658_vm2, %v1124_v15, %v1126_v60  ;;  %v704_v0 = vpop.f32.mrb[62].mxu0  ;;  %v4876_v20 = vpack.c.bf16 %v4823_v3, %v4812_v37 }
 0x18f   :  { %6798 = vst [vmem:[#allocation11_spill] sm:$0xff] %v4866_v19  ;;  %v1099_v30 = vmax.f32 %v1042_v58, %v4680_v27  ;;  %v866_v54 = vmax.f32 %v702_v32, 0.0  ;;  %v705_v63 = vadd.f32 %v4549_v34, %v704_v0  ;;  %v706_v24 = vpop.f32.mrb[63].mxu0  ;;  %v4882_v59 = vrot.slane %v1196_v21, 7 }
 0x190   :  { %6799 = vst [vmem:[#allocation12_spill] sm:$0xff] %v4876_v20  ;;  %v859_v42 = vmax.f32 %v673_v17, 0.0  ;;  %v4885_v2 = vmax.f32 %v1149_v62, %v4828_v26  ;;  %v1106_v15 = vmax.f32 %v1098_v50, %v855_v1  ;;  %v1199_v56 = vshll.u32 %v4852_v6, 16 }
 0x191   :  { %v1107_v18 = vmax.f32 %v1099_v30, %v856_v4  ;;  %v1035_v27 = vmax.f32 %v858_v22, %v866_v54  ;;  %v1059_v61 = vsel %vm4684_vm7, %v866_v54, 0.0  ;;  %v867_v11 = vmax.f32 %v705_v63, 0.0 }
 0x192   :  { %6800 = vst [vmem:[#allocation13_spill] sm:$0xff] %v4885_v2  ;;  %v6801_v17 = vmov 0  ;;  %v1142_v25 = vmax.f32 %v1106_v15, %v4828_v26  ;;  %v1128_v9 = vrot.slane %v1059_v61, 7  ;;  %v1291_v1 = vor.u32 %v4882_v59, %v1199_v56  ;;  %v4168_v61 = vld [vmem:[%s6640_s3 + $0x38] sm:$0xff]  }
 0x193   :  { %v6802_v17 = vsel %vm4896_vm10, 4294967295, %v6801_v17  ;;  %v1239_v4 = vrot.slane %v4876_v20, 4  ;;  %v1143_v33 = vmax.f32 %v1107_v18, %v1125_v49  ;;  %v1043_v58 = vmax.f32 %v4695_v29, %v1035_v27  ;;  %3715 = vmatpush3.bf16.msra.mxu1 %v4168_v61 }
 0x194   :  { %6803 = vst [vmem:[#allocation14_spill] sm:$0xff] %v6802_v17  ;;  %v1036_v32 = vmax.f32 %v859_v42, %v867_v11  ;;  %v1060_v36 = vsel %vm4691_vm8, %v867_v11, 0.0  ;;  %v1150_v62 = vmax.f32 %v1142_v25, %v4795_v45  ;;  %v1129_v50 = vsel %vm6658_vm2, %v1126_v60, %v1128_v9  ;;  %v4912_v30 = vpop.f32.mrb[64].mxu0 }
 0x195   :  { %v1155_v0 = vrot.slane %v1060_v36, 7  ;;  %v1304_v26 = vsel %vm4896_vm10, 0, %v1291_v1  ;;  %v1151_v63 = vmax.f32 %v1143_v33, %v864_v16  ;;  %v1100_v24 = vmax.f32 %v1043_v58, %v4704_v43  ;;  %v711_v29 = vpop.f32.mrb[65].mxu0 }
 0x196   :  { %v1044_v15 = vmax.f32 %v4699_v40, %v1036_v32  ;;  %1337 = vrot.lane.b32.xlu0 %v1304_v26, %s4255_s23  ;;  %v4917_v42 = vmax.f32 %v1150_v62, %v1125_v49  ;;  %v4920_v60 = vpop.f32.mrb[66].mxu0  ;;  %v1185_v18 = vsel %vm4614_vm4, %v4885_v2, 0.0  ;;  %v1184_v49 = vsel %vm4604_vm3, %v4866_v19, 0.0 }
 0x197   :  { %v1156_v45 = vsel %vm6658_vm2, %v1128_v9, %v1155_v0  ;;  %v4925_v16 = vmax.f32 %v1151_v63, %v1127_v57  ;;  %v1108_v40 = vmax.f32 %v1100_v24, %v857_v8  ;;  %v714_v27 = vpop.f32.mrb[67].mxu0  ;;  %v1249_v11 = vsel %vm6661_vm11, 0, %v1239_v4 }
 0x198   :  { %6804 = vst [vmem:[#allocation15_spill] sm:$0xff] %v4917_v42  ;;  %v1101_v43 = vmax.f32 %v1044_v15, %v4707_v53  ;;  %v1191_v25 = vpack.c.bf16 %v1185_v18, %v1184_v49  ;;  %v1186_v1 = vsel %vm4644_vm5, %v4917_v42, 0.0 }
 0x199   :  { %6805 = vst [vmem:[#allocation16_spill] sm:$0xff] %v4925_v16  ;;  %v1144_v9 = vmax.f32 %v1108_v40, %v1127_v57  ;;  %v1187_v53 = vsel %vm4654_vm6, %v4925_v16, 0.0 }
 0x19a   :  { %v1109_v10 = vmax.f32 %v1101_v43, %v858_v22  ;;  %1328 = vrot.lane.b32.xlu0 %v1249_v11, %s4255_s23  ;;  %v1204_v8 = vshrl.u32 %v1191_v25, 16  ;;  %v1192_v32 = vpack.c.bf16 %v1187_v53, %v1186_v1  ;;  %v1207_v57 = vshll.u32 %v1191_v25, 16 }
 0x19b   :  { %v1152_v33 = vmax.f32 %v1144_v9, %v4839_v55  ;;  %v4953_v22 = vpack.c.bf16 %v4885_v2, %v4866_v19 }
 0x19c   :  { %v1145_v58 = vmax.f32 %v1109_v10, %v1129_v50  ;;  %v1292_v36 = vrot.slane %v1204_v8, 7  ;;  %v4949_v23 = vpop.f32.mrb[68].mxu0  ;;  %v1213_v63 = vshrl.u32 %v1192_v32, 16  ;;  %v1216_v18 = vshll.u32 %v1192_v32, 16 }
 0x19d   :  { %6806 = vst [vmem:[#allocation17_spill] sm:$0xff] %v4953_v22  ;;  %v4955_v62 = vmax.f32 %v1152_v33, %v1129_v50  ;;  %v719_v26 = vpop.f32.mrb[69].mxu0  ;;  %v1240_v27 = vrot.slane %v4953_v22, 4  ;;  %v4966_v50 = vpack.c.bf16 %v4925_v16, %v4917_v42  ;;  %v1209_v9 = vrot.slane %v1207_v57, 4 }
 0x19e   :  { %v1153_v0 = vmax.f32 %v1145_v58, %v866_v54  ;;  %v1293_v24 = vor.u32 %v1292_v36, %v1207_v57  ;;  %v4957_v15 = vpop.f32.mrb[70].mxu0  ;;  %v1295_v40 = vrot.slane %v1213_v63, 7  ;;  %v1201_v54 = vrot.slane %v1199_v56, 4 }
 0x19f   :  { %6807 = vst [vmem:[#allocation18_spill] sm:$0xff] %v4955_v62  ;;  %v722_v55 = vpop.f32.mrb[71].mxu0  ;;  %6809 = vst [vmem:[#allocation20_spill] sm:$0xff] %v4966_v50  ;;  %v1198_v56 = vrot.slane %v1196_v21, 3  ;;  %v1241_v10 = vsel %vm6661_vm11, %v1239_v4, %v1240_v27  ;;  %v1242_v53 = vrot.slane %v4966_v50, 4 }
 0x1a0   :  { %v4959_v29 = vmax.f32 %v1153_v0, %v1156_v45  ;;  %v1294_v43 = vsel %vm6656_vm9, %v4882_v59, %v1293_v24  ;;  %v1296_v49 = vor.u32 %v1295_v40, %v1216_v18  ;;  %v1188_v45 = vsel %vm4684_vm7, %v4955_v62, 0.0 }
 0x1a1   :  { %1339 = vrot.lane.b32.xlu1 %v1294_v43, %s4255_s23  ;;  %v1206_v0 = vrot.slane %v1204_v8, 3  ;;  %v1243_v26 = vsel %vm6661_vm11, %v1240_v27, %v1242_v53  ;;  %v1218_v43 = vrot.slane %v1216_v18, 4  ;;  %v1215_v8 = vrot.slane %v1213_v63, 3 }
 0x1a2   :  { %6808 = vst [vmem:[#allocation19_spill] sm:$0xff] %v4959_v29  ;;  %v1189_v59 = vsel %vm4691_vm8, %v4959_v29, 0.0  ;;  %v4979_v61 = vpack.c.bf16 %v4959_v29, %v4955_v62  ;;  %v1297_v25 = vsel %vm6656_vm9, %v1292_v36, %v1296_v49  ;;  %v4992_v36 = vor.u32 %v1201_v54, %v1198_v56 }
 0x1a3   :  { %v1193_v11 = vpack.c.bf16 %v1189_v59, %v1188_v45  ;;  %1341 = vrot.lane.b32.xlu0 %v1297_v25, %s4255_s23  ;;  %v1210_v55 = vor.u32 %v1209_v9, %v1206_v0  ;;  %v1219_v25 = vor.u32 %v1218_v43, %v1215_v8  ;;  %v710_v63 = vadd.f32 %v4549_v34, %v4912_v30 }
 0x1a4   :  { %v4989_v1 = vpop.f32.mrb[72].mxu0  ;;  %v6652_v21 = vrot.slane %v4979_v61, 4 }
 0x1a5   :  { %v1222_v33 = vshrl.u32 %v1193_v11, 16  ;;  %1330 = vrot.lane.b32.xlu1 %v1241_v10, %s4255_s23  ;;  %v727_v58 = vpop.f32.mrb[73].mxu0  ;;  %v1225_v32 = vshll.u32 %v1193_v11, 16  ;;  %v5005_v59 = vsel %vm6659_vm12, %v4992_v36, %v1210_v55 }
 0x1a6   :  { %v4994_v6 = vpop.f32.mrb[74].mxu0  ;;  %v1245_v54 = vsel %vm6661_vm11, %v1242_v53, %v6652_v21  ;;  %v713_v58 = vadd.f32 %v4549_v34, %v4920_v60  ;;  %v718_v60 = vadd.f32 %v4549_v34, %v4949_v23 }
 0x1a7   :  { %v1298_v57 = vrot.slane %v1222_v33, 7  ;;  %v730_v4 = vpop.f32.mrb[75].mxu0  ;;  %v1227_v49 = vrot.slane %v1225_v32, 4  ;;  %v1224_v27 = vrot.slane %v1222_v33, 3 }
 0x1a8   :  { %v868_v4 = vmax.f32 %v710_v63, 0.0  ;;  %v869_v43 = vmax.f32 %v713_v58, 0.0 }
 0x1a9   :  { %v1299_v24 = vor.u32 %v1298_v57, %v1225_v32  ;;  %1332 = vrot.lane.b32.xlu1 %v1243_v26, %s4255_s23  ;;  %v5011_v56 = vor.u32 %v1227_v49, %v1224_v27 }
 0x1ab   :  { %v1300_v45 = vsel %vm6656_vm9, %v1295_v40, %v1299_v24  ;;  %6810 = vst [vmem:[#allocation21_spill] sm:$0xff] %v5011_v56  ;;  %v5016_v40 = vsel %vm6659_vm12, %v1210_v55, %v1219_v25  ;;  %v5020_v53 = vsel %vm6659_vm12, %v1219_v25, %v5011_v56 }
 0x1ac   :  { %1343 = vrot.lane.b32.xlu0 %v1300_v45, %s4255_s23  ;;  %v5008_v11 = vpop.f32.mrb[76].mxu0  ;;  %6811 = vst [vmem:[#allocation22_spill] sm:$0xff] %v5016_v40  ;;  %6812 = vst [vmem:[#allocation23_spill] sm:$0xff] %v5020_v53 }
 0x1ad   :  { %1334 = vrot.lane.b32.xlu1 %v1245_v54, %s4255_s23  ;;  %v735_v18 = vpop.f32.mrb[77].mxu0 }
 0x1ae   :  { %v5013_v9 = vpop.f32.mrb[78].mxu0 }
 0x1af   :  { %v738_v10 = vpop.f32.mrb[79].mxu0 }
 0x1b0   :  { %v721_v10 = vadd.f32 %v4549_v34, %v4957_v15 }
 0x1b4   :  { %v741_v33 = vpop.f32.mrb[80].mxu0 }
 0x1b5   :  { %v742_v32 = vadd.f32 %v4549_v34, %v741_v33  ;;  %v743_v57 = vpop.f32.mrb[81].mxu0 }
 0x1b6   :  { %v744_v0 = vpop.f32.mrb[82].mxu0 }
 0x1b7   :  { %v876_v26 = vmax.f32 %v742_v32, 0.0  ;;  %v745_v24 = vadd.f32 %v4549_v34, %v744_v0  ;;  %v746_v55 = vpop.f32.mrb[83].mxu0  ;;  %v870_v32 = vmax.f32 %v718_v60, 0.0  ;;  %v726_v60 = vadd.f32 %v4549_v34, %v4989_v1 }
 0x1b9   :  { %v5028_v49 = vmax.f32 %v868_v4, %v876_v26  ;;  %v5032_v54 = vsel %vm4564_vm0, %v876_v26, 0.0  ;;  %v877_v30 = vmax.f32 %v745_v24, 0.0  ;;  %v4169_v26 = vld [vmem:[%s6640_s3 + $0xc0] sm:$0xff]   ;;  %v871_v24 = vmax.f32 %v721_v10, 0.0 }
 0x1ba   :  { %v6653_v27 = vrot.slane %v5032_v54, 7  ;;  %3764 = vmatprep.subr.bf16.mxu1 %v4169_v26 }
 0x1bb   :  { %v5036_v45 = vmax.f32 %v869_v43, %v877_v30  ;;  %v1435_v8 = vsel %vm4574_vm1, %v877_v30, 0.0 }
 0x1bc   :  { %v1459_v18 = vrot.slane %v1435_v8, 7  ;;  %v749_v25 = vpop.f32.mrb[84].mxu0 }
 0x1bd   :  { %v750_v63 = vadd.f32 %v4549_v34, %v749_v25  ;;  %v751_v33 = vpop.f32.mrb[85].mxu0 }
 0x1be   :  { %v5047_v58 = vsel %vm6658_vm2, %v6653_v27, %v1459_v18  ;;  %v752_v23 = vpop.f32.mrb[86].mxu0 }
 0x1bf   :  { %v878_v57 = vmax.f32 %v750_v63, 0.0  ;;  %v753_v0 = vadd.f32 %v4549_v34, %v752_v23  ;;  %v754_v4 = vpop.f32.mrb[87].mxu0  ;;  %v729_v23 = vadd.f32 %v4549_v34, %v4994_v6 }
 0x1c0   :  { %v872_v4 = vmax.f32 %v726_v60, 0.0 }
 0x1c1   :  { %v5053_v15 = vmax.f32 %v870_v32, %v878_v57  ;;  %v1436_v55 = vsel %vm4604_vm3, %v878_v57, 0.0  ;;  %v879_v43 = vmax.f32 %v753_v0, 0.0 }
 0x1c2   :  { %v1461_v30 = vrot.slane %v1436_v55, 7 }
 0x1c3   :  { %v5059_v8 = vmax.f32 %v871_v24, %v879_v43  ;;  %v1437_v25 = vsel %vm4614_vm4, %v879_v43, 0.0  ;;  %v873_v43 = vmax.f32 %v729_v23, 0.0 }
 0x1c4   :  { %v5064_v63 = vsel %vm6658_vm2, %v1459_v18, %v1461_v30  ;;  %v1463_v10 = vrot.slane %v1437_v25, 7  ;;  %v757_v33 = vpop.f32.mrb[88].mxu0 }
 0x1c5   :  { %v758_v32 = vadd.f32 %v4549_v34, %v757_v33  ;;  %v759_v57 = vpop.f32.mrb[89].mxu0  ;;  %v734_v33 = vadd.f32 %v4549_v34, %v5008_v11 }
 0x1c6   :  { %v5070_v0 = vsel %vm6658_vm2, %v1461_v30, %v1463_v10  ;;  %v760_v1 = vpop.f32.mrb[90].mxu0 }
 0x1c7   :  { %v880_v26 = vmax.f32 %v758_v32, 0.0  ;;  %v761_v24 = vadd.f32 %v4549_v34, %v760_v1  ;;  %v762_v55 = vpop.f32.mrb[91].mxu0  ;;  %v737_v1 = vadd.f32 %v4549_v34, %v5013_v9 }
 0x1c8   :  { %v874_v55 = vmax.f32 %v734_v33, 0.0 }
 0x1c9   :  { %v5073_v18 = vmax.f32 %v872_v4, %v880_v26  ;;  %v1438_v25 = vsel %vm4644_vm5, %v880_v26, 0.0  ;;  %v881_v21 = vmax.f32 %v761_v24, 0.0  ;;  %v875_v27 = vmax.f32 %v737_v1, 0.0 }
 0x1ca   :  { %v1465_v6 = vrot.slane %v1438_v25, 7 }
 0x1cb   :  { %v5079_v57 = vmax.f32 %v873_v43, %v881_v21  ;;  %v1439_v30 = vsel %vm4654_vm6, %v881_v21, 0.0 }
 0x1cc   :  { %v5084_v60 = vsel %vm6658_vm2, %v1463_v10, %v1465_v6  ;;  %v1467_v32 = vrot.slane %v1439_v30, 7  ;;  %v765_v23 = vpop.f32.mrb[92].mxu0 }
 0x1cd   :  { %v766_v4 = vadd.f32 %v4549_v34, %v765_v23  ;;  %v767_v26 = vpop.f32.mrb[93].mxu0 }
 0x1ce   :  { %v5090_v24 = vsel %vm6658_vm2, %v1465_v6, %v1467_v32  ;;  %v768_v11 = vpop.f32.mrb[94].mxu0 }
 0x1cf   :  { %v882_v43 = vmax.f32 %v766_v4, 0.0  ;;  %v769_v25 = vadd.f32 %v4549_v34, %v768_v11  ;;  %v770_v21 = vpop.f32.mrb[95].mxu0 }
 0x1d1   :  { %v5093_v10 = vmax.f32 %v874_v55, %v882_v43  ;;  %v1440_v30 = vsel %vm4684_vm7, %v882_v43, 0.0  ;;  %v883_v39 = vmax.f32 %v769_v25, 0.0 }
 0x1d2   :  { %v1469_v9 = vrot.slane %v1440_v30, 7  ;;  %v6813_v30 = vand.u32 7, %v4552_v35  ;;  %v6821_v35 = vand.u32 7, %v4579_v52  ;;  %v6831_v52 = vmov 0 }
 0x1d3   :  { %v5097_v56 = vmax.f32 %v875_v27, %v883_v39  ;;  %v1441_v6 = vsel %vm4691_vm8, %v883_v39, 0.0  ;;  %v6814_v39 = vmov 0 }
 0x1d4   :  { %v5102_v23 = vsel %vm6658_vm2, %v1467_v32, %v1469_v9  ;;  %v1471_v33 = vrot.slane %v1441_v6, 7  ;;  %v773_v4 = vpop.f32.mrb[96].mxu0  ;;  %vm5113_vm13 = vcmp.gt.s32.totalorder %v6813_v30, 0  ;;  %v6817_v6 = vand.u32 7, %v4536_v28 }
 0x1d5   :  { %v775_v26 = vpop.f32.mrb[97].mxu0  ;;  %v6815_v39 = vsel %vm5113_vm13, 4294967295, %v6814_v39  ;;  %vm5132_vm15 = vcmp.gt.s32.totalorder %v6821_v35, 0 }
 0x1d6   :  { %v5105_v1 = vsel %vm6658_vm2, %v1469_v9, %v1471_v33  ;;  %v776_v11 = vpop.f32.mrb[98].mxu0  ;;  %6816 = vst [vmem:[#allocation24_spill] sm:$0xff] %v6815_v39  ;;  %vm5121_vm14 = vcmp.gt.s32.totalorder %v6817_v6, 0  ;;  %v6818_v9 = vmov 0  ;;  %v1171_v26 = vsel %vm5113_vm13, %v4823_v3, 0.0 }
 0x1d7   :  { %v778_v55 = vpop.f32.mrb[99].mxu0  ;;  %v6819_v9 = vsel %vm5121_vm14, 4294967295, %v6818_v9  ;;  %v1170_v28 = vsel %vm5121_vm14, %v4812_v37, 0.0  ;;  %v6826_v6 = vand.u32 7, %v4569_v46  ;;  %v6830_v3 = vand.u32 7, %v4619_v13 }
 0x1d8   :  { %6820 = vst [vmem:[#allocation25_spill] sm:$0xff] %v6819_v9  ;;  %v5139_v30 = vpack.c.bf16 %v1171_v26, %v1170_v28  ;;  %v1173_v35 = vsel %vm5132_vm15, %v4885_v2, 0.0  ;;  %v6835_v26 = vmov 0  ;;  %v6842_v28 = vand.u32 7, %v4649_v41 }
 0x1d9   :  { %vm5143_vm9 = vcmp.gt.s32.totalorder %v6826_v6, 0  ;;  %vm5149_vm2 = vcmp.gt.s32.totalorder %v6830_v3, 0  ;;  %v5219_v53 = vadd.f32 %v4549_v34, %v776_v11 }
 0x1da   :  { %6825 = vst [vmem:[#allocation27_spill] sm:$0xff] %v5139_v30  ;;  %v6832_v52 = vsel %vm5149_vm2, 4294967295, %v6831_v52  ;;  %v1172_v46 = vsel %vm5143_vm9, %v4866_v19, 0.0  ;;  %v1175_v13 = vsel %vm5149_vm2, %v4925_v16, 0.0  ;;  %v6675_v6 = vshll.u32 %v5139_v30, 16 }
 0x1db   :  { %6833 = vst [vmem:[#allocation29_spill] sm:$0xff] %v6832_v52  ;;  %v5172_v2 = vpack.c.bf16 %v1173_v35, %v1172_v46  ;;  %vm5189_vm2 = vcmp.gt.s32.totalorder %v6842_v28, 0  ;;  %v6843_v35 = vmov 0 }
 0x1dc   :  { %v5107_v21 = vpop.f32.mrb[100].mxu0  ;;  %v6844_v35 = vsel %vm5189_vm2, 4294967295, %v6843_v35  ;;  %v1176_v41 = vsel %vm5189_vm2, %v4955_v62, 0.0  ;;  %vm6851_vm2 = vsmask.f32 4352 }
 0x1dd   :  { %v783_v43 = vpop.f32.mrb[101].mxu0  ;;  %6845 = vst [vmem:[#allocation32_spill] sm:$0xff] %v6844_v35 }
 0x1de   :  { %v5109_v25 = vpop.f32.mrb[102].mxu0  ;;  %v6822_v43 = vmov 0 }
 0x1df   :  { %v786_v27 = vpop.f32.mrb[103].mxu0  ;;  %v6823_v43 = vsel %vm5132_vm15, 4294967295, %v6822_v43  ;;  %vm1231_vm15 = vcmask 1044480  }
 0x1e0   :  { %6824 = vst [vmem:[#allocation26_spill] sm:$0xff] %v6823_v43  ;;  %vm5223_vm13 = vmand %vm1231_vm15, %vm6851_vm2  ;;  %vm6859_vm2 = vcmask 1040384  }
 0x1e1   :  { %vm6860_vm15 = vmmov %vm6859_vm2 }
 0x1e4   :  { %v5117_v32 = vpop.f32.mrb[104].mxu0 }
 0x1e5   :  { %v791_v33 = vpop.f32.mrb[105].mxu0 }
 0x1e6   :  { %v5128_v55 = vpop.f32.mrb[106].mxu0  ;;  %v6827_v33 = vmov 0 }
 0x1e7   :  { %v794_v27 = vpop.f32.mrb[107].mxu0  ;;  %v6828_v33 = vsel %vm5143_vm9, 4294967295, %v6827_v33 }
 0x1e8   :  { %6829 = vst [vmem:[#allocation28_spill] sm:$0xff] %v6828_v33  ;;  %v6834_v27 = vand.u32 7, %v4609_v7  ;;  %v6838_v7 = vand.u32 7, %v4659_v48 }
 0x1ea   :  { %vm5158_vm12 = vcmp.gt.s32.totalorder %v6834_v27, 0  ;;  %vm5176_vm11 = vcmp.gt.s32.totalorder %v6838_v7, 0  ;;  %v6839_v27 = vmov 0 }
 0x1eb   :  { %v6836_v26 = vsel %vm5158_vm12, 4294967295, %v6835_v26  ;;  %v6840_v27 = vsel %vm5176_vm11, 4294967295, %v6839_v27  ;;  %v1174_v19 = vsel %vm5158_vm12, %v4917_v42, 0.0  ;;  %v1177_v46 = vsel %vm5176_vm11, %v4959_v29, 0.0 }
 0x1ec   :  { %6837 = vst [vmem:[#allocation30_spill] sm:$0xff] %v6836_v26  ;;  %v5168_v3 = vpop.f32.mrb[108].mxu0  ;;  %6841 = vst [vmem:[#allocation31_spill] sm:$0xff] %v6840_v27  ;;  %v5185_v50 = vpack.c.bf16 %v1175_v13, %v1174_v19  ;;  %v1257_v42 = vrot.slane %v6675_v6, 5  ;;  %v1260_v19 = vshrl.u32 %v5172_v2, 16  ;;  %v1263_v13 = vshll.u32 %v5172_v2, 16 }
 0x1ed   :  { %v799_v37 = vpop.f32.mrb[109].mxu0  ;;  %vm6710_vm12 = vsmask.f32 3328  ;;  %v5207_v29 = vpack.c.bf16 %v1177_v46, %v1176_v41  ;;  %vm6848_vm11 = vcmask 1043456   ;;  %v6849_v2 = vmov 0 }
 0x1ee   :  { %v5183_v16 = vpop.f32.mrb[110].mxu0  ;;  %v6846_v37 = vshrl.u32 %v5139_v30, 16  ;;  %v6694_v28 = vshrl.u32 %v5185_v50, 16  ;;  %vm5214_vm9 = vmand %vm6848_vm11, %vm6710_vm12  ;;  %v1262_v20 = vrot.slane %v1260_v19, 4  ;;  %v1265_v62 = vrot.slane %v1263_v13, 5 }
 0x1ef   :  { %v802_v48 = vpop.f32.mrb[111].mxu0  ;;  %6847 = vst [vmem:[#allocation33_spill] sm:$0xff] %v5207_v29  ;;  %v6850_v2 = vsel %vm5214_vm9, 4294967295, %v6849_v2  ;;  %v6854_v41 = vshll.u32 %v5185_v50, 16  ;;  %v6855_v30 = vshrl.u32 %v5207_v29, 16  ;;  %vm6711_vm11 = vcmask 523264  }
 0x1f0   :  { %v1254_v7 = vrot.slane %v6846_v37, 4  ;;  %v774_v37 = vadd.f32 %v4549_v34, %v773_v4  ;;  %v6852_v4 = vmov 0 }
 0x1f1   :  { %v6853_v4 = vsel %vm5223_vm13, 4294967295, %v6852_v4  ;;  %v1274_v35 = vrot.slane %v6854_v41, 5  ;;  %v6703_v41 = vmax.f32 %v5219_v53, 0.0 }
 0x1f2   :  { %v5210_v6 = vor.u32 %v1257_v42, %v1254_v7  ;;  %v1271_v7 = vrot.slane %v6694_v28, 4  ;;  %v884_v27 = vmax.f32 %v774_v37, 0.0  ;;  %v1280_v37 = vrot.slane %v6855_v30, 4 }
 0x1f4   :  { %v805_v22 = vpop.f32.mrb[112].mxu0  ;;  %v5258_v28 = vor.u32 %v1274_v35, %v1271_v7  ;;  %v6858_v35 = vrot.slane %v5032_v54, 7 }
 0x1f5   :  { %v806_v48 = vadd.f32 %v4549_v34, %v805_v22  ;;  %v807_v46 = vpop.f32.mrb[113].mxu0  ;;  %v5237_v34 = vld [vmem:[%s6639_s2] ss:$0 sm:$0xff] }
 0x1f6   :  { %v808_v42 = vpop.f32.mrb[114].mxu0  ;;  %v5256_v52 = vadd.f32 %v5237_v34, %v5107_v21  ;;  %v6857_v21 = vshll.u32 %v5207_v29, 16  ;;  %v1481_v7 = vsel %vm6859_vm2, 0.0, %v6858_v35  ;;  %v5278_v30 = vadd.f32 %v5237_v34, %v5109_v25 }
 0x1f7   :  { %v5232_v11 = vmax.f32 %v806_v48, 0.0  ;;  %v809_v22 = vadd.f32 %v5237_v34, %v808_v42  ;;  %v810_v46 = vpop.f32.mrb[115].mxu0  ;;  %v1266_v48 = vor.u32 %v1265_v62, %v1262_v20  ;;  %v5262_v20 = vrot.slane %v1263_v13, 1 }
 0x1f8   :  { %v1283_v33 = vrot.slane %v6857_v21, 5  ;;  %v886_v54 = vmax.f32 %v5256_v52, 0.0  ;;  %v5289_v25 = vadd.f32 %v5237_v34, %v5117_v32  ;;  %v6707_v52 = vmax.f32 %v5278_v30, 0.0 }
 0x1f9   :  { %v1418_v26 = vmax.f32 %v884_v27, %v5232_v11  ;;  %v1442_v42 = vsel %vm4564_vm0, %v5232_v11, 0.0  ;;  %v5252_v46 = vmax.f32 %v809_v22, 0.0  ;;  %6856 = vst [vmem:[#allocation34_spill] sm:$0xff] %v5262_v20  ;;  %v5284_v21 = vsel %vm6710_vm12, %v5210_v6, %v1266_v48 }
 0x1fa   :  { %v5302_v32 = vadd.f32 %v5237_v34, %v5128_v55 }
 0x1fb   :  { %v1426_v62 = vmax.f32 %v5028_v49, %v1418_v26  ;;  %v1419_v43 = vmax.f32 %v6703_v41, %v5252_v46  ;;  %v1443_v22 = vsel %vm4574_vm1, %v5252_v46, 0.0  ;;  %v1505_v49 = vrot.slane %v1442_v42, 7 }
 0x1fc   :  { %v1506_v26 = vrot.slane %v1443_v22, 7  ;;  %v813_v13 = vpop.f32.mrb[116].mxu0 }
 0x1fd   :  { %v1482_v39 = vmax.f32 %v1426_v62, %v1481_v7  ;;  %v1427_v41 = vmax.f32 %v5036_v45, %v1419_v43  ;;  %v814_v40 = vadd.f32 %v5237_v34, %v813_v13  ;;  %v815_v9 = vpop.f32.mrb[117].mxu0  ;;  %v5293_v62 = vor.u32 %v5262_v20, %v1260_v19 }
 0x1fe   :  { %v1507_v42 = vsel %vm6860_vm15, %v1505_v49, %v1506_v26  ;;  %v816_v22 = vpop.f32.mrb[118].mxu0  ;;  %v5306_v13 = vsel %vm6710_vm12, %v1266_v48, %v5258_v28  ;;  %v5308_v19 = vor.u32 %v1283_v33, %v1280_v37  ;;  %v1525_v55 = vsel %vm6859_vm2, 0.0, %v1505_v49  ;;  %vm6862_vm15 = vmmov %vm6859_vm2 }
 0x1ff   :  { %6861 = vst [vmem:[#allocation35_spill] sm:$0xff] %v5293_v62  ;;  %v1490_v45 = vmax.f32 %v1482_v39, 0.0  ;;  %v1483_v9 = vmax.f32 %v1427_v41, %v5047_v58  ;;  %v5296_v43 = vmax.f32 %v814_v40, 0.0  ;;  %v817_v35 = vadd.f32 %v5237_v34, %v816_v22  ;;  %v818_v7 = vpop.f32.mrb[119].mxu0 }
 0x200   :  { %v5316_v41 = vadd.f32 %v5237_v34, %v5168_v3 }
 0x201   :  { %v1526_v39 = vmax.f32 %v1490_v45, 0.0  ;;  %v1491_v20 = vmax.f32 %v1483_v9, %v884_v27  ;;  %v1420_v40 = vmax.f32 %v886_v54, %v5296_v43  ;;  %v1444_v58 = vsel %vm4604_vm3, %v5296_v43, 0.0 }
 0x202   :  { %v1508_v22 = vrot.slane %v1444_v58, 7  ;;  %v5319_v7 = vmax.f32 %v817_v35, 0.0  ;;  %v890_v45 = vmax.f32 %v5316_v41, 0.0  ;;  %v6881_v41 = vshll.u32 %v5185_v50, 16 }
 0x203   :  { %v1534_v37 = vmax.f32 %v1526_v39, 0.0  ;;  %v1527_v48 = vmax.f32 %v1491_v20, %v1525_v55  ;;  %v1428_v27 = vmax.f32 %v5053_v15, %v1420_v40 }
 0x204   :  { %v1509_v9 = vsel %vm6862_vm15, %v1506_v26, %v1508_v22  ;;  %v1421_v3 = vmax.f32 %v6707_v52, %v5319_v7  ;;  %v1445_v49 = vsel %vm4614_vm4, %v5319_v7, 0.0  ;;  %v821_v35 = vpop.f32.mrb[120].mxu0  ;;  %v5338_v26 = vadd.f32 %v5237_v34, %v5183_v16  ;;  %vm6871_vm15 = vmmov %vm6859_vm2 }
 0x205   :  { %v5331_v58 = vmax.f32 %v1534_v37, %v1525_v55  ;;  %v1535_v39 = vmax.f32 %v1527_v48, %v5232_v11  ;;  %v1484_v20 = vmax.f32 %v1428_v27, %v5064_v63  ;;  %v1510_v15 = vrot.slane %v1445_v49, 7  ;;  %v823_v40 = vpop.f32.mrb[121].mxu0 }
 0x206   :  { %v1429_v52 = vmax.f32 %v5059_v8, %v1421_v3  ;;  %v822_v33 = vadd.f32 %v5237_v34, %v821_v35  ;;  %v824_v62 = vpop.f32.mrb[122].mxu0  ;;  %v6865_v55 = vmax.f32 %v5219_v53, 0.0  ;;  %v6866_v8 = vsel %vm5214_vm9, 0, %v5210_v6 }
 0x207   :  { %6863 = vst [vmem:[#allocation36_spill] sm:$0xff] %v5331_v58  ;;  %v5342_v29 = vmax.f32 %v1535_v39, %v1507_v42  ;;  %v5347_v63 = vsel %vm6859_vm2, %v1508_v22, %v1510_v15  ;;  %v825_v48 = vadd.f32 %v5237_v34, %v824_v62  ;;  %v826_v27 = vpop.f32.mrb[123].mxu0  ;;  %v1570_v53 = vsel %vm4564_vm0, %v5331_v58, 0.0 }
 0x208   :  { %v1492_v11 = vmax.f32 %v1484_v20, %v6865_v55  ;;  %v1338_v37 = vpop.permute.xlu0 %1337  ;;  %v1485_v16 = vmax.f32 %v1429_v52, %v5070_v0  ;;  %v5351_v49 = vmax.f32 %v822_v33, 0.0  ;;  %v6867_v6 = vmax.f32 %v5289_v25, 0.0  ;;  %v4170_v20 = vld [vmem:[%s6640_s3 + $0x80] sm:$0xff]   ;;  %v4171_v27 = vld [vmem:[%s6640_s3 + $0xc8] sm:$0xff]  }
 0x209   :  { %6864 = vst [vmem:[#allocation37_spill] sm:$0xff] %v5342_v29  ;;  %v1376_v3 = vsel %vm6711_vm11, %v6866_v8, %v1338_v37  ;;  %v5361_v35 = vmax.f32 %v825_v48, 0.0  ;;  %v5365_v62 = vpack.c.bf16 %v5342_v29, %v5331_v58  ;;  %v1571_v0 = vsel %vm4574_vm1, %v5342_v29, 0.0 }
 0x20a   :  { %v1528_v22 = vmax.f32 %v1492_v11, %v1507_v42  ;;  %2128 = vmatprep.mubr.bf16.mxu1 %v1376_v3  ;;  %v1493_v52 = vmax.f32 %v1485_v16, %v886_v54  ;;  %v1422_v33 = vmax.f32 %v6867_v6, %v5351_v49  ;;  %v1446_v42 = vsel %vm4644_vm5, %v5351_v49, 0.0 }
 0x20b   :  { %v5376_v39 = vpack.c.bf16 %v1571_v0, %v1570_v53  ;;  %v1512_v55 = vrot.slane %v1446_v42, 7  ;;  %v6868_v54 = vmax.f32 %v5302_v32, 0.0  ;;  %v1447_v37 = vsel %vm4654_vm6, %v5361_v35, 0.0 }
 0x20c   :  { %v1536_v40 = vmax.f32 %v1528_v22, %v5252_v46  ;;  %v1329_v48 = vpop.permute.xlu0 %1328  ;;  %v1529_v16 = vmax.f32 %v1493_v52, %v1509_v9  ;;  %v1430_v8 = vmax.f32 %v5073_v18, %v1422_v33  ;;  %v1514_v3 = vrot.slane %v1447_v37, 7  ;;  %v829_v22 = vpop.f32.mrb[124].mxu0 }
 0x20d   :  { %v1423_v11 = vmax.f32 %v6868_v54, %v5361_v35  ;;  %v6869_v46 = vsel %vm5223_vm13, 0, %v4992_v36  ;;  %v1513_v6 = vsel %vm6871_vm15, %v1510_v15, %v1512_v55  ;;  %v830_v54 = vadd.f32 %v5237_v34, %v829_v22  ;;  %v831_v52 = vpop.f32.mrb[125].mxu0 }
 0x20e   :  { %v1360_v53 = vsel %vm6711_vm11, %v6869_v46, %v1329_v48  ;;  %v5397_v0 = vmax.f32 %v1536_v40, %v1509_v9  ;;  %v1537_v18 = vmax.f32 %v1529_v16, %v5296_v43  ;;  %v1486_v33 = vmax.f32 %v1430_v8, %v5084_v60  ;;  %v832_v36 = vpop.f32.mrb[126].mxu0  ;;  %v4172_v9 = vld [vmem:[%s6640_s3 + $0x88] sm:$0xff]  }
 0x20f   :  { %v1431_v42 = vmax.f32 %v5079_v57, %v1423_v11  ;;  %2129 = vmatmul.mubr.bf16.vlgmr.msra.gmra.mrb[0].mxu1 %v1360_v53  ;;  %v5405_v37 = vsel %vm6859_vm2, %v1512_v55, %v1514_v3  ;;  %v1623_v48 = vrot.slane %v5365_v62, 4  ;;  %v5412_v15 = vmax.f32 %v830_v54, 0.0  ;;  %v834_v43 = vpop.f32.mrb[127].mxu0  ;;  %v4173_v55 = vld [vmem:[%s6640_s3 + $0xd0] sm:$0xff]  }
 0x210   :  { %6870 = vst [vmem:[#allocation38_spill] sm:$0xff] %v5397_v0  ;;  %3765 = vmatpush3.bf16.msra.mxu1 %v4170_v20  ;;  %v833_v40 = vadd.f32 %v5237_v34, %v832_v36  ;;  %v6714_v60 = vshrl.u32 %v5376_v39, 16  ;;  %v891_v20 = vmax.f32 %v5338_v26, 0.0  ;;  %v5421_v11 = vmax.f32 %v1537_v18, %v5347_v63  ;;  %v4174_v54 = vld [vmem:[%s6640_s3 + $0x90] sm:$0xff]  }
 0x211   :  { %v1487_v57 = vmax.f32 %v1431_v42, %v5090_v24  ;;  %3766 = vmatprep.subr.bf16.mxu1 %v4171_v27  ;;  %v6873_v16 = vmax.f32 %v5278_v30, 0.0  ;;  %vm6874_vm15 = vcmask 1043456   ;;  %v6875_v8 = vmax.f32 %v5289_v25, 0.0 }
 0x212   :  { %6872 = vst [vmem:[#allocation39_spill] sm:$0xff] %v5421_v11  ;;  %v1631_v34 = vsel %vm6874_vm15, 0, %v1623_v48  ;;  %v1424_v27 = vmax.f32 %v890_v45, %v5412_v15  ;;  %v1448_v26 = vsel %vm4684_vm7, %v5412_v15, 0.0  ;;  %v899_v53 = vmax.f32 %v833_v40, 0.0  ;;  %vm6877_vm15 = vmmov %vm6859_vm2 }
 0x213   :  { %v1494_v24 = vmax.f32 %v1486_v33, %v6873_v16  ;;  %v1495_v46 = vmax.f32 %v1487_v57, %v6875_v8  ;;  %1702 = vrot.lane.b32.xlu1 %v1631_v34, %s4255_s23  ;;  %v1516_v22 = vrot.slane %v1448_v26, 7  ;;  %v6716_v42 = vshll.u32 %v5376_v39, 16  ;;  %v1340_v33 = vpop.permute.xlu1 %1339  ;;  %v4175_v57 = vld [vmem:[%s6640_s3 + $0xd8] sm:$0xff]  }
 0x214   :  { %v5441_v25 = vrot.slane %v6714_v60, 7  ;;  %3767 = vmatpush3.bf16.msra.mxu1 %v4172_v9  ;;  %v1432_v18 = vmax.f32 %v5093_v10, %v1424_v27  ;;  %v1425_v36 = vmax.f32 %v891_v20, %v899_v53  ;;  %v1380_v16 = vsel %vm6711_vm11, %v5284_v21, %v1340_v33 }
 0x215   :  { %v1530_v30 = vmax.f32 %v1494_v24, %v5347_v63  ;;  %v1531_v52 = vmax.f32 %v1495_v46, %v1513_v6  ;;  %v1449_v63 = vsel %vm4691_vm8, %v899_v53, 0.0  ;;  %3768 = vmatprep.subr.bf16.mxu1 %v4173_v55  ;;  %v1517_v9 = vsel %vm6859_vm2, %v1514_v3, %v1516_v22  ;;  %2136 = vmatprep.mubr.bf16.mxu1 %v1380_v16  ;;  %v1342_v3 = vpop.permute.xlu0 %1341 }
 0x216   :  { %v1543_v43 = vrot.slane %v1449_v63, 7  ;;  %v1488_v20 = vmax.f32 %v1432_v18, %v5102_v23  ;;  %v1433_v24 = vmax.f32 %v5097_v56, %v1425_v36  ;;  %v1670_v55 = vor.u32 %v5441_v25, %v6716_v42  ;;  %v4176_v56 = vld [vmem:[%s6640_s3 + $0x98] sm:$0xff]  }
 0x217   :  { %v1538_v40 = vmax.f32 %v1530_v30, %v5319_v7  ;;  %v1539_v10 = vmax.f32 %v1531_v52, %v5351_v49  ;;  %v5467_v8 = vpack.c.bf16 %v5421_v11, %v5397_v0  ;;  %v1572_v23 = vsel %vm4604_vm3, %v5397_v0, 0.0  ;;  %v1331_v26 = vpop.permute.xlu1 %1330  ;;  %v4177_v30 = vld [vmem:[%s6640_s3 + $0xe0] sm:$0xff]  }
 0x218   :  { %v1544_v7 = vsel %vm6877_vm15, %v1516_v22, %v1543_v43  ;;  %3769 = vmatpush3.bf16.msra.mxu1 %v4174_v54  ;;  %v1489_v27 = vmax.f32 %v1433_v24, %v5105_v1  ;;  %v1681_v53 = vsel %vm4896_vm10, 0, %v1670_v55  ;;  %v5489_v22 = vsel %vm6711_vm11, %v5005_v59, %v1331_v26  ;;  %v4179_v24 = vld [vmem:[%s6640_s3 + $0xe8] sm:$0xff]  }
 0x219   :  { %v5462_v34 = vmax.f32 %v1538_v40, %v1513_v6  ;;  %v5476_v49 = vmax.f32 %v1539_v10, %v5405_v37  ;;  %v6879_v6 = vmax.f32 %v5302_v32, 0.0  ;;  %3770 = vmatprep.subr.bf16.mxu1 %v4175_v57  ;;  %1711 = vrot.lane.b32.xlu0 %v1681_v53, %s4255_s23  ;;  %v1624_v32 = vrot.slane %v5467_v8, 4  ;;  %v4178_v40 = vld [vmem:[%s6640_s3 + $0xa0] sm:$0xff]  }
 0x21a   :  { %v1384_v1 = vsel %vm6711_vm11, %v5306_v13, %v1342_v3  ;;  %v1573_v54 = vsel %vm4614_vm4, %v5421_v11, 0.0  ;;  %v1497_v18 = vmax.f32 %v1489_v27, %v890_v45  ;;  %2137 = vmatmul.mubr.bf16.gmra.mrb[4].mxu1 %v5489_v22  ;;  %vm6880_vm2 = vcmask 1043456  }
 0x21b   :  { %6876 = vst [vmem:[#allocation40_spill] sm:$0xff] %v5462_v34  ;;  %6878 = vst [vmem:[#allocation41_spill] sm:$0xff] %v5476_v49  ;;  %v1496_v46 = vmax.f32 %v1488_v20, %v6879_v6  ;;  %v5501_v33 = vpack.c.bf16 %v1573_v54, %v1572_v23  ;;  %v5505_v59 = vpack.c.bf16 %v5476_v49, %v5462_v34  ;;  %2144 = vmatprep.mubr.bf16.mxu1 %v1384_v1  ;;  %v1333_v16 = vpop.permute.xlu1 %1332  ;;  %vm6939_vm1 = vsmask.f32 4352 }
 0x21c   :  { %v1625_v36 = vsel %vm6880_vm2, %v1623_v48, %v1624_v32  ;;  %v5515_v45 = vrot.slane %v6881_v41, 1  ;;  %v6882_v63 = vrot.slane %v4979_v61, 4  ;;  %vm6883_vm15 = vmmov %vm6880_vm2  ;;  %3771 = vmatpush3.bf16.msra.mxu1 %v4176_v56  ;;  %v1533_v43 = vmax.f32 %v1497_v18, %v1517_v9 }
 0x21d   :  { %v1532_v52 = vmax.f32 %v1496_v46, %v5405_v37  ;;  %v1575_v37 = vsel %vm4654_vm6, %v5476_v49, 0.0  ;;  %1704 = vrot.lane.b32.xlu1 %v1625_v36, %s4255_s23  ;;  %v6713_v10 = vshrl.u32 %v5501_v33, 16  ;;  %v1574_v20 = vsel %vm4644_vm5, %v5462_v34, 0.0  ;;  %3772 = vmatprep.subr.bf16.mxu1 %v4177_v30  ;;  %v6886_v30 = vld [vmem:[#allocation22_spill] sm:$0xff] }
 0x21e   :  { %v5520_v57 = vsel %vm6883_vm15, %v6882_v63, 0  ;;  %v1626_v55 = vrot.slane %v5505_v59, 4  ;;  %v5540_v3 = vpack.c.bf16 %v1575_v37, %v1574_v20  ;;  %v1558_v56 = vsel %vm5121_vm14, %v5331_v58, 0.0  ;;  %v1344_v53 = vpop.permute.xlu0 %1343  ;;  %vm6887_vm15 = vmmov %vm6880_vm2  ;;  %v6891_v63 = vld [vmem:[#allocation28_spill] sm:$0xff] }
 0x21f   :  { %v1540_v48 = vmax.f32 %v1532_v52, %v5361_v35  ;;  %v5538_v35 = vsel %vm6710_vm12, %v5258_v28, %v5308_v19  ;;  %v1541_v46 = vmax.f32 %v1533_v43, %v5412_v15  ;;  %v6715_v27 = vshll.u32 %v5501_v33, 16  ;;  %v6888_v52 = vld [vmem:[#allocation24_spill] sm:$0xff] }
 0x220   :  { %v1671_v26 = vrot.slane %v6713_v10, 7  ;;  %v5553_v28 = vsel %vm6711_vm11, %v6886_v30, %v1333_v16  ;;  %v1627_v1 = vsel %vm6887_vm15, %v1624_v32, %v1626_v55  ;;  %v6712_v54 = vshrl.u32 %v5540_v3, 16  ;;  %3773 = vmatpush3.bf16.msra.mxu1 %v4178_v40  ;;  %v4180_v32 = vld [vmem:[%s6640_s3 + $0xa8] sm:$0xff]   ;;  %v4181_v16 = vld [vmem:[%s6640_s3 + $0xf0] sm:$0xff]  }
 0x221   :  { %v5545_v6 = vmax.f32 %v1540_v48, %v1517_v9  ;;  %vm6889_vm12 = vnez %v6888_v52  ;;  %v5560_v15 = vmax.f32 %v1541_v46, %v1544_v7  ;;  %1706 = vrot.lane.b32.xlu1 %v1627_v1, %s4255_s23  ;;  %v1388_v36 = vsel %vm6711_vm11, %v5538_v35, %v1344_v53  ;;  %3774 = vmatprep.subr.bf16.mxu1 %v4179_v24  ;;  %v6893_v48 = vld [vmem:[#allocation26_spill] sm:$0xff] }
 0x222   :  { %v1559_v9 = vsel %vm6889_vm12, %v5342_v29, 0.0  ;;  %v1672_v18 = vor.u32 %v1671_v26, %v6715_v27  ;;  %v6719_v37 = vshll.u32 %v5540_v3, 16  ;;  %v1674_v41 = vrot.slane %v6712_v54, 7  ;;  %2145 = vmatmul.mubr.bf16.gmra.mrb[8].mxu1 %v5553_v28  ;;  %v6903_v27 = vld [vmem:[#allocation35_spill] sm:$0xff] }
 0x223   :  { %6885 = vst [vmem:[#allocation25_spill] sm:$0xff] %v5545_v6  ;;  %6890 = vst [vmem:[#allocation22_spill] sm:$0xff] %v5560_v15  ;;  %v1576_v7 = vsel %vm4684_vm7, %v5545_v6, 0.0  ;;  %vm6892_vm15 = vnez %v6891_v63  ;;  %vm6894_vm11 = vnez %v6893_v48  ;;  %vm6895_vm2 = vsmask.f32 256  ;;  %2152 = vmatprep.mubr.bf16.mxu1 %v1388_v36  ;;  %v4182_v36 = vld [vmem:[%s6640_s3 + $0xb0] sm:$0xff]  }
 0x224   :  { %v1560_v40 = vsel %vm6892_vm15, %v5397_v0, 0.0  ;;  %v1561_v43 = vsel %vm6894_vm11, %v5421_v11, 0.0  ;;  %v1673_v20 = vsel %vm6895_vm2, %v5441_v25, %v1672_v18  ;;  %v5590_v24 = vpack.c.bf16 %v5560_v15, %v5545_v6  ;;  %v6896_v25 = vld [vmem:[#allocation27_spill] sm:$0xff]  ;;  %3775 = vmatpush3.bf16.msra.mxu1 %v4180_v32 }
 0x225   :  { %v1577_v46 = vsel %vm4691_vm8, %v5560_v15, 0.0  ;;  %v5595_v53 = vpack.c.bf16 %v1559_v9, %v1558_v56  ;;  %1713 = vrot.lane.b32.xlu0 %v1673_v20, %s4255_s23  ;;  %v1675_v30 = vor.u32 %v1674_v41, %v6719_v37  ;;  %v6897_v18 = vshll.u32 %v6896_v25, 16  ;;  %v6898_v9 = vld [vmem:[#allocation33_spill] sm:$0xff]  ;;  %3776 = vmatprep.subr.bf16.mxu1 %v4181_v16  ;;  %v6913_v11 = vld [vmem:[#allocation23_spill] sm:$0xff] }
 0x226   :  { %v5600_v1 = vpack.c.bf16 %v1577_v46, %v1576_v7  ;;  %v5604_v10 = vpack.c.bf16 %v1561_v43, %v1560_v40  ;;  %v6724_v60 = vrot.slane %v5590_v24, 4  ;;  %v6899_v42 = vshll.u32 %v6898_v9, 16  ;;  %v1335_v7 = vpop.permute.xlu1 %1334 }
 0x227   :  { %v1306_v54 = vrot.slane %v6897_v18, 1  ;;  %v1636_v56 = vshll.u32 %v5595_v53, 16  ;;  %v1676_v46 = vsel %vm6895_vm2, %v1671_v26, %v1675_v30  ;;  %v6900_v18 = vld [vmem:[#allocation29_spill] sm:$0xff]  ;;  %vm6902_vm6 = vcmask 1043456  }
 0x228   :  { %v5611_v20 = vrot.slane %v6899_v42, 1  ;;  %v1644_v43 = vshll.u32 %v5604_v10, 16  ;;  %vm6901_vm10 = vnez %v6900_v18  ;;  %v4183_v42 = vld [vmem:[%s6640_s3 + $0xf8] sm:$0xff]   ;;  %v1629_v32 = vsel %vm6902_vm6, %v1626_v55, %v6724_v60  ;;  %3777 = vmatpush3.bf16.msra.mxu1 %v4182_v36 }
 0x229   :  { %v1563_v37 = vsel %vm6901_vm10, %v5476_v49, 0.0  ;;  %vm6904_vm2 = vsmask.f32 7424  ;;  %v6905_v30 = vshrl.u32 %v5185_v50, 16  ;;  %v6906_v49 = vld [vmem:[#allocation31_spill] sm:$0xff]  ;;  %1715 = vrot.lane.b32.xlu0 %v1676_v46, %s4255_s23  ;;  %1708 = vrot.lane.b32.xlu1 %v1629_v32, %s4255_s23  ;;  %v1612_v29 = vshll.u32 %v5600_v1, 16 }
 0x22a   :  { %v1312_v26 = vsel %vm6904_vm2, %v6903_v27, %v5515_v45  ;;  %vm6907_vm10 = vnez %v6906_v49  ;;  %v6908_v55 = vshrl.u32 %v5600_v1, 16  ;;  %v6909_v27 = vld [vmem:[#allocation30_spill] sm:$0xff]  ;;  %vm6914_vm8 = vcmask 523264   ;;  %3778 = vmatprep.subr.bf16.mxu1 %v4183_v42 }
 0x22b   :  { %v5634_v40 = vor.u32 %v5515_v45, %v6905_v30  ;;  %v1565_v16 = vsel %vm6907_vm10, %v5560_v15, 0.0  ;;  %vm6910_vm6 = vnez %v6909_v27  ;;  %v6911_v45 = vld [vmem:[#allocation32_spill] sm:$0xff]  ;;  %v5652_v15 = vsel %vm6914_vm8, %v6913_v11, %v1335_v7  ;;  %v5665_v11 = vld [vmem:[%s6640_s3 + $0x100] sm:$0xff]  }
 0x22c   :  { %v1677_v60 = vrot.slane %v6908_v55, 7  ;;  %v1562_v50 = vsel %vm6910_vm6, %v5462_v34, 0.0  ;;  %vm6912_vm2 = vnez %v6911_v45  ;;  %v6741_v32 = vshrl.u32 %v5604_v10, 16  ;;  %v4184_v55 = vld [vmem:[%s6640_s3 + $0xb8] sm:$0xff]   ;;  %2153 = vmatmul.mubr.bf16.gmra.mrb[12].mxu1 %v5652_v15 }
 0x22d   :  { %v1564_v30 = vsel %vm6912_vm2, %v5545_v6, 0.0  ;;  %v1568_v46 = vpack.c.bf16 %v1563_v37, %v1562_v50  ;;  %v1646_v34 = vrot.slane %v1644_v43, 5  ;;  %v6915_v17 = vshrl.u32 %v5595_v53, 16  ;;  %1348 = vrot.lane.b32.xlu1 %v1312_v26, %s4255_s23  ;;  %3779 = vmatpush3.bf16.msra.mxu1 %v4184_v55 }
 0x22e   :  { %v5654_v58 = vpack.c.bf16 %v1565_v16, %v1564_v30  ;;  %v1678_v0 = vor.u32 %v1677_v60, %v1612_v29  ;;  %v1638_v47 = vrot.slane %v1636_v56, 5  ;;  %v6916_v37 = vshll.u32 %v5376_v39, 16  ;;  %3980 = vmatprep.subr.bf16.mxu1 %v5665_v11 }
 0x22f   :  { %v1635_v6 = vrot.slane %v6915_v17, 4  ;;  %v6917_v7 = vshrl.u32 %v6896_v25, 16  ;;  %v1650_v16 = vshrl.u32 %v1568_v46, 16  ;;  %vm6918_vm8 = vsmask.f32 256 }
 0x230   :  { %v1588_v36 = vrot.slane %v6916_v37, 4  ;;  %v1662_v50 = vshll.u32 %v5654_v58, 16  ;;  %v1679_v17 = vsel %vm6918_vm8, %v1674_v41, %v1678_v0  ;;  %v1653_v42 = vshll.u32 %v1568_v46, 16 }
 0x231   :  { %v1307_v60 = vor.u32 %v1306_v54, %v6917_v7  ;;  %v1659_v30 = vshrl.u32 %v5654_v58, 16  ;;  %v1643_v18 = vrot.slane %v6741_v32, 4  ;;  %v6919_v37 = vshll.u32 %v5501_v33, 16  ;;  %1717 = vrot.lane.b32.xlu0 %v1679_v17, %s4255_s23  ;;  %v6922_v32 = vld [vmem:[#allocation34_spill] sm:$0xff]  ;;  %1355 = vrot.lane.b32.xlu1 %v5520_v57, %s4255_s23 }
 0x232   :  { %v1682_v25 = vrot.slane %v1636_v56, 1  ;;  %v1652_v54 = vrot.slane %v1650_v16, 4  ;;  %v1664_v7 = vrot.slane %v1662_v50, 5  ;;  %v1639_v38 = vor.u32 %v1638_v47, %v1635_v6 }
 0x233   :  { %v1596_v31 = vrot.slane %v6919_v37, 4  ;;  %v1661_v49 = vrot.slane %v1659_v30, 4  ;;  %v6920_v26 = vshrl.u32 %v5376_v39, 16  ;;  %v1647_v41 = vor.u32 %v1646_v34, %v1643_v18 }
 0x234   :  { %v6921_v58 = vshll.u32 %v5540_v3, 16  ;;  %vm6923_vm8 = vsmask.f32 7424  ;;  %v1684_v27 = vrot.slane %v1644_v43, 1  ;;  %v6924_v56 = vshrl.u32 %v5501_v33, 16 }
 0x235   :  { %v1585_v0 = vrot.slane %v6920_v26, 3  ;;  %v1309_v37 = vsel %vm6923_vm8, %v1307_v60, %v6922_v32  ;;  %v1614_v14 = vrot.slane %v1612_v29, 4  ;;  %vm6925_vm10 = vsmask.f32 3328 }
 0x236   :  { %v1605_v46 = vrot.slane %v6921_v58, 4  ;;  %v1593_v17 = vrot.slane %v6924_v56, 3  ;;  %v5693_v39 = vsel %vm6925_vm10, %v1639_v38, %v1647_v41  ;;  %v1655_v34 = vrot.slane %v1653_v42, 5  ;;  %1346 = vrot.lane.b32.xlu0 %v1309_v37, %s4255_s23  ;;  %vm6930_vm10 = vmmov %vm6923_vm8 }
 0x237   :  { %v1589_v47 = vor.u32 %v1588_v36, %v1585_v0  ;;  %v6926_v6 = vshrl.u32 %v5595_v53, 16  ;;  %v1687_v55 = vrot.slane %v1653_v42, 1  ;;  %v6927_v43 = vshrl.u32 %v5540_v3, 16  ;;  %vm6932_vm5 = vmmov %vm6930_vm10 }
 0x238   :  { %v1597_v32 = vor.u32 %v1596_v31, %v1593_v17  ;;  %v6928_v29 = vshrl.u32 %v6898_v9, 16  ;;  %v1656_v57 = vor.u32 %v1655_v34, %v1652_v54  ;;  %v5703_v36 = vor.u32 %v1664_v7, %v1661_v49 }
 0x239   :  { %v1683_v18 = vor.u32 %v1682_v25, %v6926_v6  ;;  %v1602_v33 = vrot.slane %v6927_v43, 3  ;;  %v6929_v26 = vshrl.u32 %v5600_v1, 16  ;;  %v1690_v37 = vrot.slane %v1662_v50, 1 }
 0x23a   :  { %v1316_v60 = vor.u32 %v5611_v20, %v6928_v29  ;;  %vm6931_vm8 = vsmask.f32 4352  ;;  %v1315_v31 = vsel %vm6932_vm5, %v5634_v40, %v5611_v20  ;;  %vm6933_vm6 = vsmask.f32 3328 }
 0x23b   :  { %v1611_v0 = vrot.slane %v6929_v26, 3  ;;  %v1685_v58 = vsel %vm6930_vm10, %v1683_v18, %v1684_v27  ;;  %v1598_v53 = vsel %vm6931_vm8, %v1589_v47, %v1597_v32  ;;  %v1606_v42 = vor.u32 %v1605_v46, %v1602_v33  ;;  %vm6934_vm7 = vmmov %vm6933_vm6  ;;  %1350 = vrot.lane.b32.xlu0 %v1315_v31, %s4255_s23 }
 0x23c   :  { %1720 = vrot.lane.b32.xlu1 %v1685_v58, %s4255_s23  ;;  %v5714_v3 = vsel %vm6933_vm6, %v1647_v41, %v1656_v57  ;;  %v5718_v49 = vsel %vm6934_vm7, %v1656_v57, %v5703_v36  ;;  %v1689_v9 = vor.u32 %v1687_v55, %v1650_v16  ;;  %vm6935_vm10 = vmmov %vm6932_vm5  ;;  %vm6936_vm8 = vcmask 1047552  }
 0x23d   :  { %v5720_v1 = vor.u32 %v1614_v14, %v1611_v0  ;;  %vm5725_vm2 = vmand %vm6936_vm8, %vm6935_vm10  ;;  %v6937_v50 = vmov 0  ;;  %v1607_v20 = vsel %vm6939_vm1, %v1597_v32, %v1606_v42  ;;  %v1692_v54 = vor.u32 %v1690_v37, %v1659_v30 }
 0x23e   :  { %v6938_v50 = vsel %vm5725_vm2, 4294967295, %v6937_v50  ;;  %vm6940_vm5 = vmmov %vm6939_vm1  ;;  %v1320_v14 = vsel %vm5725_vm2, %v1316_v60, 0  ;;  %v6942_v16 = vshrl.u32 %v5604_v10, 16  ;;  %v6944_v30 = vrot.slane %v5590_v24, 4 }
 0x23f   :  { %v1616_v40 = vsel %vm6940_vm5, %v1606_v42, %v5720_v1  ;;  %vm6941_vm6 = vmmov %vm6935_vm10  ;;  %1352 = vrot.lane.b32.xlu0 %v1320_v14, %s4255_s23  ;;  %v1694_v41 = vsel %vm5725_vm2, %v1692_v54, 0  ;;  %vm6945_vm7 = vcmask 1043456   ;;  %v1668_v10 = vsel %vm5214_vm9, 0, %v1639_v38  ;;  %v6954_v42 = vld [vmem:[#allocation12_spill] sm:$0xff] }
 0x240   :  { %v1691_v25 = vsel %vm6941_vm6, %v1689_v9, %v1690_v37  ;;  %v1686_v7 = vor.u32 %v1684_v27, %v6942_v16  ;;  %vm6943_vm1 = vmmov %vm6941_vm6  ;;  %v1698_v56 = vsel %vm6945_vm7, %v6944_v30, 0  ;;  %vm6946_vm10 = vcmask 523264   ;;  %v4187_v9 = vld [vmem:[%s6640_s3 + $0x110] sm:$0xff]   ;;  %v6958_v54 = vld [vmem:[#allocation20_spill] sm:$0xff] }
 0x241   :  { %1724 = vrot.lane.b32.xlu1 %v1691_v25, %s4255_s23  ;;  %v1618_v6 = vsel %vm5223_vm13, 0, %v1589_v47  ;;  %vm6947_vm8 = vmmov %vm6946_vm10  ;;  %v6959_v16 = vld [vmem:[#allocation21_spill] sm:$0xff] }
 0x242   :  { %v1688_v46 = vsel %vm6943_vm1, %v1686_v7, %v1687_v55  ;;  %vm6948_vm5 = vmmov %vm6947_vm8  ;;  %v1322_v7 = vsel %vm5223_vm13, %v6959_v16, 0 }
 0x243   :  { %1722 = vrot.lane.b32.xlu0 %v1688_v46, %s4255_s23  ;;  %vm6949_vm6 = vmmov %vm6948_vm5 }
 0x244   :  { %vm6950_vm1 = vmmov %vm6948_vm5 }
 0x245   :  { %1726 = vrot.lane.b32.xlu1 %v1694_v41, %s4255_s23  ;;  %vm6951_vm7 = vmmov %vm6950_vm1 }
 0x247   :  { %1729 = vrot.lane.b32.xlu0 %v1698_v56, %s4255_s23 }
 0x285   :  { %v1703_v17 = vpop.permute.xlu1 %1702 }
 0x286   :  { %v1733_v18 = vsel %vm6947_vm8, %v1618_v6, %v1703_v17  ;;  %vm6953_vm8 = vmmov %vm6950_vm1 }
 0x28b   :  { %v1712_v34 = vpop.permute.xlu0 %1711 }
 0x28c   :  { %v1749_v27 = vsel %vm6946_vm10, %v1668_v10, %v1712_v34  ;;  %vm6952_vm10 = vmmov %vm6950_vm1 }
 0x28d   :  { %2160 = vmatprep.mubr.bf16.mxu1 %v1749_v27 }
 0x28e   :  { %2161 = vmatmul.mubr.bf16.gmra.mrb[16].mxu1 %v1733_v18 }
 0x28f   :  { %v1705_v55 = vpop.permute.xlu1 %1704 }
 0x290   :  { %v1737_v33 = vsel %vm6949_vm6, %v1598_v53, %v1705_v55  ;;  %v4186_v53 = vld [vmem:[%s6640_s3 + $0x108] sm:$0xff]   ;;  %vm6957_vm6 = vmmov %vm6950_vm1 }
 0x293   :  { %v1707_v60 = vpop.permute.xlu1 %1706 }
 0x294   :  { %v1741_v57 = vsel %vm6951_vm7, %v1607_v20, %v1707_v60  ;;  %vm6960_vm7 = vmmov %vm6950_vm1 }
 0x297   :  { %v1714_v32 = vpop.permute.xlu0 %1713 }
 0x298   :  { %v1753_v43 = vsel %vm6948_vm5, %v5693_v39, %v1714_v32  ;;  %vm6955_vm5 = vmmov %vm6950_vm1 }
 0x299   :  { %2168 = vmatprep.mubr.bf16.mxu1 %v1753_v43 }
 0x29a   :  { %2169 = vmatmul.mubr.bf16.gmra.mrb[20].mxu1 %v1737_v33 }
 0x29b   :  { %v1716_v29 = vpop.permute.xlu0 %1715  ;;  %v1709_v0 = vpop.permute.xlu1 %1708 }
 0x29c   :  { %v1757_v38 = vsel %vm6950_vm1, %v5714_v3, %v1716_v29  ;;  %v1745_v58 = vsel %vm6953_vm8, %v1616_v40, %v1709_v0  ;;  %v6956_v40 = vld [vmem:[#allocation17_spill] sm:$0xff]  ;;  %vm6962_vm8 = vmmov %vm6950_vm1 }
 0x29d   :  { %2176 = vmatprep.mubr.bf16.mxu1 %v1757_v38 }
 0x29f   :  { %v1349_v20 = vpop.permute.xlu1 %1348 }
 0x2a0   :  { %v1396_v25 = vsel %vm6957_vm6, %v6956_v40, %v1349_v20  ;;  %vm6964_vm6 = vmmov %vm6950_vm1 }
 0x2a2   :  { %2177 = vmatmul.mubr.bf16.gmra.mrb[24].mxu1 %v1741_v57 }
 0x2a3   :  { %v1718_v47 = vpop.permute.xlu0 %1717 }
 0x2a4   :  { %v1761_v26 = vsel %vm6952_vm10, %v5718_v49, %v1718_v47  ;;  %vm6961_vm10 = vmmov %vm6950_vm1 }
 0x2a5   :  { %2184 = vmatprep.mubr.bf16.mxu1 %v1761_v26 }
 0x2a8   :  { %v1347_v37 = vpop.permute.xlu0 %1346 }
 0x2a9   :  { %v1392_v31 = vsel %vm6955_vm5, %v6954_v42, %v1347_v37  ;;  %vm6963_vm5 = vmmov %vm6950_vm1 }
 0x2aa   :  { %2185 = vmatmul.mubr.bf16.gmra.mrb[28].mxu1 %v1745_v58 }
 0x2ab   :  { %2225 = vmatprep.mubr.bf16.mxu1 %v5489_v22  ;;  %v4188_v22 = vld [vmem:[%s6640_s3 + $0x118] sm:$0xff]  }
 0x2b2   :  { %2226 = vmatmul.mubr.bf16.vlgmr.msra.gmra.mrb[32].mxu1 %v1392_v31 }
 0x2b3   :  { %3981 = vmatpush3.bf16.msra.mxu1 %v5665_v11  ;;  %2233 = vmatprep.mubr.bf16.mxu1 %v5553_v28  ;;  %v1351_v28 = vpop.permute.xlu0 %1350  ;;  %v1356_v11 = vpop.permute.xlu1 %1355 }
 0x2b4   :  { %3982 = vmatprep.subr.bf16.mxu1 %v4186_v53  ;;  %v1400_v14 = vsel %vm6950_vm1, %v6958_v54, %v1351_v28  ;;  %v1408_v41 = vsel %vm6960_vm7, %v1322_v7, %v1356_v11  ;;  %vm6965_vm7 = vmmov %vm6950_vm1  ;;  %v4192_v54 = vld [vmem:[%s6642_s5 + $0x118] sm:$0xff]  }
 0x2b7   :  { %3983 = vmatpush3.bf16.msra.mxu1 %v4186_v53  ;;  %v1353_v46 = vpop.permute.xlu0 %1352  ;;  %v1721_v30 = vpop.permute.xlu1 %1720 }
 0x2b8   :  { %3984 = vmatprep.subr.bf16.mxu1 %v4187_v9  ;;  %v1765_v56 = vsel %vm6962_vm8, %v5365_v62, %v1721_v30  ;;  %vm6967_vm8 = vmmov %vm6950_vm1 }
 0x2ba   :  { %2234 = vmatmul.mubr.bf16.gmra.mrb[36].mxu1 %v1396_v25 }
 0x2bb   :  { %2241 = vmatprep.mubr.bf16.mxu1 %v5652_v15  ;;  %3985 = vmatpush3.bf16.msra.mxu1 %v4187_v9  ;;  %v1404_v15 = vsel %vm6961_vm10, %v4979_v61, %v1353_v46  ;;  %v1723_v17 = vpop.permute.xlu0 %1722  ;;  %v1725_v10 = vpop.permute.xlu1 %1724  ;;  %v1696_v61 = vsel %vm5223_vm13, %v5720_v1, 0  ;;  %vm6966_vm10 = vmmov %vm6950_vm1 }
 0x2bc   :  { %3986 = vmatprep.subr.bf16.mxu1 %v4188_v22  ;;  %v1769_v34 = vsel %vm6963_vm5, %v5467_v8, %v1723_v17  ;;  %v1773_v6 = vsel %vm6964_vm6, %v5505_v59, %v1725_v10  ;;  %vm6968_vm5 = vmmov %vm6950_vm1 }
 0x2bd   :  { %vm6969_vm6 = vmmov %vm6950_vm1 }
 0x2bf   :  { %3987 = vmatpush3.bf16.msra.mxu1 %v4188_v22  ;;  %v1730_v27 = vpop.permute.xlu0 %1729  ;;  %v1727_v43 = vpop.permute.xlu1 %1726 }
 0x2c0   :  { %v1781_v62 = vsel %vm6950_vm1, %v1696_v61, %v1730_v27  ;;  %v1777_v59 = vsel %vm6965_vm7, %v5590_v24, %v1727_v43  ;;  %vm6970_vm7 = vmmov %vm6950_vm1 }
 0x2c2   :  { %2242 = vmatmul.mubr.bf16.gmra.mrb[40].mxu1 %v1400_v14 }
 0x2c3   :  { %2249 = vmatprep.mubr.bf16.mxu1 %v1408_v41 }
 0x2ca   :  { %2250 = vmatmul.mubr.bf16.gmra.mrb[44].mxu1 %v1404_v15 }
 0x2cb   :  { %2257 = vmatprep.mubr.bf16.mxu1 %v1737_v33 }
 0x2d2   :  { %2258 = vmatmul.mubr.bf16.gmra.mrb[48].mxu1 %v1765_v56 }
 0x2d3   :  { %2265 = vmatprep.mubr.bf16.mxu1 %v1741_v57 }
 0x2da   :  { %2266 = vmatmul.mubr.bf16.gmra.mrb[52].mxu1 %v1769_v34 }
 0x2db   :  { %2273 = vmatprep.mubr.bf16.mxu1 %v1745_v58 }
 0x2e2   :  { %2274 = vmatmul.mubr.bf16.gmra.mrb[56].mxu1 %v1773_v6  ;;  %v3716_v18 = vpop.f32.mrb[0].mxu1 }
 0x2e3   :  { %2281 = vmatprep.mubr.bf16.mxu1 %v1781_v62  ;;  %v3717_v55 = vpop.f32.mrb[1].mxu1 }
 0x2e4   :  { %v5798_v32 = vadd.f32 %v3717_v55, %v3716_v18  ;;  %v3719_v8 = vpop.f32.mrb[2].mxu1 }
 0x2e5   :  { %v3720_v33 = vpop.f32.mrb[3].mxu1 }
 0x2e6   :  { %v5800_v29 = vadd.f32 %v3720_v33, %v3719_v8  ;;  %v5871_v33 = vld [vmem:[%s6641_s4] ss:$0 sm:$0xff] }
 0x2ea   :  { %2282 = vmatmul.mubr.bf16.gmra.mrb[60].mxu1 %v1777_v59 }
 0x2eb   :  { %3988 = vmatprep.mubr.msk.bf16.mxu1 %vm6966_vm10, %v5284_v21  ;;  %v1326_v21 = vsel %vm5214_vm9, %v5308_v19, 0  ;;  %vm6971_vm10 = vmmov %vm6950_vm1  ;;  %v1700_v19 = vsel %vm5214_vm9, %v5703_v36, 0  ;;  %v4191_v36 = vld [vmem:[%s6642_s5 + $0x110] sm:$0xff]  }
 0x2ed   :  { %v3722_v1 = vpop.f32.mrb[4].mxu1 }
 0x2ee   :  { %v3723_v38 = vpop.f32.mrb[5].mxu1 }
 0x2ef   :  { %v5806_v60 = vadd.f32 %v3723_v38, %v3722_v1  ;;  %v3725_v47 = vpop.f32.mrb[6].mxu1  ;;  %v2131_v38 = vadd.f32 %v5798_v32, %v5871_v33 }
 0x2f0   :  { %v3726_v57 = vpop.f32.mrb[7].mxu1 }
 0x2f1   :  { %v5810_v26 = vadd.f32 %v3726_v57, %v3725_v47 }
 0x2f2   :  { %3989 = vmatmul.mubr.msk.bf16.vlgmr.msra.gmra.mrb[64].mxu1 %vm6967_vm8, %v5306_v13  ;;  %vm6972_vm8 = vmmov %vm6950_vm1 }
 0x2f3   :  { %3992 = vmatprep.mubr.msk.bf16.mxu1 %vm6968_vm5, %v5538_v35  ;;  %v2142_v32 = vadd.f32 %v5810_v26, %v5871_v33  ;;  %vm6973_vm5 = vnez %v6779_v51 }
 0x2f5   :  { %v3728_v0 = vpop.f32.mrb[8].mxu1 }
 0x2f6   :  { %v3729_v24 = vpop.f32.mrb[9].mxu1 }
 0x2f7   :  { %v5814_v58 = vadd.f32 %v3729_v24, %v3728_v0  ;;  %v3731_v37 = vpop.f32.mrb[10].mxu1  ;;  %v2134_v24 = vadd.f32 %v5800_v29, %v5871_v33 }
 0x2f8   :  { %v3732_v53 = vpop.f32.mrb[11].mxu1 }
 0x2f9   :  { %v5820_v42 = vadd.f32 %v3732_v53, %v3731_v37  ;;  %v2147_v26 = vadd.f32 %v5814_v58, %v5871_v33  ;;  %v4197_v58 = vld [vmem:[%s6642_s5 + $0x50] sm:$0xff]  }
 0x2fa   :  { %3993 = vmatmul.mubr.msk.bf16.gmra.mrb[68].mxu1 %vm6969_vm6, %v1326_v21  ;;  %vm6974_vm6 = vnez %v6911_v45 }
 0x2fb   :  { %3996 = vmatprep.mubr.msk.bf16.mxu1 %vm6950_vm1, %v5693_v39  ;;  %v5839_v39 = vld [vmem:[%s6642_s5 + $0x100] sm:$0xff]  }
 0x2fc   :  { %4004 = vmatprep.subr.bf16.mxu0 %v5839_v39 }
 0x2fd   :  { %4005 = vmatpush3.bf16.msra.mxu0 %v5839_v39 }
 0x2ff   :  { %v3734_v13 = vpop.f32.mrb[12].mxu1 }
 0x300   :  { %v3735_v31 = vpop.f32.mrb[13].mxu1 }
 0x301   :  { %v5824_v35 = vadd.f32 %v3735_v31, %v3734_v13  ;;  %v3737_v9 = vpop.f32.mrb[14].mxu1 }
 0x302   :  { %3997 = vmatmul.mubr.msk.bf16.gmra.mrb[72].mxu1 %vm6970_vm7, %v5714_v3  ;;  %v3738_v20 = vpop.f32.mrb[15].mxu1  ;;  %v4190_v3 = vld [vmem:[%s6642_s5 + $0x108] sm:$0xff]   ;;  %vm6977_vm7 = vcmask 1043456  }
 0x303   :  { %v5828_v22 = vadd.f32 %v3738_v20, %v3737_v9  ;;  %4000 = vmatprep.mubr.msk.bf16.mxu1 %vm6971_vm10, %v5718_v49  ;;  %4006 = vmatprep.subr.bf16.mxu0 %v4190_v3  ;;  %v2139_v9 = vadd.f32 %v5806_v60, %v5871_v33  ;;  %v4194_v60 = vld [vmem:[%s6642_s5] sm:$0xff]   ;;  %vm6982_vm13 = vmmov %vm6977_vm7 }
 0x304   :  { %4007 = vmatpush3.bf16.msra.mxu0 %v4190_v3 }
 0x305   :  { %4008 = vmatprep.subr.bf16.mxu0 %v4191_v36 }
 0x308   :  { %4009 = vmatpush3.bf16.msra.mxu0 %v4191_v36 }
 0x309   :  { %4010 = vmatprep.subr.bf16.mxu0 %v4192_v54 }
 0x30a   :  { %4001 = vmatmul.mubr.msk.bf16.gmra.mrb[76].mxu1 %vm6972_vm8, %v1700_v19 }
 0x30c   :  { %4011 = vmatpush3.bf16.msra.mxu0 %v4192_v54  ;;  %v4195_v54 = vld [vmem:[%s6642_s5 + $0x48] sm:$0xff]  }
 0x361   :  { %v3740_v49 = vpop.f32.mrb[16].mxu1 }
 0x362   :  { %v3741_v40 = vpop.f32.mrb[17].mxu1 }
 0x363   :  { %v5849_v25 = vadd.f32 %v3741_v40, %v3740_v49  ;;  %v3743_v28 = vpop.f32.mrb[18].mxu1 }
 0x364   :  { %v3744_v11 = vpop.f32.mrb[19].mxu1 }
 0x365   :  { %v5854_v14 = vadd.f32 %v3744_v11, %v3743_v28  ;;  %v4193_v11 = vld [vmem:[%s6642_s5 + $0x40] sm:$0xff]  }
 0x366   :  { %3840 = vmatprep.subr.bf16.mxu1 %v4193_v11  ;;  %v4204_v11 = vld [vmem:[%s6642_s5 + $0x28] sm:$0xff]  }
 0x367   :  { %3841 = vmatpush3.bf16.msra.mxu1 %v4194_v60  ;;  %v4205_v60 = vld [vmem:[%s6642_s5 + $0x70] sm:$0xff]  }
 0x368   :  { %3842 = vmatprep.subr.bf16.mxu1 %v4195_v54 }
 0x36d   :  { %v3746_v16 = vpop.f32.mrb[20].mxu1 }
 0x36e   :  { %v3747_v7 = vpop.f32.mrb[21].mxu1 }
 0x36f   :  { %v5856_v41 = vadd.f32 %v3747_v7, %v3746_v16  ;;  %v3749_v46 = vpop.f32.mrb[22].mxu1 }
 0x370   :  { %v3750_v15 = vpop.f32.mrb[23].mxu1 }
 0x371   :  { %v5858_v30 = vadd.f32 %v3750_v15, %v3749_v46  ;;  %v2150_v15 = vadd.f32 %v5820_v42, %v5871_v33  ;;  %v4198_v42 = vld [vmem:[%s6642_s5 + $0x10] sm:$0xff]  }
 0x375   :  { %v3752_v56 = vpop.f32.mrb[24].mxu1 }
 0x376   :  { %v3753_v17 = vpop.f32.mrb[25].mxu1 }
 0x377   :  { %v5860_v34 = vadd.f32 %v3753_v17, %v3752_v56  ;;  %v3755_v10 = vpop.f32.mrb[26].mxu1 }
 0x378   :  { %v3756_v27 = vpop.f32.mrb[27].mxu1 }
 0x379   :  { %v5862_v6 = vadd.f32 %v3756_v27, %v3755_v10  ;;  %v4196_v10 = vld [vmem:[%s6642_s5 + $0x8] sm:$0xff]  }
 0x37a   :  { %3843 = vmatpush3.bf16.msra.mxu1 %v4196_v10 }
 0x37b   :  { %3844 = vmatprep.subr.bf16.mxu1 %v4197_v58 }
 0x37d   :  { %v3758_v61 = vpop.f32.mrb[28].mxu1 }
 0x37e   :  { %v3759_v62 = vpop.f32.mrb[29].mxu1  ;;  %3845 = vmatpush3.bf16.msra.mxu1 %v4198_v42 }
 0x37f   :  { %v5864_v18 = vadd.f32 %v3759_v62, %v3758_v61  ;;  %v3761_v55 = vpop.f32.mrb[30].mxu1 }
 0x380   :  { %v3762_v8 = vpop.f32.mrb[31].mxu1 }
 0x381   :  { %v5866_v43 = vadd.f32 %v3762_v8, %v3761_v55  ;;  %v4199_v55 = vld [vmem:[%s6642_s5 + $0x58] sm:$0xff]   ;;  %v2155_v8 = vadd.f32 %v5824_v35, %v5871_v33 }
 0x382   :  { %3846 = vmatprep.subr.bf16.mxu1 %v4199_v55  ;;  %v2179_v55 = vadd.f32 %v5860_v34, %v5871_v33 }
 0x383   :  { %v2190_v34 = vadd.f32 %v5866_v43, %v5871_v33  ;;  %v4208_v43 = vld [vmem:[%s6642_s5 + $0x38] sm:$0xff]  }
 0x385   :  { %v3780_v59 = vpop.f32.mrb[32].mxu1 }
 0x386   :  { %v3781_v1 = vpop.f32.mrb[33].mxu1 }
 0x387   :  { %v3782_v47 = vadd.f32 %v3781_v1, %v3780_v59  ;;  %v3783_v57 = vpop.f32.mrb[34].mxu1 }
 0x388   :  { %v3784_v0 = vpop.f32.mrb[35].mxu1 }
 0x389   :  { %v3785_v37 = vadd.f32 %v3784_v0, %v3783_v57  ;;  %v5877_v21 = vadd.f32 %v3782_v47, %v2131_v38  ;;  %v2158_v47 = vadd.f32 %v5828_v22, %v5871_v33  ;;  %v4202_v22 = vld [vmem:[%s6642_s5 + $0x20] sm:$0xff]  }
 0x38b   :  { %v5879_v53 = vadd.f32 %v3785_v37, %v2134_v24  ;;  %v4200_v24 = vld [vmem:[%s6642_s5 + $0x18] sm:$0xff]   ;;  %v4201_v37 = vld [vmem:[%s6642_s5 + $0x60] sm:$0xff]  }
 0x38c   :  { %3847 = vmatpush3.bf16.msra.mxu1 %v4200_v24 }
 0x38d   :  { %v3786_v13 = vpop.f32.mrb[36].mxu1  ;;  %3848 = vmatprep.subr.bf16.mxu1 %v4201_v37  ;;  %v2187_v37 = vadd.f32 %v5864_v18, %v5871_v33  ;;  %v4207_v18 = vld [vmem:[%s6642_s5 + $0x78] sm:$0xff]  }
 0x38e   :  { %v3787_v31 = vpop.f32.mrb[37].mxu1 }
 0x38f   :  { %v3788_v20 = vadd.f32 %v3787_v31, %v3786_v13  ;;  %v3789_v19 = vpop.f32.mrb[38].mxu1 }
 0x390   :  { %v3790_v3 = vpop.f32.mrb[39].mxu1  ;;  %3849 = vmatpush3.bf16.msra.mxu1 %v4202_v22 }
 0x391   :  { %v3791_v36 = vadd.f32 %v3790_v3, %v3789_v19  ;;  %v5885_v49 = vadd.f32 %v3788_v20, %v2139_v9  ;;  %v4203_v9 = vld [vmem:[%s6642_s5 + $0x68] sm:$0xff]   ;;  %v2163_v20 = vadd.f32 %v5849_v25, %v5871_v33 }
 0x392   :  { %3850 = vmatprep.subr.bf16.mxu1 %v4203_v9 }
 0x393   :  { %v5887_v29 = vadd.f32 %v3791_v36, %v2142_v32  ;;  %v2166_v36 = vadd.f32 %v5854_v14, %v5871_v33  ;;  %v4206_v14 = vld [vmem:[%s6642_s5 + $0x30] sm:$0xff]  }
 0x394   :  { %3851 = vmatpush3.bf16.msra.mxu1 %v4204_v11 }
 0x395   :  { %v3792_v40 = vpop.f32.mrb[40].mxu1  ;;  %3852 = vmatprep.subr.bf16.mxu1 %v4205_v60 }
 0x396   :  { %v3793_v28 = vpop.f32.mrb[41].mxu1 }
 0x397   :  { %v3794_v16 = vadd.f32 %v3793_v28, %v3792_v40  ;;  %v3795_v7 = vpop.f32.mrb[42].mxu1 }
 0x398   :  { %v3796_v46 = vpop.f32.mrb[43].mxu1  ;;  %3853 = vmatpush3.bf16.msra.mxu1 %v4206_v14 }
 0x399   :  { %v3797_v56 = vadd.f32 %v3796_v46, %v3795_v7  ;;  %v5902_v17 = vadd.f32 %v3794_v16, %v2147_v26  ;;  %v2171_v16 = vadd.f32 %v5856_v41, %v5871_v33  ;;  %3854 = vmatprep.subr.bf16.mxu1 %v4207_v18 }
 0x39b   :  { %v5910_v27 = vadd.f32 %v3797_v56, %v2150_v15  ;;  %v2174_v56 = vadd.f32 %v5858_v30, %v5871_v33 }
 0x39c   :  { %3855 = vmatpush3.bf16.msra.mxu1 %v4208_v43 }
 0x39d   :  { %v3798_v61 = vpop.f32.mrb[44].mxu1 }
 0x39e   :  { %v3799_v62 = vpop.f32.mrb[45].mxu1 }
 0x39f   :  { %v3800_v59 = vadd.f32 %v3799_v62, %v3798_v61  ;;  %v3801_v1 = vpop.f32.mrb[46].mxu1 }
 0x3a0   :  { %v3802_v38 = vpop.f32.mrb[47].mxu1 }
 0x3a1   :  { %v3803_v57 = vadd.f32 %v3802_v38, %v3801_v1  ;;  %v5922_v0 = vadd.f32 %v3800_v59, %v2155_v8  ;;  %v2182_v1 = vadd.f32 %v5862_v6, %v5871_v33 }
 0x3a3   :  { %v5930_v35 = vadd.f32 %v3803_v57, %v2158_v47 }
 0x3a5   :  { %v3804_v13 = vpop.f32.mrb[48].mxu1 }
 0x3a6   :  { %v3805_v31 = vpop.f32.mrb[49].mxu1 }
 0x3a7   :  { %v3806_v19 = vadd.f32 %v3805_v31, %v3804_v13  ;;  %v3807_v3 = vpop.f32.mrb[50].mxu1 }
 0x3a8   :  { %v3808_v32 = vpop.f32.mrb[51].mxu1 }
 0x3a9   :  { %v3809_v40 = vadd.f32 %v3808_v32, %v3807_v3  ;;  %v5942_v28 = vadd.f32 %v3806_v19, %v2163_v20 }
 0x3ab   :  { %v5950_v25 = vadd.f32 %v3809_v40, %v2166_v36 }
 0x3ad   :  { %v3810_v54 = vpop.f32.mrb[52].mxu1 }
 0x3ae   :  { %v3811_v26 = vpop.f32.mrb[53].mxu1 }
 0x3af   :  { %v3812_v7 = vadd.f32 %v3811_v26, %v3810_v54  ;;  %v3813_v46 = vpop.f32.mrb[54].mxu1 }
 0x3b0   :  { %v3814_v15 = vpop.f32.mrb[55].mxu1 }
 0x3b1   :  { %v3815_v10 = vadd.f32 %v3814_v15, %v3813_v46  ;;  %v5959_v58 = vadd.f32 %v3812_v7, %v2171_v16 }
 0x3b3   :  { %v5961_v61 = vadd.f32 %v3815_v10, %v2174_v56 }
 0x3b5   :  { %v3816_v42 = vpop.f32.mrb[56].mxu1 }
 0x3b6   :  { %v3817_v62 = vpop.f32.mrb[57].mxu1 }
 0x3b7   :  { %v3818_v8 = vadd.f32 %v3817_v62, %v3816_v42  ;;  %v3819_v59 = vpop.f32.mrb[58].mxu1 }
 0x3b8   :  { %v3820_v41 = vpop.f32.mrb[59].mxu1 }
 0x3b9   :  { %v3821_v38 = vadd.f32 %v3820_v41, %v3819_v59  ;;  %v5967_v47 = vadd.f32 %v3818_v8, %v2179_v55 }
 0x3bb   :  { %v5969_v30 = vadd.f32 %v3821_v38, %v2182_v1 }
 0x3bd   :  { %v3822_v57 = vpop.f32.mrb[60].mxu1 }
 0x3be   :  { %v3823_v24 = vpop.f32.mrb[61].mxu1 }
 0x3bf   :  { %v3824_v13 = vadd.f32 %v3823_v24, %v3822_v57  ;;  %v3825_v22 = vpop.f32.mrb[62].mxu1 }
 0x3c0   :  { %v3826_v31 = vpop.f32.mrb[63].mxu1 }
 0x3c1   :  { %v3827_v9 = vadd.f32 %v3826_v31, %v3825_v22  ;;  %v5975_v20 = vadd.f32 %v3824_v13, %v2187_v37 }
 0x3c3   :  { %v5977_v6 = vadd.f32 %v3827_v9, %v2190_v34 }
 0x3c5   :  { %v3990_v19 = vpop.f32.mrb[64].mxu1 }
 0x3c6   :  { %v2333_v3 = vadd.f32 %v3990_v19, %v5885_v49  ;;  %v2324_v32 = vpop.f32.mrb[65].mxu1 }
 0x3c7   :  { %v2325_v36 = vadd.f32 %v2324_v32, %v5877_v21  ;;  %v3991_v40 = vpop.f32.mrb[66].mxu1 }
 0x3c8   :  { %v2389_v33 = vmax.f32 %v2333_v3, 0.0  ;;  %v2336_v11 = vadd.f32 %v3991_v40, %v5887_v29  ;;  %v2327_v60 = vpop.f32.mrb[67].mxu1  ;;  %v6975_v40 = vld [vmem:[#allocation7_spill] sm:$0xff] }
 0x3c9   :  { %v2387_v54 = vmax.f32 %v2325_v36, 0.0  ;;  %v2328_v14 = vadd.f32 %v2327_v60, %v5879_v53  ;;  %vm6976_vm1 = vnez %v6975_v40  ;;  %v6980_v60 = vld [vmem:[#allocation5_spill] sm:$0xff] }
 0x3ca   :  { %v2390_v49 = vmax.f32 %v2336_v11, 0.0  ;;  %v2409_v21 = vsel %vm6892_vm15, %v2389_v33, 0.0  ;;  %v2421_v26 = vsel %vm4604_vm3, %v2389_v33, 0.0  ;;  %vm6981_vm8 = vnez %v6980_v60 }
 0x3cb   :  { %v2388_v16 = vmax.f32 %v2328_v14, 0.0  ;;  %v2407_v7 = vsel %vm5121_vm14, %v2387_v54, 0.0  ;;  %v2419_v55 = vsel %vm4564_vm0, %v2387_v54, 0.0 }
 0x3cc   :  { %v5995_v46 = vpack.c.bf16 %v2390_v49, %v2389_v33  ;;  %v2410_v29 = vsel %vm6894_vm11, %v2390_v49, 0.0  ;;  %v2422_v53 = vsel %vm4614_vm4, %v2390_v49, 0.0  ;;  %v6978_v33 = vld [vmem:[#allocation30_spill] sm:$0xff] }
 0x3cd   :  { %v6001_v15 = vpack.c.bf16 %v2410_v29, %v2409_v21  ;;  %v6003_v56 = vpack.c.bf16 %v2422_v53, %v2421_v26  ;;  %v6005_v10 = vpack.c.bf16 %v2388_v16, %v2387_v54  ;;  %v2408_v42 = vsel %vm6889_vm12, %v2388_v16, 0.0  ;;  %v3994_v62 = vpop.f32.mrb[68].mxu1  ;;  %v6983_v26 = vld [vmem:[#allocation31_spill] sm:$0xff] }
 0x3ce   :  { %v6011_v8 = vpack.c.bf16 %v2408_v42, %v2407_v7  ;;  %v2420_v59 = vsel %vm6973_vm5, %v2388_v16, 0.0  ;;  %v2349_v41 = vadd.f32 %v3994_v62, %v5922_v0  ;;  %v2340_v1 = vpop.f32.mrb[69].mxu1  ;;  %v2473_v22 = vrot.slane %v5995_v46, 4  ;;  %v6985_v7 = vld [vmem:[#allocation8_spill] sm:$0xff] }
 0x3cf   :  { %v6016_v38 = vpack.c.bf16 %v2420_v59, %v2419_v55  ;;  %v3995_v57 = vpop.f32.mrb[70].mxu1  ;;  %v2341_v37 = vadd.f32 %v2340_v1, %v5902_v17  ;;  %v2472_v9 = vrot.slane %v6005_v10, 4  ;;  %v6764_v0 = vshrl.u32 %v6003_v56, 16  ;;  %v4209_v17 = vld [vmem:[%s6642_s5 + $0xc0] sm:$0xff]   ;;  %v6989_v1 = vld [vmem:[#allocation6_spill] sm:$0xff] }
 0x3d0   :  { %v2393_v24 = vmax.f32 %v2349_v41, 0.0  ;;  %v2343_v13 = vpop.f32.mrb[71].mxu1  ;;  %v2352_v31 = vadd.f32 %v3995_v57, %v5930_v35  ;;  %v6758_v3 = vshrl.u32 %v6011_v8, 16  ;;  %vm6979_vm10 = vnez %v6978_v33  ;;  %3904 = vmatprep.subr.bf16.mxu1 %v4209_v17  ;;  %v6987_v59 = vld [vmem:[#allocation29_spill] sm:$0xff] }
 0x3d1   :  { %v2344_v34 = vadd.f32 %v2343_v13, %v5910_v27  ;;  %v6756_v19 = vshrl.u32 %v6016_v38, 16  ;;  %v2391_v36 = vmax.f32 %v2341_v37, 0.0  ;;  %v2480_v43 = vsel %vm6977_vm7, 0, %v2472_v9 }
 0x3d2   :  { %v2413_v32 = vsel %vm6974_vm6, %v2393_v24, 0.0  ;;  %v2425_v35 = vsel %vm6976_vm1, %v2393_v24, 0.0  ;;  %v2394_v27 = vmax.f32 %v2352_v31, 0.0  ;;  %2551 = vrot.lane.b32.xlu1 %v2480_v43, %s4255_s23  ;;  %v2474_v14 = vsel %vm6982_vm13, %v2472_v9, %v2473_v22 }
 0x3d3   :  { %v2392_v18 = vmax.f32 %v2344_v34, 0.0  ;;  %v2411_v11 = vsel %vm6979_vm10, %v2391_v36, 0.0  ;;  %v2423_v54 = vsel %vm6981_vm8, %v2391_v36, 0.0  ;;  %v6044_v49 = vrot.slane %v6756_v19, 7 }
 0x3d4   :  { %v6046_v21 = vpack.c.bf16 %v2394_v27, %v2393_v24  ;;  %vm6984_vm7 = vnez %v6983_v26  ;;  %vm6986_vm2 = vnez %v6985_v7  ;;  %vm6988_vm13 = vnez %v6987_v59 }
 0x3d5   :  { %v2414_v16 = vsel %vm6984_vm7, %v2394_v27, 0.0  ;;  %v2426_v29 = vsel %vm6986_vm2, %v2394_v27, 0.0  ;;  %v6052_v53 = vpack.c.bf16 %v2392_v18, %v2391_v36  ;;  %v3998_v42 = vpop.f32.mrb[72].mxu1  ;;  %v2412_v41 = vsel %vm6988_vm13, %v2392_v18, 0.0 }
 0x3d6   :  { %v6054_v62 = vpack.c.bf16 %v2414_v16, %v2413_v32  ;;  %v6056_v55 = vpack.c.bf16 %v2426_v29, %v2425_v35  ;;  %vm6990_vm9 = vnez %v6989_v1  ;;  %v2356_v24 = vpop.f32.mrb[73].mxu1  ;;  %v6062_v37 = vpack.c.bf16 %v2412_v41, %v2411_v11  ;;  %2553 = vrot.lane.b32.xlu1 %v2474_v14, %s4255_s23 }
 0x3d7   :  { %v2424_v57 = vsel %vm6990_vm9, %v2392_v18, 0.0  ;;  %v2365_v31 = vadd.f32 %v3998_v42, %v5959_v58  ;;  %v2357_v34 = vadd.f32 %v2356_v24, %v5942_v28  ;;  %v3999_v9 = vpop.f32.mrb[74].mxu1  ;;  %v6761_v32 = vshrl.u32 %v6001_v15, 16 }
 0x3d8   :  { %v6064_v13 = vpack.c.bf16 %v2424_v57, %v2423_v54  ;;  %v6762_v36 = vshll.u32 %v6001_v15, 16  ;;  %v2368_v17 = vadd.f32 %v3999_v9, %v5961_v61  ;;  %v6763_v35 = vshll.u32 %v6016_v38, 16  ;;  %v2359_v27 = vpop.f32.mrb[75].mxu1 }
 0x3d9   :  { %v6760_v18 = vshll.u32 %v6011_v8, 16  ;;  %v6757_v43 = vshrl.u32 %v6062_v37, 16  ;;  %v6759_v58 = vshll.u32 %v6062_v37, 16  ;;  %v2397_v11 = vmax.f32 %v2365_v31, 0.0 }
 0x3da   :  { %v6769_v28 = vshrl.u32 %v6056_v55, 16  ;;  %v2395_v54 = vmax.f32 %v2357_v34, 0.0  ;;  %v2398_v16 = vmax.f32 %v2368_v17, 0.0  ;;  %v2519_v14 = vor.u32 %v6044_v49, %v6763_v35 }
 0x3db   :  { %v6771_v61 = vshrl.u32 %v6064_v13, 16  ;;  %v2501_v29 = vrot.slane %v6757_v43, 4  ;;  %v2504_v42 = vrot.slane %v6759_v58, 5  ;;  %v2484_v41 = vrot.slane %v6758_v3, 4  ;;  %v6991_v43 = vld [vmem:[#allocation14_spill] sm:$0xff] }
 0x3dc   :  { %v2638_v57 = vsel %vm6892_vm15, %v2397_v11, 0.0  ;;  %v2650_v24 = vsel %vm4604_vm3, %v2397_v11, 0.0  ;;  %v6091_v31 = vpack.c.bf16 %v2398_v16, %v2397_v11  ;;  %v2639_v34 = vsel %vm6894_vm11, %v2398_v16, 0.0 }
 0x3dd   :  { %v2636_v9 = vsel %vm5121_vm14, %v2395_v54, 0.0  ;;  %v6097_v17 = vpack.c.bf16 %v2639_v34, %v2638_v57  ;;  %v2651_v19 = vsel %vm4614_vm4, %v2398_v16, 0.0  ;;  %vm6992_vm9 = vnez %v6991_v43  ;;  %v4002_v3 = vpop.f32.mrb[76].mxu1 }
 0x3de   :  { %v2530_v63 = vsel %vm6992_vm9, 0, %v2519_v14  ;;  %v6103_v58 = vpack.c.bf16 %v2651_v19, %v2650_v24  ;;  %v2487_v5 = vrot.slane %v6760_v18, 5  ;;  %v2492_v23 = vrot.slane %v6761_v32, 4  ;;  %v2372_v11 = vpop.f32.mrb[77].mxu1 }
 0x3df   :  { %2560 = vrot.lane.b32.xlu0 %v2530_v63, %s4255_s23  ;;  %v2495_v48 = vrot.slane %v6762_v36, 5  ;;  %v2360_v12 = vadd.f32 %v2359_v27, %v5950_v25  ;;  %v2475_v16 = vrot.slane %v6052_v53, 4  ;;  %v2443_v14 = vshll.u32 %v6003_v56, 16  ;;  %v4003_v57 = vpop.f32.mrb[78].mxu1 }
 0x3e0   :  { %v2520_v19 = vrot.slane %v6764_v0, 7  ;;  %v2648_v24 = vsel %vm4564_vm0, %v2395_v54, 0.0  ;;  %v6119_v34 = vor.u32 %v2487_v5, %v2484_v41  ;;  %v2381_v18 = vadd.f32 %v4002_v3, %v5975_v20  ;;  %v2375_v32 = vpop.f32.mrb[79].mxu1 }
 0x3e1   :  { %v2496_v63 = vor.u32 %v2495_v48, %v2492_v23  ;;  %v2505_v36 = vor.u32 %v2504_v42, %v2501_v29  ;;  %v2396_v35 = vmax.f32 %v2360_v12, 0.0  ;;  %vm6993_vm3 = vcmask 1043456  }
 0x3e2   :  { %v2476_v25 = vsel %vm6993_vm3, %v2473_v22, %v2475_v16  ;;  %v2521_v27 = vor.u32 %v2520_v19, %v2443_v14  ;;  %vm6994_vm4 = vsmask.f32 3328  ;;  %v2401_v44 = vmax.f32 %v2381_v18, 0.0 }
 0x3e3   :  { %v6129_v0 = vsel %vm6994_vm4, %v6119_v34, %v2496_v63  ;;  %2555 = vrot.lane.b32.xlu1 %v2476_v25, %s4255_s23  ;;  %v2373_v41 = vadd.f32 %v2372_v11, %v5967_v47  ;;  %v6772_v20 = vrot.slane %v6046_v21, 4  ;;  %vm6995_vm0 = vcmask 523264   ;;  %vm6998_vm11 = vmmov %vm6994_vm4 }
 0x3e4   :  { %4012 = vmatprep.mubr.msk.bf16.mxu0 %vm6995_vm0, %v6129_v0  ;;  %v6136_v3 = vpack.c.bf16 %v2396_v35, %v2395_v54  ;;  %v2637_v22 = vsel %vm6889_vm12, %v2396_v35, 0.0  ;;  %v2649_v29 = vsel %vm6973_vm5, %v2396_v35, 0.0  ;;  %vm6996_vm14 = vsmask.f32 256  ;;  %vm6997_vm12 = vmmov %vm6993_vm3 }
 0x3e5   :  { %v2522_v42 = vsel %vm6996_vm14, %v6044_v49, %v2521_v27  ;;  %v6765_v18 = vshrl.u32 %v6054_v62, 16  ;;  %v2511_v47 = vshll.u32 %v6054_v62, 16  ;;  %v6146_v5 = vpack.c.bf16 %v2637_v22, %v2636_v9  ;;  %vm6999_vm15 = vmmov %vm6995_vm0 }
 0x3e6   :  { %v6148_v23 = vpack.c.bf16 %v2649_v29, %v2648_v24  ;;  %2562 = vrot.lane.b32.xlu0 %v2522_v42, %s4255_s23  ;;  %v2642_v52 = vsel %vm6974_vm6, %v2401_v44, 0.0  ;;  %v2399_v54 = vmax.f32 %v2373_v41, 0.0  ;;  %v2478_v51 = vsel %vm6997_vm12, %v2475_v16, %v6772_v20  ;;  %vm7000_vm5 = vmmov %vm6996_vm14 }
 0x3e7   :  { %v2384_v49 = vadd.f32 %v4003_v57, %v5977_v6  ;;  %2557 = vrot.lane.b32.xlu1 %v2478_v51, %s4255_s23  ;;  %v2452_v35 = vshll.u32 %v6064_v13, 16  ;;  %v2523_v9 = vrot.slane %v6771_v61, 7  ;;  %v6162_v48 = vsel %vm6998_vm11, %v2496_v63, %v2505_v36 }
 0x3e8   :  { %v2376_v45 = vadd.f32 %v2375_v32, %v5969_v30  ;;  %v2654_v11 = vsel %vm6976_vm1, %v2401_v44, 0.0  ;;  %v2640_v12 = vsel %vm6979_vm10, %v2399_v54, 0.0  ;;  %v2652_v6 = vsel %vm6981_vm8, %v2399_v54, 0.0  ;;  %4013 = vmatmul.mubr.msk.bf16.vlgmr.msra.gmra.mrb[128].mxu0 %vm6999_vm15, %v6162_v48  ;;  %vm7004_vm1 = vmmov %vm6994_vm4 }
 0x3e9   :  { %v2402_v16 = vmax.f32 %v2384_v49, 0.0  ;;  %v2524_v57 = vor.u32 %v2523_v9, %v2452_v35  ;;  %v2510_v30 = vrot.slane %v6765_v18, 4  ;;  %v2513_v40 = vrot.slane %v2511_v47, 5  ;;  %vm7005_vm10 = vmmov %vm6995_vm0 }
 0x3ea   :  { %v2400_v24 = vmax.f32 %v2376_v45, 0.0  ;;  %v2701_v63 = vrot.slane %v6136_v3, 4  ;;  %vm7002_vm6 = vnez %v6989_v1  ;;  %v6767_v42 = vshrl.u32 %v6103_v58, 16 }
 0x3eb   :  { %v6179_v32 = vpack.c.bf16 %v2402_v16, %v2401_v44  ;;  %v2643_v33 = vsel %vm6984_vm7, %v2402_v16, 0.0  ;;  %v2655_v60 = vsel %vm6986_vm2, %v2402_v16, 0.0  ;;  %v2525_v41 = vsel %vm7000_vm5, %v2520_v19, %v2524_v57  ;;  %vm7003_vm2 = vmmov %vm6993_vm3 }
 0x3ec   :  { %v6186_v25 = vpack.c.bf16 %v2643_v33, %v2642_v52  ;;  %v6188_v27 = vpack.c.bf16 %v2655_v60, %v2654_v11  ;;  %v6191_v22 = vpack.c.bf16 %v2400_v24, %v2399_v54  ;;  %2564 = vrot.lane.b32.xlu0 %v2525_v41, %s4255_s23  ;;  %v2641_v44 = vsel %vm6988_vm13, %v2400_v24, 0.0  ;;  %vm7006_vm8 = vmmov %vm7003_vm2 }
 0x3ed   :  { %v2653_v26 = vsel %vm7002_vm6, %v2400_v24, 0.0  ;;  %v2514_v7 = vor.u32 %v2513_v40, %v2510_v30  ;;  %v2709_v29 = vsel %vm7003_vm2, 0, %v2701_v63  ;;  %v6200_v52 = vpack.c.bf16 %v2641_v44, %v2640_v12  ;;  %vm7009_vm13 = vmmov %vm6995_vm0 }
 0x3ee   :  { %7001 = vst [vmem:[#allocation24_spill] sm:$0xff] %v6191_v22  ;;  %v6202_v51 = vpack.c.bf16 %v2653_v26, %v2652_v6  ;;  %2780 = vrot.lane.b32.xlu1 %v2709_v29, %s4255_s23  ;;  %v2461_v19 = vshll.u32 %v6056_v55, 16  ;;  %v2526_v59 = vrot.slane %v6769_v28, 7  ;;  %v2702_v1 = vrot.slane %v6091_v31, 4  ;;  %vm7010_vm3 = vmmov %vm7000_vm5 }
 0x3ef   :  { %v6207_v54 = vsel %vm7004_vm1, %v2505_v36, %v2514_v7  ;;  %v6768_v49 = vshrl.u32 %v6148_v23, 16  ;;  %v2664_v11 = vshll.u32 %v6148_v23, 16  ;;  %vm7007_vm7 = vnez %v6850_v2  ;;  %vm7011_vm4 = vmmov %vm7003_vm2 }
 0x3f0   :  { %v6766_v45 = vshrl.u32 %v6202_v51, 16  ;;  %4016 = vmatprep.mubr.msk.bf16.mxu0 %vm7005_vm10, %v6207_v54  ;;  %v2527_v12 = vor.u32 %v2526_v59, %v2461_v19  ;;  %v2703_v6 = vsel %vm7006_vm8, %v2701_v63, %v2702_v1  ;;  %v2549_v16 = vsel %vm7007_vm7, %v2514_v7, 0  ;;  %vm7013_vm0 = vmmov %vm7010_vm3 }
 0x3f1   :  { %v2747_v36 = vrot.slane %v6768_v49, 7  ;;  %v7008_v57 = vshll.u32 %v6016_v38, 16  ;;  %4017 = vmatmul.mubr.msk.bf16.gmra.mrb[132].mxu0 %vm7009_vm13, %v2549_v16  ;;  %v2704_v30 = vrot.slane %v6191_v22, 4  ;;  %v2672_v40 = vshll.u32 %v6103_v58, 16  ;;  %vm7018_vm14 = vmmov %vm7013_vm0 }
 0x3f2   :  { %2782 = vrot.lane.b32.xlu1 %v2703_v6, %s4255_s23  ;;  %v2749_v33 = vrot.slane %v6767_v42, 7  ;;  %v6770_v60 = vshrl.u32 %v6188_v27, 16  ;;  %v2528_v63 = vsel %vm7010_vm3, %v2523_v9, %v2527_v12  ;;  %v6773_v44 = vrot.slane %v6179_v32, 4  ;;  %vm7022_vm11 = vmmov %vm7013_vm0 }
 0x3f3   :  { %v6224_v24 = vrot.slane %v7008_v57, 4  ;;  %v2748_v41 = vor.u32 %v2747_v36, %v2664_v11  ;;  %2566 = vrot.lane.b32.xlu0 %v2528_v63, %s4255_s23  ;;  %v2705_v26 = vsel %vm7011_vm4, %v2702_v1, %v2704_v30  ;;  %v2681_v29 = vshll.u32 %v6202_v51, 16 }
 0x3f4   :  { %v2750_v7 = vor.u32 %v2749_v33, %v2672_v40  ;;  %v2752_v59 = vrot.slane %v6766_v45, 7  ;;  %v2714_v6 = vshll.u32 %v6146_v5, 16  ;;  %v2445_v16 = vrot.slane %v2443_v14, 4 }
 0x3f5   :  { %v2759_v9 = vsel %vm6992_vm9, 0, %v2748_v41  ;;  %v7012_v12 = vshll.u32 %v6001_v15, 16  ;;  %v6774_v63 = vshll.u32 %v6200_v52, 16  ;;  %v7014_v45 = vshll.u32 %v6062_v37, 16  ;;  %vm7017_vm9 = vmmov %vm7003_vm2 }
 0x3f6   :  { %2784 = vrot.lane.b32.xlu1 %v2705_v26, %s4255_s23  ;;  %v2751_v1 = vsel %vm7013_vm0, %v2747_v36, %v2750_v7  ;;  %v2753_v18 = vor.u32 %v2752_v59, %v2681_v29  ;;  %v7015_v49 = vshrl.u32 %v6001_v15, 16  ;;  %v2690_v14 = vshll.u32 %v6188_v27, 16 }
 0x3f7   :  { %v2533_v57 = vrot.slane %v7012_v12, 1  ;;  %v2536_v42 = vrot.slane %v7014_v45, 1  ;;  %v2755_v43 = vrot.slane %v6770_v60, 7  ;;  %v7016_v41 = vshll.u32 %v6011_v8, 16  ;;  %2789 = vrot.lane.b32.xlu0 %v2759_v9, %s4255_s23 }
 0x3f8   :  { %v2707_v36 = vsel %vm7017_vm9, %v2704_v30, %v6773_v44  ;;  %v2754_v26 = vsel %vm7018_vm14, %v2749_v33, %v2753_v18  ;;  %v2711_v45 = vshrl.u32 %v6146_v5, 16  ;;  %v2722_v15 = vshll.u32 %v6097_v17, 16 }
 0x3f9   :  { %v2535_v28 = vor.u32 %v2533_v57, %v7015_v49  ;;  %v2531_v12 = vrot.slane %v7016_v41, 1  ;;  %vm7019_vm12 = vsmask.f32 7424  ;;  %v2756_v7 = vor.u32 %v2755_v43, %v2690_v14 }
 0x3fa   :  { %v7020_v60 = vshrl.u32 %v6011_v8, 16  ;;  %v2760_v20 = vrot.slane %v2714_v6, 1  ;;  %v2454_v9 = vrot.slane %v2452_v35, 4  ;;  %v2463_v41 = vrot.slane %v2461_v19, 4  ;;  %2786 = vrot.lane.b32.xlu1 %v2707_v36, %s4255_s23  ;;  %vm7023_vm15 = vmmov %vm7019_vm12 }
 0x3fb   :  { %v2537_v49 = vsel %vm7019_vm12, %v2535_v28, %v2536_v42  ;;  %v7021_v30 = vshrl.u32 %v6062_v37, 16  ;;  %v6276_v5 = vrot.slane %v2511_v47, 1  ;;  %v2757_v28 = vsel %vm7022_vm11, %v2752_v59, %v2756_v7  ;;  %2791 = vrot.lane.b32.xlu0 %v2751_v1, %s4255_s23  ;;  %vm7024_vm5 = vmmov %vm7019_vm12 }
 0x3fc   :  { %v2532_v61 = vor.u32 %v2531_v12, %v7020_v60  ;;  %v2761_v8 = vor.u32 %v2760_v20, %v2711_v45  ;;  %v2762_v60 = vrot.slane %v2722_v15, 1  ;;  %v2728_v19 = vshrl.u32 %v6200_v52, 16  ;;  %vm7025_vm6 = vmmov %vm7024_vm5 }
 0x3fd   :  { %v2538_v18 = vor.u32 %v2536_v42, %v7021_v30  ;;  %v2740_v37 = vshll.u32 %v6186_v25, 16  ;;  %v2765_v47 = vrot.slane %v6774_v63, 1  ;;  %v2666_v42 = vrot.slane %v2664_v11, 4  ;;  %vm7027_vm1 = vmmov %vm7024_vm5 }
 0x3fe   :  { %v2534_v33 = vsel %vm7023_vm15, %v2532_v61, %v2533_v57  ;;  %v2674_v43 = vrot.slane %v2672_v40, 4  ;;  %v2763_v59 = vsel %vm7025_vm6, %v2761_v8, %v2762_v60  ;;  %v2719_v61 = vshrl.u32 %v6097_v17, 16  ;;  %2571 = vrot.lane.b32.xlu1 %v2537_v49, %s4255_s23  ;;  %vm7029_vm10 = vmmov %vm7027_vm1 }
 0x3ff   :  { %v6283_v35 = vsel %vm7024_vm5, %v2538_v18, %v6276_v5  ;;  %v2683_v20 = vrot.slane %v2681_v29, 4  ;;  %v2767_v57 = vor.u32 %v2765_v47, %v2728_v19  ;;  %v2768_v1 = vrot.slane %v2740_v37, 1  ;;  %2793 = vrot.lane.b32.xlu0 %v2754_v26, %s4255_s23  ;;  %vm7050_vm5 = vmmov %vm7003_vm2 }
 0x400   :  { %v2737_v12 = vshrl.u32 %v6186_v25, 16  ;;  %v2692_v36 = vrot.slane %v2690_v14, 4  ;;  %v7026_v7 = vrot.slane %v6046_v21, 4  ;;  %v2724_v18 = vrot.slane %v2722_v15, 5 }
 0x401   :  { %v2764_v44 = vor.u32 %v2762_v60, %v2719_v61  ;;  %v2742_v11 = vrot.slane %v2740_v37, 5  ;;  %v2769_v40 = vsel %vm7027_vm1, %v2767_v57, %v2768_v1  ;;  %v2721_v17 = vrot.slane %v2719_v61, 4 }
 0x402   :  { %v2547_v30 = vsel %vm7003_vm2, %v7026_v7, 0  ;;  %v7028_v29 = vshrl.u32 %v6016_v38, 16  ;;  %v7030_v25 = vshrl.u32 %v6003_v56, 16  ;;  %v7031_v63 = vshrl.u32 %v6064_v13, 16 }
 0x403   :  { %v2766_v8 = vsel %vm7029_vm10, %v2764_v44, %v2765_v47  ;;  %v7032_v15 = vshrl.u32 %v6056_v55, 16  ;;  %2578 = vrot.lane.b32.xlu1 %v2547_v30, %s4255_s23  ;;  %v2739_v26 = vrot.slane %v2737_v12, 4  ;;  %v2713_v61 = vrot.slane %v2711_v45, 4  ;;  %2795 = vrot.lane.b32.xlu0 %v2757_v28, %s4255_s23 }
 0x404   :  { %v2434_v49 = vrot.slane %v7028_v29, 3  ;;  %v2442_v14 = vrot.slane %v7030_v25, 3  ;;  %v2451_v22 = vrot.slane %v7031_v63, 3  ;;  %v2716_v57 = vrot.slane %v2714_v6, 5 }
 0x405   :  { %v2460_v60 = vrot.slane %v7032_v15, 3  ;;  %v7033_v56 = vshrl.u32 %v6148_v23, 16  ;;  %v2730_v13 = vrot.slane %v2728_v19, 4  ;;  %v2725_v55 = vor.u32 %v2724_v18, %v2721_v17  ;;  %v4211_v15 = vld [vmem:[%s6642_s5 + $0xc8] sm:$0xff]  }
 0x406   :  { %v2438_v37 = vor.u32 %v6224_v24, %v2434_v49  ;;  %v2446_v38 = vor.u32 %v2445_v16, %v2442_v14  ;;  %v2455_v7 = vor.u32 %v2454_v9, %v2451_v22  ;;  %v6314_v63 = vor.u32 %v2716_v57, %v2713_v61 }
 0x407   :  { %v6309_v29 = vor.u32 %v2463_v41, %v2460_v60  ;;  %v2663_v44 = vrot.slane %v7033_v56, 3  ;;  %v7034_v47 = vshrl.u32 %v6103_v58, 16  ;;  %vm7035_vm8 = vsmask.f32 4352  ;;  %2798 = vrot.lane.b32.xlu1 %v2763_v59, %s4255_s23  ;;  %2569 = vrot.lane.b32.xlu0 %v2534_v33, %s4255_s23 }
 0x408   :  { %v2447_v24 = vsel %vm7035_vm8, %v2438_v37, %v2446_v38  ;;  %vm7036_vm13 = vmmov %vm7035_vm8  ;;  %vm7038_vm4 = vsmask.f32 3328  ;;  %v7039_v58 = vshll.u32 %v6200_v52, 16  ;;  %v7040_v41 = vshrl.u32 %v6202_v51, 16 }
 0x409   :  { %v2671_v30 = vrot.slane %v7034_v47, 3  ;;  %v6320_v6 = vsel %vm7036_vm13, %v2446_v38, %v2455_v7  ;;  %vm7037_vm3 = vmmov %vm7035_vm8  ;;  %v6326_v23 = vor.u32 %v2666_v42, %v2663_v44  ;;  %v6331_v16 = vsel %vm7038_vm4, %v6314_v63, %v2725_v55  ;;  %v4214_v38 = vld [vmem:[%s6642_s5 + $0x90] sm:$0xff]   ;;  %v4216_v44 = vld [vmem:[%s6642_s5 + $0x98] sm:$0xff]  }
 0x40a   :  { %v6324_v22 = vsel %vm7037_vm3, %v2455_v7, %v6309_v29  ;;  %v2733_v9 = vrot.slane %v7039_v58, 5  ;;  %v2680_v28 = vrot.slane %v7040_v41, 3  ;;  %v6337_v19 = vor.u32 %v2742_v11, %v2739_v26  ;;  %vm7042_vm0 = vmmov %vm7037_vm3  ;;  %v4213_v26 = vld [vmem:[%s6642_s5 + $0xd0] sm:$0xff]   ;;  %v4215_v7 = vld [vmem:[%s6642_s5 + $0xd8] sm:$0xff]  }
 0x40b   :  { %v2675_v45 = vor.u32 %v2674_v43, %v2671_v30  ;;  %v7041_v18 = vshrl.u32 %v6188_v27, 16  ;;  %v2770_v49 = vor.u32 %v2768_v1, %v2737_v12  ;;  %2802 = vrot.lane.b32.xlu1 %v2769_v40, %s4255_s23  ;;  %vm7043_vm9 = vmmov %vm7038_vm4  ;;  %v7045_v51 = vshrl.u32 %v6054_v62, 16  ;;  %2573 = vrot.lane.b32.xlu0 %v6283_v35, %s4255_s23  ;;  %v4218_v30 = vld [vmem:[%s6642_s5 + $0xa0] sm:$0xff]   ;;  %v4221_v41 = vld [vmem:[%s6642_s5 + $0xf0] sm:$0xff]  }
 0x40c   :  { %v2734_v59 = vor.u32 %v2733_v9, %v2730_v13  ;;  %v2684_v43 = vor.u32 %v2683_v20, %v2680_v28  ;;  %vm7044_vm14 = vmmov %vm7038_vm4  ;;  %vm7048_vm15 = vnez %v6938_v50  ;;  %v2517_v40 = vsel %vm7007_vm7, 0, %v6119_v34  ;;  %v4210_v50 = vld [vmem:[%s6642_s5 + $0x80] sm:$0xff]   ;;  %v4212_v34 = vld [vmem:[%s6642_s5 + $0x88] sm:$0xff]  }
 0x40d   :  { %v2689_v17 = vrot.slane %v7041_v18, 3  ;;  %v6344_v42 = vsel %vm7042_vm0, %v6326_v23, %v2675_v45  ;;  %v2541_v33 = vor.u32 %v6276_v5, %v7045_v51  ;;  %vm7046_vm12 = vmmov %vm7042_vm0  ;;  %v2772_v1 = vsel %vm7048_vm15, %v2770_v49, 0  ;;  %v4217_v13 = vld [vmem:[%s6642_s5 + $0xe0] sm:$0xff]  }
 0x40e   :  { %v6350_v52 = vsel %vm7043_vm9, %v2725_v55, %v2734_v59  ;;  %v6354_v27 = vsel %vm7044_vm14, %v2734_v59, %v6337_v19  ;;  %v6360_v11 = vsel %vm7046_vm12, %v2675_v45, %v2684_v43  ;;  %vm7047_vm11 = vmmov %vm7042_vm0  ;;  %v7049_v5 = vrot.slane %v6179_v32, 4 }
 0x40f   :  { %v6346_v25 = vor.u32 %v2692_v36, %v2689_v17  ;;  %2804 = vrot.lane.b32.xlu1 %v2772_v1, %s4255_s23  ;;  %v2543_v62 = vsel %vm7048_vm15, %v2541_v33, 0  ;;  %vm7051_vm6 = vnez %v6853_v4  ;;  %vm7052_vm2 = vcmask 523264   ;;  %v4223_v17 = vld [vmem:[%s6642_s5 + $0xf8] sm:$0xff]  }
 0x410   :  { %2575 = vrot.lane.b32.xlu0 %v2543_v62, %s4255_s23  ;;  %v2776_v12 = vsel %vm7050_vm5, %v7049_v5, 0  ;;  %v2467_v14 = vsel %vm7051_vm6, 0, %v2438_v37  ;;  %vm7053_vm1 = vmmov %vm7052_vm2  ;;  %v2746_v59 = vsel %vm7007_vm7, 0, %v6314_v63  ;;  %v2778_v4 = vsel %vm7007_vm7, %v6337_v19, 0 }
 0x411   :  { %v6364_v20 = vsel %vm7047_vm11, %v2684_v43, %v6346_v25  ;;  %vm7054_vm10 = vmmov %vm7053_vm1  ;;  %v4224_v43 = vld [vmem:[%s6642_s5 + $0xb8] sm:$0xff]  }
 0x412   :  { %vm7055_vm8 = vmmov %vm7053_vm1 }
 0x413   :  { %vm7056_vm13 = vmmov %vm7053_vm1 }
 0x414   :  { %2800 = vrot.lane.b32.xlu0 %v2766_v8, %s4255_s23  ;;  %vm7057_vm3 = vmmov %vm7053_vm1 }
 0x415   :  { %vm7058_vm4 = vmmov %vm7053_vm1 }
 0x416   :  { %vm7059_vm0 = vmmov %vm7053_vm1 }
 0x417   :  { %vm7060_vm9 = vmmov %vm7059_vm0 }
 0x418   :  { %2807 = vrot.lane.b32.xlu0 %v2776_v12, %s4255_s23  ;;  %vm7061_vm14 = vmmov %vm7059_vm0 }
 0x419   :  { %vm7062_vm12 = vmmov %vm7059_vm0 }
 0x41a   :  { %vm7063_vm11 = vmmov %vm7059_vm0 }
 0x41b   :  { %vm7064_vm15 = vmmov %vm7059_vm0 }
 0x41c   :  { %vm7065_vm5 = vmmov %vm7059_vm0 }
 0x41d   :  { %vm7084_vm7 = vmmov %vm7059_vm0 }
 0x444   :  { %v2552_v36 = vpop.permute.xlu1 %2551 }
 0x445   :  { %v2582_v60 = vsel %vm7053_vm1, %v2467_v14, %v2552_v36  ;;  %vm7067_vm1 = vmmov %vm7059_vm0 }
 0x448   :  { %v2554_v61 = vpop.permute.xlu1 %2553 }
 0x449   :  { %v2586_v56 = vsel %vm7055_vm8, %v2447_v24, %v2554_v61  ;;  %v4219_v24 = vld [vmem:[%s6642_s5 + $0xe8] sm:$0xff]   ;;  %vm7069_vm8 = vmmov %vm7059_vm0 }
 0x451   :  { %v2561_v35 = vpop.permute.xlu0 %2560 }
 0x452   :  { %v2598_v8 = vsel %vm7052_vm2, %v2517_v40, %v2561_v35  ;;  %vm7066_vm2 = vmmov %vm7059_vm0 }
 0x453   :  { %3206 = vmatprep.mubr.bf16.mxu1 %v2598_v8 }
 0x454   :  { %3207 = vmatmul.mubr.bf16.vlgmr.msra.gmra.mrb[80].mxu1 %v2582_v60 }
 0x455   :  { %3905 = vmatpush3.bf16.msra.mxu1 %v4210_v50  ;;  %v2556_v47 = vpop.permute.xlu1 %2555 }
 0x456   :  { %3906 = vmatprep.subr.bf16.mxu1 %v4211_v15  ;;  %v2590_v45 = vsel %vm7057_vm3, %v6320_v6, %v2556_v47  ;;  %v4222_v6 = vld [vmem:[%s6642_s5 + $0xb0] sm:$0xff]   ;;  %v4227_v15 = vld [vmem:[%s6642_s5 + $0x108] sm:$0xff]   ;;  %vm7071_vm3 = vmmov %vm7059_vm0 }
 0x458   :  { %v2563_v37 = vpop.permute.xlu0 %2562 }
 0x459   :  { %v2602_v57 = vsel %vm7054_vm10, %v6129_v0, %v2563_v37  ;;  %3907 = vmatpush3.bf16.msra.mxu1 %v4212_v34  ;;  %v2558_v28 = vpop.permute.xlu1 %2557  ;;  %vm7068_vm10 = vmmov %vm7059_vm0  ;;  %v4229_v34 = vld [vmem:[%s6642_s5 + $0x118] sm:$0xff]  }
 0x45a   :  { %3214 = vmatprep.mubr.bf16.mxu1 %v2602_v57  ;;  %3908 = vmatprep.subr.bf16.mxu1 %v4213_v26  ;;  %v2545_v57 = vsel %vm7051_vm6, %v6309_v29, 0 }
 0x45c   :  { %3215 = vmatmul.mubr.bf16.gmra.mrb[84].mxu1 %v2586_v56 }
 0x45d   :  { %3909 = vmatpush3.bf16.msra.mxu1 %v4214_v38 }
 0x45e   :  { %v2565_v0 = vpop.permute.xlu0 %2564  ;;  %3910 = vmatprep.subr.bf16.mxu1 %v4215_v7 }
 0x45f   :  { %v2606_v55 = vsel %vm7056_vm13, %v6162_v48, %v2565_v0  ;;  %v4220_v48 = vld [vmem:[%s6642_s5 + $0xa8] sm:$0xff]   ;;  %vm7070_vm13 = vmmov %vm7059_vm0 }
 0x460   :  { %3222 = vmatprep.mubr.bf16.mxu1 %v2606_v55  ;;  %v2781_v51 = vpop.permute.xlu1 %2780 }
 0x461   :  { %3911 = vmatpush3.bf16.msra.mxu1 %v4216_v44 }
 0x462   :  { %3912 = vmatprep.subr.bf16.mxu1 %v4217_v13 }
 0x464   :  { %3223 = vmatmul.mubr.bf16.gmra.mrb[88].mxu1 %v2590_v45  ;;  %v2783_v62 = vpop.permute.xlu1 %2782 }
 0x465   :  { %v2567_v58 = vpop.permute.xlu0 %2566  ;;  %3913 = vmatpush3.bf16.msra.mxu1 %v4218_v30  ;;  %v2815_v12 = vsel %vm7063_vm11, %v6344_v42, %v2783_v62  ;;  %vm7077_vm11 = vmmov %vm7059_vm0 }
 0x466   :  { %v2610_v9 = vsel %vm7058_vm4, %v6207_v54, %v2567_v58  ;;  %3914 = vmatprep.subr.bf16.mxu1 %v4219_v24  ;;  %v2594_v54 = vsel %vm7059_vm0, %v6324_v22, %v2558_v28  ;;  %v2696_v22 = vsel %vm7051_vm6, 0, %v6326_v23  ;;  %vm7072_vm4 = vmmov %vm7059_vm0  ;;  %v7074_v24 = vld [vmem:[#allocation24_spill] sm:$0xff] }
 0x467   :  { %3230 = vmatprep.mubr.bf16.mxu1 %v2610_v9  ;;  %v2811_v63 = vsel %vm7061_vm14, %v2696_v22, %v2781_v51  ;;  %vm7075_vm14 = vmmov %vm7059_vm0 }
 0x468   :  { %v2785_v23 = vpop.permute.xlu1 %2784 }
 0x469   :  { %v2790_v18 = vpop.permute.xlu0 %2789  ;;  %3915 = vmatpush3.bf16.msra.mxu1 %v4220_v48 }
 0x46a   :  { %3916 = vmatprep.subr.bf16.mxu1 %v4221_v41  ;;  %v2827_v49 = vsel %vm7060_vm9, %v2746_v59, %v2790_v18  ;;  %vm7073_vm9 = vmmov %vm7059_vm0 }
 0x46c   :  { %3231 = vmatmul.mubr.bf16.gmra.mrb[92].mxu1 %v2594_v54  ;;  %v2787_v50 = vpop.permute.xlu1 %2786 }
 0x46d   :  { %3238 = vmatprep.mubr.bf16.mxu1 %v2827_v49  ;;  %3917 = vmatpush3.bf16.msra.mxu1 %v4222_v6  ;;  %v2792_v33 = vpop.permute.xlu0 %2791  ;;  %v2823_v14 = vsel %vm7067_vm1, %v6364_v20, %v2787_v50  ;;  %v4228_v20 = vld [vmem:[%s6642_s5 + $0x110] sm:$0xff]   ;;  %vm7085_vm1 = vmmov %vm7059_vm0 }
 0x46e   :  { %3918 = vmatprep.subr.bf16.mxu1 %v4223_v17  ;;  %v2831_v1 = vsel %vm7062_vm12, %v6331_v16, %v2792_v33  ;;  %vm7076_vm12 = vmmov %vm7059_vm0 }
 0x470   :  { %v2572_v60 = vpop.permute.xlu1 %2571 }
 0x471   :  { %3919 = vmatpush3.bf16.msra.mxu1 %v4224_v43  ;;  %v2794_v5 = vpop.permute.xlu0 %2793 }
 0x472   :  { %4028 = vmatprep.subr.bf16.mxu1 %v5839_v39  ;;  %v2835_v36 = vsel %vm7064_vm15, %v6350_v52, %v2794_v5  ;;  %v2819_v39 = vsel %vm7065_vm5, %v6360_v11, %v2785_v23  ;;  %v4226_v11 = vld [vmem:[%s6642_s5 + $0x100] sm:$0xff]   ;;  %vm7078_vm15 = vmmov %vm7059_vm0 }
 0x473   :  { %vm7080_vm5 = vmmov %vm7059_vm0 }
 0x474   :  { %3239 = vmatmul.mubr.bf16.gmra.mrb[96].mxu1 %v2811_v63 }
 0x475   :  { %3246 = vmatprep.mubr.bf16.mxu1 %v2831_v1  ;;  %v2796_v35 = vpop.permute.xlu0 %2795  ;;  %v2579_v37 = vpop.permute.xlu1 %2578 }
 0x476   :  { %v2839_v40 = vsel %vm7066_vm2, %v6354_v27, %v2796_v35  ;;  %vm7081_vm2 = vmmov %vm7059_vm0 }
 0x479   :  { %v2570_v42 = vpop.permute.xlu0 %2569 }
 0x47a   :  { %v2614_v8 = vsel %vm7068_vm10, %v6005_v10, %v2570_v42  ;;  %v2618_v10 = vsel %vm7069_vm8, %v5995_v46, %v2572_v60  ;;  %v2630_v46 = vsel %vm7071_vm3, %v2545_v57, %v2579_v37  ;;  %vm7088_vm10 = vmmov %vm7059_vm0 }
 0x47b   :  { %vm7089_vm8 = vmmov %vm7059_vm0 }
 0x47c   :  { %3247 = vmatmul.mubr.bf16.gmra.mrb[100].mxu1 %v2815_v12  ;;  %vm7093_vm3 = vmmov %vm7059_vm0 }
 0x47d   :  { %3254 = vmatprep.mubr.bf16.mxu1 %v2835_v36  ;;  %v2574_v26 = vpop.permute.xlu0 %2573 }
 0x47e   :  { %v2622_v61 = vsel %vm7070_vm13, %v6052_v53, %v2574_v26  ;;  %vm7092_vm13 = vmmov %vm7059_vm0 }
 0x482   :  { %v2576_v38 = vpop.permute.xlu0 %2575 }
 0x483   :  { %v2626_v7 = vsel %vm7072_vm4, %v6046_v21, %v2576_v38  ;;  %vm7096_vm4 = vmmov %vm7059_vm0 }
 0x484   :  { %3255 = vmatmul.mubr.bf16.gmra.mrb[104].mxu1 %v2819_v39 }
 0x485   :  { %3262 = vmatprep.mubr.bf16.mxu1 %v2839_v40 }
 0x486   :  { %v2801_v53 = vpop.permute.xlu0 %2800 }
 0x487   :  { %v2847_v29 = vsel %vm7073_vm9, %v6091_v31, %v2801_v53  ;;  %vm7101_vm9 = vmmov %vm7059_vm0 }
 0x48a   :  { %v2808_v30 = vpop.permute.xlu0 %2807 }
 0x48c   :  { %3263 = vmatmul.mubr.bf16.gmra.mrb[108].mxu1 %v2823_v14 }
 0x48d   :  { %3303 = vmatprep.mubr.bf16.mxu1 %v2586_v56  ;;  %v2799_v56 = vpop.permute.xlu1 %2798 }
 0x48e   :  { %v2843_v44 = vsel %vm7059_vm0, %v6136_v3, %v2799_v56 }
 0x491   :  { %v2803_v47 = vpop.permute.xlu1 %2802 }
 0x492   :  { %v2851_v3 = vsel %vm7075_vm14, %v7074_v24, %v2803_v47  ;;  %vm7102_vm14 = vmmov %vm7059_vm0 }
 0x494   :  { %3304 = vmatmul.mubr.bf16.vlgmr.msra.gmra.mrb[112].mxu1 %v2614_v8 }
 0x495   :  { %4032 = vmatpush3.bf16.msra.mxu1 %v4226_v11  ;;  %3311 = vmatprep.mubr.bf16.mxu1 %v2590_v45  ;;  %v2774_v45 = vsel %vm7051_vm6, %v6346_v25, 0  ;;  %v2805_v28 = vpop.permute.xlu1 %2804  ;;  %vm7079_vm6 = vmmov %vm7059_vm0 }
 0x496   :  { %4029 = vmatprep.subr.bf16.mxu1 %v4227_v15  ;;  %v2859_v31 = vsel %vm7076_vm12, %v2774_v45, %v2808_v30  ;;  %v2855_v18 = vsel %vm7077_vm11, %v6179_v32, %v2805_v28  ;;  %vm7103_vm12 = vmmov %vm7059_vm0 }
 0x497   :  { %vm7104_vm11 = vmmov %vm7059_vm0 }
 0x499   :  { %4033 = vmatpush3.bf16.msra.mxu1 %v4227_v15 }
 0x49a   :  { %4030 = vmatprep.subr.bf16.mxu1 %v4228_v20 }
 0x49c   :  { %3312 = vmatmul.mubr.bf16.gmra.mrb[116].mxu1 %v2618_v10 }
 0x49d   :  { %3319 = vmatprep.mubr.bf16.mxu1 %v2594_v54  ;;  %4034 = vmatpush3.bf16.msra.mxu1 %v4228_v20 }
 0x49e   :  { %4031 = vmatprep.subr.bf16.mxu1 %v4229_v34 }
 0x4a1   :  { %4035 = vmatpush3.bf16.msra.mxu1 %v4229_v34 }
 0x4a4   :  { %3320 = vmatmul.mubr.bf16.gmra.mrb[120].mxu1 %v2622_v61 }
 0x4a5   :  { %3327 = vmatprep.mubr.bf16.mxu1 %v2630_v46  ;;  %v6546_v46 = vld [vmem:[%s6643_s6] ss:$0 sm:$0xff]  ;;  %s4256_s6 = smov [#allocation2]  }
 0x4a6   :  { %s3518_s3 = sshll.u32 %s4256_s6, 4  ;;  %s3519_s3 = int_to_ptr.vmem [resolvable:$true] %s3518_s3 }
 0x4a7   :  { %s4230_s19 = scalar_lea.vmem %s3519_s3, 2048  ;;  %p4235_p1 = scmp.lt.s32.totalorder %s3519_s3, %s3519_s3 }
 0x4a8   :  { %p4231_p0 = scmp.ne.s32.totalorder %s3519_s3, %s4230_s19  ;;  %p4236_p2 = scmp.lt.s32.totalorder %s4230_s19, %s4230_s19 }
 0x4aa   :  { %p4237_p3 = por %p4236_p2, %p4235_p1 }
 0x4ac   :  { %3328 = vmatmul.mubr.bf16.gmra.mrb[124].mxu1 %v2626_v7  ;;  %p4238_p4 = pnand %p4237_p3, %p4231_p0 }
 0x4ad   :  { %3335 = vmatprep.mubr.bf16.mxu1 %v2815_v12 }
 0x4b4   :  { %3336 = vmatmul.mubr.bf16.gmra.mrb[128].mxu1 %v2843_v44 }
 0x4b5   :  { %3343 = vmatprep.mubr.bf16.mxu1 %v2819_v39 }
 0x4bb   :  { %v6489_v0 = vpop.f32.mrb[128].mxu0 }
 0x4bc   :  { %v6493_v13 = vpop.f32.mrb[129].mxu0  ;;  %3344 = vmatmul.mubr.bf16.gmra.mrb[132].mxu1 %v2847_v29 }
 0x4bd   :  { %v6495_v55 = vpop.f32.mrb[130].mxu0  ;;  %3351 = vmatprep.mubr.bf16.mxu1 %v2823_v14 }
 0x4be   :  { %v6497_v21 = vpop.f32.mrb[131].mxu0 }
 0x4c4   :  { %v6504_v58 = vpop.f32.mrb[132].mxu0  ;;  %3352 = vmatmul.mubr.bf16.gmra.mrb[136].mxu1 %v2851_v3 }
 0x4c5   :  { %v6507_v48 = vpop.f32.mrb[133].mxu0  ;;  %3359 = vmatprep.mubr.bf16.mxu1 %v2859_v31 }
 0x4c6   :  { %v6509_v9 = vpop.f32.mrb[134].mxu0 }
 0x4c7   :  { %v6511_v41 = vpop.f32.mrb[135].mxu0 }
 0x4cc   :  { %3360 = vmatmul.mubr.bf16.gmra.mrb[140].mxu1 %v2855_v18 }
 0x4cd   :  { %4020 = vmatprep.mubr.msk.bf16.mxu1 %vm7078_vm15, %v6331_v16  ;;  %vm7109_vm15 = vmmov %vm7059_vm0 }
 0x4d4   :  { %4021 = vmatmul.mubr.msk.bf16.vlgmr.msra.gmra.mrb[144].mxu1 %vm7079_vm6, %v6350_v52  ;;  %vm7110_vm6 = vmmov %vm7059_vm0 }
 0x4d5   :  { %4024 = vmatprep.mubr.msk.bf16.mxu1 %vm7080_vm5, %v6354_v27  ;;  %vm7111_vm5 = vmmov %vm7059_vm0 }
 0x4dc   :  { %4025 = vmatmul.mubr.msk.bf16.gmra.mrb[148].mxu1 %vm7081_vm2, %v2778_v4  ;;  %vm7112_vm2 = vmmov %vm7059_vm0 }
 0x527   :  { %v3856_v25 = vpop.f32.mrb[80].mxu1 }
 0x528   :  { %v3857_v6 = vpop.f32.mrb[81].mxu1 }
 0x529   :  { %v3858_v17 = vadd.f32 %v3857_v6, %v3856_v25  ;;  %v3859_v32 = vpop.f32.mrb[82].mxu1 }
 0x52a   :  { %v3860_v54 = vpop.f32.mrb[83].mxu1 }
 0x52b   :  { %v3861_v59 = vadd.f32 %v3860_v54, %v3859_v32  ;;  %v3209_v4 = vadd.f32 %v3858_v17, %v6546_v46  ;;  %v7083_v17 = vld [vmem:[#allocation10_spill] sm:$0xff] }
 0x52d   :  { %v3212_v54 = vadd.f32 %v3861_v59, %v6546_v46 }
 0x52f   :  { %v3862_v49 = vpop.f32.mrb[84].mxu1 }
 0x530   :  { %v3863_v16 = vpop.f32.mrb[85].mxu1 }
 0x531   :  { %v3864_v43 = vadd.f32 %v3863_v16, %v3862_v49  ;;  %v3865_v51 = vpop.f32.mrb[86].mxu1 }
 0x532   :  { %v3866_v52 = vpop.f32.mrb[87].mxu1 }
 0x533   :  { %v6525_v33 = vadd.f32 %v3866_v52, %v3865_v51 }
 0x535   :  { %v3220_v59 = vadd.f32 %v6525_v33, %v6546_v46 }
 0x537   :  { %v3868_v27 = vpop.f32.mrb[88].mxu1 }
 0x538   :  { %v3869_v22 = vpop.f32.mrb[89].mxu1 }
 0x539   :  { %v6527_v63 = vadd.f32 %v3869_v22, %v3868_v27  ;;  %v3871_v2 = vpop.f32.mrb[90].mxu1  ;;  %v7082_v27 = vld [vmem:[#allocation9_spill] sm:$0xff] }
 0x53a   :  { %v3872_v19 = vpop.f32.mrb[91].mxu1 }
 0x53b   :  { %v6529_v1 = vadd.f32 %v3872_v19, %v3871_v2 }
 0x53f   :  { %v3874_v62 = vpop.f32.mrb[92].mxu1 }
 0x540   :  { %v3875_v5 = vpop.f32.mrb[93].mxu1 }
 0x541   :  { %v6531_v12 = vadd.f32 %v3875_v5, %v3874_v62  ;;  %v3877_v36 = vpop.f32.mrb[94].mxu1  ;;  %v3217_v5 = vadd.f32 %v3864_v43, %v6546_v46  ;;  %v7086_v43 = vld [vmem:[#allocation11_spill] sm:$0xff] }
 0x542   :  { %v3878_v23 = vpop.f32.mrb[95].mxu1 }
 0x543   :  { %v6533_v35 = vadd.f32 %v3878_v23, %v3877_v36 }
 0x547   :  { %v3880_v39 = vpop.f32.mrb[96].mxu1 }
 0x548   :  { %v3881_v40 = vpop.f32.mrb[97].mxu1 }
 0x549   :  { %v6535_v50 = vadd.f32 %v3881_v40, %v3880_v39  ;;  %v3883_v14 = vpop.f32.mrb[98].mxu1 }
 0x54a   :  { %v3884_v42 = vpop.f32.mrb[99].mxu1 }
 0x54b   :  { %v6537_v8 = vadd.f32 %v3884_v42, %v3883_v14 }
 0x54f   :  { %v3886_v11 = vpop.f32.mrb[100].mxu1 }
 0x550   :  { %v3887_v15 = vpop.f32.mrb[101].mxu1 }
 0x551   :  { %v6539_v60 = vadd.f32 %v3887_v15, %v3886_v11  ;;  %v3889_v20 = vpop.f32.mrb[102].mxu1 }
 0x552   :  { %v3890_v10 = vpop.f32.mrb[103].mxu1 }
 0x553   :  { %v6541_v34 = vadd.f32 %v3890_v10, %v3889_v20 }
 0x557   :  { %v3892_v26 = vpop.f32.mrb[104].mxu1 }
 0x558   :  { %v3893_v37 = vpop.f32.mrb[105].mxu1 }
 0x559   :  { %v3894_v61 = vadd.f32 %v3893_v37, %v3892_v26  ;;  %v3895_v57 = vpop.f32.mrb[106].mxu1 }
 0x55a   :  { %v3896_v38 = vpop.f32.mrb[107].mxu1 }
 0x55b   :  { %v6549_v7 = vadd.f32 %v3894_v61, %v6546_v46  ;;  %v3897_v56 = vadd.f32 %v3896_v38, %v3895_v57  ;;  %v3225_v61 = vadd.f32 %v6527_v63, %v6546_v46  ;;  %v7087_v57 = vld [vmem:[#allocation13_spill] sm:$0xff]  ;;  %v7090_v63 = vld [vmem:[#allocation15_spill] sm:$0xff] }
 0x55d   :  { %v6552_v44 = vadd.f32 %v3897_v56, %v6546_v46 }
 0x55f   :  { %v3898_v53 = vpop.f32.mrb[108].mxu1 }
 0x560   :  { %v3899_v29 = vpop.f32.mrb[109].mxu1 }
 0x561   :  { %v3900_v47 = vadd.f32 %v3899_v29, %v3898_v53  ;;  %v3901_v30 = vpop.f32.mrb[110].mxu1 }
 0x562   :  { %v3902_v24 = vpop.f32.mrb[111].mxu1 }
 0x563   :  { %v6555_v3 = vadd.f32 %v3900_v47, %v6546_v46  ;;  %v3903_v45 = vadd.f32 %v3902_v24, %v3901_v30  ;;  %v3228_v47 = vadd.f32 %v6529_v1, %v6546_v46 }
 0x565   :  { %v6558_v31 = vadd.f32 %v3903_v45, %v6546_v46 }
 0x567   :  { %v3920_v28 = vpop.f32.mrb[112].mxu1 }
 0x568   :  { %v3921_v18 = vpop.f32.mrb[113].mxu1 }
 0x569   :  { %v3922_v25 = vadd.f32 %v3921_v18, %v3920_v28  ;;  %v3923_v6 = vpop.f32.mrb[114].mxu1 }
 0x56a   :  { %v3924_v32 = vpop.f32.mrb[115].mxu1 }
 0x56b   :  { %v3306_v49 = vadd.f32 %v3922_v25, %v3209_v4  ;;  %v3925_v16 = vadd.f32 %v3924_v32, %v3923_v6  ;;  %v3233_v6 = vadd.f32 %v6531_v12, %v6546_v46  ;;  %v7091_v32 = vld [vmem:[#allocation16_spill] sm:$0xff]  ;;  %v7094_v12 = vld [vmem:[#allocation18_spill] sm:$0xff] }
 0x56d   :  { %v3403_v51 = vadd.f32 %v6493_v13, %v3306_v49  ;;  %v3309_v52 = vadd.f32 %v3925_v16, %v3212_v54 }
 0x56f   :  { %v3465_v22 = vadd.f32 %v3403_v51, %v7082_v27  ;;  %v3406_v2 = vadd.f32 %v6497_v21, %v3309_v52  ;;  %v3926_v19 = vpop.f32.mrb[116].mxu1  ;;  %v3236_v52 = vadd.f32 %v6533_v35, %v6546_v46 }
 0x570   :  { %v3927_v62 = vpop.f32.mrb[117].mxu1 }
 0x571   :  { %v3481_v36 = vmax.f32 %v3465_v22, 0.0  ;;  %v3466_v23 = vadd.f32 %v3406_v2, %v7083_v17  ;;  %v3928_v39 = vadd.f32 %v3927_v62, %v3926_v19  ;;  %v3929_v40 = vpop.f32.mrb[118].mxu1  ;;  %v3241_v17 = vadd.f32 %v6535_v50, %v6546_v46 }
 0x572   :  { %v3930_v14 = vpop.f32.mrb[119].mxu1  ;;  %v3249_v50 = vadd.f32 %v6539_v60, %v6546_v46 }
 0x573   :  { %3497 = vst.msk [vmem:[#allocation2] sm:$0xff] %vm7084_vm7, %v3481_v36  ;;  %v3482_v13 = vmax.f32 %v3466_v23, 0.0  ;;  %v3314_v42 = vadd.f32 %v3928_v39, %v3217_v5  ;;  %v3931_v11 = vadd.f32 %v3930_v14, %v3929_v40  ;;  %v7095_v23 = vld [vmem:[#allocation19_spill] sm:$0xff] }
 0x575   :  { %3498 = vst.msk [vmem:[#allocation2 + $0x8] sm:$0xff] %vm7085_vm1, %v3482_v13  ;;  %v3411_v21 = vadd.f32 %v6489_v0, %v3314_v42  ;;  %v3317_v15 = vadd.f32 %v3931_v11, %v3220_v59  ;;  %v3244_v13 = vadd.f32 %v6537_v8, %v6546_v46 }
 0x577   :  { %v3467_v20 = vadd.f32 %v3411_v21, %v7086_v43  ;;  %v3414_v10 = vadd.f32 %v6495_v55, %v3317_v15  ;;  %v3932_v26 = vpop.f32.mrb[120].mxu1 }
 0x578   :  { %v3933_v37 = vpop.f32.mrb[121].mxu1 }
 0x579   :  { %v3483_v33 = vmax.f32 %v3467_v20, 0.0  ;;  %v3468_v38 = vadd.f32 %v3414_v10, %v7087_v57  ;;  %v3934_v56 = vadd.f32 %v3933_v37, %v3932_v26  ;;  %v3935_v53 = vpop.f32.mrb[122].mxu1  ;;  %v3252_v26 = vadd.f32 %v6541_v34, %v6546_v46 }
 0x57a   :  { %v3936_v29 = vpop.f32.mrb[123].mxu1 }
 0x57b   :  { %3499 = vst.msk [vmem:[#allocation2 + $0x10] sm:$0xff] %vm7088_vm10, %v3483_v33  ;;  %v3484_v0 = vmax.f32 %v3468_v38, 0.0  ;;  %v3322_v30 = vadd.f32 %v3934_v56, %v3225_v61  ;;  %v3937_v24 = vadd.f32 %v3936_v29, %v3935_v53 }
 0x57d   :  { %3500 = vst.msk [vmem:[#allocation2 + $0x18] sm:$0xff] %vm7089_vm8, %v3484_v0  ;;  %v3419_v55 = vadd.f32 %v6507_v48, %v3322_v30  ;;  %v3325_v45 = vadd.f32 %v3937_v24, %v3228_v47 }
 0x57f   :  { %v3469_v28 = vadd.f32 %v3419_v55, %v7090_v63  ;;  %v3422_v18 = vadd.f32 %v6511_v41, %v3325_v45  ;;  %v3938_v4 = vpop.f32.mrb[124].mxu1 }
 0x580   :  { %v3939_v25 = vpop.f32.mrb[125].mxu1 }
 0x581   :  { %v3485_v1 = vmax.f32 %v3469_v28, 0.0  ;;  %v3470_v54 = vadd.f32 %v3422_v18, %v7091_v32  ;;  %v3940_v49 = vadd.f32 %v3939_v25, %v3938_v4  ;;  %v3941_v16 = vpop.f32.mrb[126].mxu1 }
 0x582   :  { %v3942_v51 = vpop.f32.mrb[127].mxu1 }
 0x583   :  { %3501 = vst.msk [vmem:[#allocation2 + $0x20] sm:$0xff] %vm7092_vm13, %v3485_v1  ;;  %v3486_v48 = vmax.f32 %v3470_v54, 0.0  ;;  %v3330_v27 = vadd.f32 %v3940_v49, %v3233_v6  ;;  %v3943_v22 = vadd.f32 %v3942_v51, %v3941_v16  ;;  %v7097_v1 = vld [vmem:[#allocation38_spill] sm:$0xff] }
 0x585   :  { %3502 = vst.msk [vmem:[#allocation2 + $0x28] sm:$0xff] %vm7093_vm3, %v3486_v48  ;;  %v3427_v41 = vadd.f32 %v6504_v58, %v3330_v27  ;;  %v3333_v2 = vadd.f32 %v3943_v22, %v3236_v52  ;;  %v7099_v52 = vld [vmem:[#allocation39_spill] sm:$0xff]  ;;  %v7100_v22 = vld [vmem:[#allocation37_spill] sm:$0xff] }
 0x587   :  { %v3471_v19 = vadd.f32 %v3427_v41, %v7094_v12  ;;  %v3430_v62 = vadd.f32 %v6509_v9, %v3333_v2  ;;  %v3944_v5 = vpop.f32.mrb[128].mxu1 }
 0x588   :  { %v3945_v36 = vpop.f32.mrb[129].mxu1 }
 0x589   :  { %v3487_v35 = vmax.f32 %v3471_v19, 0.0  ;;  %v3472_v39 = vadd.f32 %v3430_v62, %v7095_v23  ;;  %v3946_v40 = vadd.f32 %v3945_v36, %v3944_v5  ;;  %v3947_v14 = vpop.f32.mrb[130].mxu1  ;;  %v7105_v36 = vld [vmem:[#allocation25_spill] sm:$0xff] }
 0x58a   :  { %v3948_v59 = vpop.f32.mrb[131].mxu1 }
 0x58b   :  { %3503 = vst.msk [vmem:[#allocation2 + $0x30] sm:$0xff] %vm7096_vm4, %v3487_v35  ;;  %v3488_v58 = vmax.f32 %v3472_v39, 0.0  ;;  %v3949_v42 = vadd.f32 %v3948_v59, %v3947_v14  ;;  %v3338_v11 = vadd.f32 %v3946_v40, %v3241_v17  ;;  %v7106_v39 = vld [vmem:[#allocation40_spill] sm:$0xff] }
 0x58d   :  { %3504 = vst.msk [vmem:[#allocation2 + $0x38] sm:$0xff] %vm7059_vm0, %v3488_v58  ;;  %v3341_v9 = vadd.f32 %v3949_v42, %v3244_v13  ;;  %v7107_v13 = vld [vmem:[#allocation22_spill] sm:$0xff] }
 0x58f   :  { %v3950_v21 = vpop.f32.mrb[132].mxu1 }
 0x590   :  { %v3951_v15 = vpop.f32.mrb[133].mxu1 }
 0x591   :  { %v3952_v43 = vadd.f32 %v3951_v15, %v3950_v21  ;;  %v3953_v20 = vpop.f32.mrb[134].mxu1 }
 0x592   :  { %v3954_v10 = vpop.f32.mrb[135].mxu1 }
 0x593   :  { %v3955_v8 = vadd.f32 %v3954_v10, %v3953_v20  ;;  %v3346_v37 = vadd.f32 %v3952_v43, %v3249_v50 }
 0x595   :  { %v3349_v61 = vadd.f32 %v3955_v8, %v3252_v26 }
 0x597   :  { %v3956_v33 = vpop.f32.mrb[136].mxu1 }
 0x598   :  { %v3957_v57 = vpop.f32.mrb[137].mxu1 }
 0x599   :  { %v3958_v38 = vadd.f32 %v3957_v57, %v3956_v33  ;;  %v3959_v56 = vpop.f32.mrb[138].mxu1 }
 0x59a   :  { %v3960_v53 = vpop.f32.mrb[139].mxu1 }
 0x59b   :  { %v3961_v29 = vadd.f32 %v3960_v53, %v3959_v56  ;;  %v3354_v47 = vadd.f32 %v3958_v38, %v6549_v7 }
 0x59d   :  { %v3357_v0 = vadd.f32 %v3961_v29, %v6552_v44  ;;  %v7098_v44 = vld [vmem:[#allocation36_spill] sm:$0xff] }
 0x59f   :  { %v3962_v60 = vpop.f32.mrb[140].mxu1 }
 0x5a0   :  { %v3963_v30 = vpop.f32.mrb[141].mxu1 }
 0x5a1   :  { %v3964_v24 = vadd.f32 %v3963_v30, %v3962_v60  ;;  %v3965_v55 = vpop.f32.mrb[142].mxu1 }
 0x5a2   :  { %v3966_v45 = vpop.f32.mrb[143].mxu1 }
 0x5a3   :  { %v3967_v63 = vadd.f32 %v3966_v45, %v3965_v55  ;;  %v3362_v34 = vadd.f32 %v3964_v24, %v6555_v3 }
 0x5a5   :  { %v3365_v46 = vadd.f32 %v3967_v63, %v6558_v31 }
 0x5a7   :  { %v4022_v28 = vpop.f32.mrb[144].mxu1 }
 0x5a8   :  { %v3443_v18 = vadd.f32 %v4022_v28, %v3346_v37  ;;  %v3434_v4 = vpop.f32.mrb[145].mxu1 }
 0x5a9   :  { %v3435_v25 = vadd.f32 %v3434_v4, %v3338_v11  ;;  %v4023_v6 = vpop.f32.mrb[146].mxu1  ;;  %v7108_v11 = vld [vmem:[#allocation41_spill] sm:$0xff] }
 0x5aa   :  { %v3475_v32 = vadd.f32 %v3443_v18, %v7097_v1  ;;  %v3446_v7 = vadd.f32 %v4023_v6, %v3349_v61  ;;  %v3437_v54 = vpop.f32.mrb[147].mxu1 }
 0x5ab   :  { %v3473_v49 = vadd.f32 %v3435_v25, %v7098_v44  ;;  %v3438_v16 = vadd.f32 %v3437_v54, %v3341_v9 }
 0x5ac   :  { %v3491_v51 = vmax.f32 %v3475_v32, 0.0  ;;  %v3476_v48 = vadd.f32 %v3446_v7, %v7099_v52 }
 0x5ad   :  { %v3489_v27 = vmax.f32 %v3473_v49, 0.0  ;;  %v3474_v3 = vadd.f32 %v3438_v16, %v7100_v22 }
 0x5ae   :  { %3507 = vst.msk [vmem:[#allocation2 + $0x50] sm:$0xff] %vm7101_vm9, %v3491_v51  ;;  %v3492_v31 = vmax.f32 %v3476_v48, 0.0 }
 0x5af   :  { %3505 = vst.msk [vmem:[#allocation2 + $0x40] sm:$0xff] %vm7102_vm14, %v3489_v27  ;;  %v3490_v41 = vmax.f32 %v3474_v3, 0.0  ;;  %v4026_v2 = vpop.f32.mrb[148].mxu1 }
 0x5b0   :  { %3508 = vst.msk [vmem:[#allocation2 + $0x58] sm:$0xff] %vm7103_vm12, %v3492_v31  ;;  %v3459_v12 = vadd.f32 %v4026_v2, %v3362_v34  ;;  %v3450_v19 = vpop.f32.mrb[149].mxu1 }
 0x5b1   :  { %3506 = vst.msk [vmem:[#allocation2 + $0x48] sm:$0xff] %vm7104_vm11, %v3490_v41  ;;  %v3451_v62 = vadd.f32 %v3450_v19, %v3354_v47  ;;  %v4027_v5 = vpop.f32.mrb[150].mxu1 }
 0x5b2   :  { %v3479_v17 = vadd.f32 %v3459_v12, %v7105_v36  ;;  %v3462_v35 = vadd.f32 %v4027_v5, %v3365_v46  ;;  %v3453_v23 = vpop.f32.mrb[151].mxu1 }
 0x5b3   :  { %v3477_v40 = vadd.f32 %v3451_v62, %v7106_v39  ;;  %v3454_v14 = vadd.f32 %v3453_v23, %v3357_v0 }
 0x5b4   :  { %v3495_v59 = vmax.f32 %v3479_v17, 0.0  ;;  %v3480_v58 = vadd.f32 %v3462_v35, %v7107_v13 }
 0x5b5   :  { %v3493_v42 = vmax.f32 %v3477_v40, 0.0  ;;  %v3478_v9 = vadd.f32 %v3454_v14, %v7108_v11 }
 0x5b6   :  { %3511 = vst.msk [vmem:[#allocation2 + $0x70] sm:$0xff] %vm7109_vm15, %v3495_v59  ;;  %v3496_v21 = vmax.f32 %v3480_v58, 0.0 }
 0x5b7   :  { %3509 = vst.msk [vmem:[#allocation2 + $0x60] sm:$0xff] %vm7110_vm6, %v3493_v42  ;;  %v3494_v15 = vmax.f32 %v3478_v9, 0.0 }
 0x5b8   :  { %3512 = vst.msk [vmem:[#allocation2 + $0x78] sm:$0xff] %vm7111_vm5, %v3496_v21 }
 0x5b9   :  { %3510 = vst.msk [vmem:[#allocation2 + $0x68] sm:$0xff] %vm7112_vm2, %v3494_v15 }
 0x5ba   :  { %4241 = shalt.err (!%p4238_p4)
}
 0x5bb   :  { %s4242_s20 = scalar_lea.hbm %s6644_s7, 2048 }
 0x5bc   :  { %p4243_p5 = scmp.ne.s32.totalorder %s6644_s7, %s4242_s20  ;;  %p4246_p6 = scmp.lt.u32.totalorder %s4242_s20, %s6644_s7 }
 0x5be   :  { %p4248_p7 = pnand %p4246_p6, %p4243_p5 }
 0x5c0   :  { %4251 = shalt.err (!%p4248_p7)
}
 0x5c1   :  { %s4257_s26 = smov 128   ;;  %s4258_s4 = smov 8  }
 0x5c2   :  { %3524 = dma.vmem_to_hbm [thread:$0]  %s3519_s3, 2048, %s6644_s7, [#allocation3], %s4257_s26, %s4257_s26, %s4258_s4  }
 0x5c3   :  { %4252 = dma.done.wait [#allocation3], 2048  }
 0x5c4   :  { %4253 = vsyncadd [#allocation3], 4294965248 }
 0x5c5   :  { %3528 = vsyncpa [#allocation3], 1 }

</bundles_post_ra>
